<compile_context>
chip_gen: v7x
topology: tpu7x:2x2x1
jax: 0.10.0
libtpu: 0.0.40
codegen_flags: <defaults>
</compile_context>

<pallas_src>
import functools
import math

import jax
import jax.numpy as jnp
from jax.experimental import pallas as pl
from jax.experimental.pallas import tpu as pltpu


# ----------------------------------------------------------------------------
# small helpers
# ----------------------------------------------------------------------------
def _round_up(x, m):
    return (x + m - 1) // m * m


def _pick_m_tile(m, cap=256):
    # multiple of 8, capped at `cap` (fits all of v5e/v6e/v7x VMEM comfortably)
    return min(cap, _round_up(m, 8))


def _pick_k_tile(kp, cap=512):
    # kp is a multiple of 128; return the largest multiple of 128 <= cap
    # that divides kp (128 always does).
    t = (min(cap, kp) // 128) * 128
    while kp % t:
        t -= 128
    return t


# ----------------------------------------------------------------------------
# Pallas kernels
# ----------------------------------------------------------------------------
def _mm_kernel(x_ref, w_ref, b_ref, o_ref, acc_ref, *, relu):
    # grid = (M_tiles, N_tiles, K_tiles); K is the reduction axis (last).
    k = pl.program_id(2)

    @pl.when(k == 0)
    def _():
        acc_ref[...] = jnp.zeros_like(acc_ref)

    acc_ref[...] += jnp.dot(x_ref[...], w_ref[...],
                            preferred_element_type=jnp.float32)

    @pl.when(k == pl.num_programs(2) - 1)
    def _():
        out = acc_ref[...] + b_ref[...]
        if relu:
            out = jnp.maximum(out, 0.0)
        o_ref[...] = out.astype(o_ref.dtype)


def pallas_dense(x, w, b, *, relu=False, out_dtype=jnp.float32):
    """(M, K) @ (K, N) + b  with optional fused ReLU.

    Batch is expected to be pre-flattened into M. K and N are zero-padded to
    multiples of 128 (lane-dense loads/stores), M is tiled; inputs are cast to
    bf16 with f32 accumulation.
    """
    M, K = x.shape
    K2, N = w.shape
    assert K == K2

    Kp = _round_up(K, 128)
    Np = _round_up(N, 128)
    tm = _pick_m_tile(M)
    Mp = _round_up(M, tm)
    tk = _pick_k_tile(Kp)
    tn = 128

    xp = jnp.pad(x, ((0, Mp - M), (0, Kp - K))).astype(jnp.bfloat16)
    wp = jnp.pad(w, ((0, Kp - K), (0, Np - N))).astype(jnp.bfloat16)
    bp = jnp.pad(b.reshape(1, N), ((0, 0), (0, Np - N))).astype(jnp.float32)

    grid = (Mp // tm, Np // tn, Kp // tk)
    out = pl.pallas_call(
        functools.partial(_mm_kernel, relu=relu),
        out_shape=jax.ShapeDtypeStruct((Mp, Np), out_dtype),
        grid=grid,
        in_specs=[
            pl.BlockSpec((tm, tk), lambda i, j, k: (i, k)),
            pl.BlockSpec((tk, tn), lambda i, j, k: (k, j)),
            pl.BlockSpec((1, tn), lambda i, j, k: (0, j)),
        ],
        out_specs=pl.BlockSpec((tm, tn), lambda i, j, k: (i, j)),
        scratch_shapes=[pltpu.VMEM((tm, tn), jnp.float32)],
        compiler_params=pltpu.CompilerParams(
            dimension_semantics=("parallel", "parallel", "arbitrary")),
    )(xp, wp, bp)
    return out[:M, :N]


def _head_kernel(xc_ref, xb_ref, wc_ref, wb_ref, bc_ref, bb_ref,
                 cls_ref, boxctr_ref, score_ref, acc_c, acc_b, *, ctr_col):
    # Fused FCOS prediction layers: cls logits, [box deltas | ctr logit] and
    # the score map sqrt(sigmoid(cls) * sigmoid(ctr)) in one pass.
    k = pl.program_id(1)

    @pl.when(k == 0)
    def _():
        acc_c[...] = jnp.zeros_like(acc_c)
        acc_b[...] = jnp.zeros_like(acc_b)

    acc_c[...] += jnp.dot(xc_ref[...], wc_ref[...],
                          preferred_element_type=jnp.float32)
    acc_b[...] += jnp.dot(xb_ref[...], wb_ref[...],
                          preferred_element_type=jnp.float32)

    @pl.when(k == pl.num_programs(1) - 1)
    def _():
        cls = acc_c[...] + bc_ref[...]
        bc = acc_b[...] + bb_ref[...]
        cls_ref[...] = cls.astype(cls_ref.dtype)
        boxctr_ref[...] = bc.astype(boxctr_ref.dtype)
        ctr = bc[:, ctr_col:ctr_col + 1]
        # sigmoid / sqrt use the EUP slot; effectively free behind the epilogue.
        score_ref[...] = jnp.sqrt(
            jax.nn.sigmoid(cls) * jax.nn.sigmoid(ctr)).astype(score_ref.dtype)


def pallas_fcos_head(cls_patches, box_patches, w_cls, b_cls, w_boxctr, b_boxctr):
    """Fused prediction head over the level-concatenated im2col patches.

    Returns (cls_logits (M, NC), boxctr (M, NB), scores (M, NC)); padded
    columns / rows are sliced off here (important: padded class columns have
    nonzero sigmoid, so they must never leak out).
    """
    M, K = cls_patches.shape
    NC = w_cls.shape[1]
    NB = w_boxctr.shape[1]

    Kp = _round_up(K, 128)
    NCp = _round_up(NC, 128)
    NBp = _round_up(NB, 128)
    tm = _pick_m_tile(M)
    Mp = _round_up(M, tm)
    tk = _pick_k_tile(Kp)

    xc = jnp.pad(cls_patches, ((0, Mp - M), (0, Kp - K))).astype(jnp.bfloat16)
    xb = jnp.pad(box_patches, ((0, Mp - M), (0, Kp - K))).astype(jnp.bfloat16)
    wc = jnp.pad(w_cls, ((0, Kp - K), (0, NCp - NC))).astype(jnp.bfloat16)
    wb = jnp.pad(w_boxctr, ((0, Kp - K), (0, NBp - NB))).astype(jnp.bfloat16)
    bc = jnp.pad(b_cls.reshape(1, NC), ((0, 0), (0, NCp - NC))).astype(jnp.float32)
    bb = jnp.pad(b_boxctr.reshape(1, NB), ((0, 0), (0, NBp - NB))).astype(jnp.float32)

    grid = (Mp // tm, Kp // tk)
    cls_out, boxctr_out, score_out = pl.pallas_call(
        functools.partial(_head_kernel, ctr_col=NB - 1),
        out_shape=(
            jax.ShapeDtypeStruct((Mp, NCp), jnp.float32),
            jax.ShapeDtypeStruct((Mp, NBp), jnp.float32),
            jax.ShapeDtypeStruct((Mp, NCp), jnp.float32),
        ),
        grid=grid,
        in_specs=[
            pl.BlockSpec((tm, tk), lambda i, k: (i, k)),
            pl.BlockSpec((tm, tk), lambda i, k: (i, k)),
            pl.BlockSpec((tk, NCp), lambda i, k: (k, 0)),
            pl.BlockSpec((tk, NBp), lambda i, k: (k, 0)),
            pl.BlockSpec((1, NCp), lambda i, k: (0, 0)),
            pl.BlockSpec((1, NBp), lambda i, k: (0, 0)),
        ],
        out_specs=(
            pl.BlockSpec((tm, NCp), lambda i, k: (i, 0)),
            pl.BlockSpec((tm, NBp), lambda i, k: (i, 0)),
            pl.BlockSpec((tm, NCp), lambda i, k: (i, 0)),
        ),
        scratch_shapes=[
            pltpu.VMEM((tm, NCp), jnp.float32),
            pltpu.VMEM((tm, NBp), jnp.float32),
        ],
        compiler_params=pltpu.CompilerParams(
            dimension_semantics=("parallel", "arbitrary")),
    )(xc, xb, wc, wb, bc, bb)
    return cls_out[:M, :NC], boxctr_out[:M, :NB], score_out[:M, :NC]


# ----------------------------------------------------------------------------
# Conv wrappers: im2col (glue) + Pallas matmul (hot path)
# ----------------------------------------------------------------------------
def _im2col(x, kh, kw, stride=1):
    """x: (B,H,W,Cin) -> patches (B*Ho*Wo, kh*kw*Cin), 'same' padding."""
    B, H, W, Cin = x.shape
    ph, pw = kh // 2, kw // 2
    xpad = jnp.pad(x, ((0, 0), (ph, ph), (pw, pw), (0, 0)))
    cols = [xpad[:, dy:dy + H, dx:dx + W, :]
            for dy in range(kh) for dx in range(kw)]
    patches = cols[0] if len(cols) == 1 else jnp.concatenate(cols, axis=-1)
    if stride > 1:
        patches = patches[:, ::stride, ::stride, :]
    Ho, Wo = patches.shape[1], patches.shape[2]
    return patches.reshape(B * Ho * Wo, kh * kw * Cin), (B, Ho, Wo)


def conv2d(x, w, b, *, stride=1, relu=False):
    """'same'-padded conv. x: (B,H,W,Cin), w: (kh,kw,Cin,Cout), b: (Cout,)."""
    kh, kw, Cin, Cout = w.shape
    pm, (B, Ho, Wo) = _im2col(x, kh, kw, stride)
    out = pallas_dense(pm, w.reshape(kh * kw * Cin, Cout), b, relu=relu)
    return out.reshape(B, Ho, Wo, Cout)


LEVELS = ("p3", "p4", "p5")


def conv2d_levels(feats, w, b, *, relu=False):
    """Shared-weight conv applied to all FPN levels with a single pallas_call
    (levels concatenated along M)."""
    kh, kw, Cin, Cout = w.shape
    patches, meta = [], []
    for name in LEVELS:
        pm, (B, Ho, Wo) = _im2col(feats[name], kh, kw, 1)
        patches.append(pm)
        meta.append((name, B, Ho, Wo))
    x = jnp.concatenate(patches, axis=0)
    out = pallas_dense(x, w.reshape(kh * kw * Cin, Cout), b, relu=relu)
    result, off = {}, 0
    for name, B, Ho, Wo in meta:
        n = B * Ho * Wo
        result[name] = out[off:off + n].reshape(B, Ho, Wo, Cout)
        off += n
    return result


def upsample_nearest_2x(x):
    # F.interpolate(mode="nearest") to the exactly-2x-larger FPN level.
    x = jnp.repeat(x, 2, axis=1)
    return jnp.repeat(x, 2, axis=2)


def fpn_locations(shape_hw, stride):
    # get_fpn_location_coords: center (x, y) of each feature cell.
    H, W = shape_hw
    ys = (jnp.arange(H, dtype=jnp.float32) + 0.5) * stride
    xs = (jnp.arange(W, dtype=jnp.float32) + 0.5) * stride
    gy, gx = jnp.meshgrid(ys, xs, indexing="ij")
    return jnp.stack([gx.reshape(-1), gy.reshape(-1)], axis=-1)  # (H*W, 2)


# ----------------------------------------------------------------------------
# Parameters (deterministic, synthetic init)
# ----------------------------------------------------------------------------
def conv_params(key, kh, kw, cin, cout, std=0.01, bias_const=0.0):
    w = std * jax.random.normal(key, (kh, kw, cin, cout), jnp.float32)
    b = jnp.full((cout,), bias_const, jnp.float32)
    return {"w": w, "b": b}


def init_fcos_params(key, num_classes, fpn_channels, stem_channels,
                     backbone_channels=(8, 16, 32, 64, 128)):
    keys = iter(jax.random.split(key, 64))
    p = {}
    # TODO(synk): real DetectorBackboneWithFPN uses a pretrained RegNet-X-400MF
    # trunk (c3/c4/c5 channels = 64/160/400); replaced by a deterministic
    # strided-conv backbone with the same strides (8/16/32).
    chans = (3,) + tuple(backbone_channels)
    p["backbone"] = [conv_params(next(keys), 3, 3, chans[i], chans[i + 1])
                     for i in range(len(backbone_channels))]
    c3c, c4c, c5c = backbone_channels[-3], backbone_channels[-2], backbone_channels[-1]
    p["lateral_c3"] = conv_params(next(keys), 1, 1, c3c, fpn_channels)
    p["lateral_c4"] = conv_params(next(keys), 1, 1, c4c, fpn_channels)
    p["lateral_c5"] = conv_params(next(keys), 1, 1, c5c, fpn_channels)
    p["output_p3"] = conv_params(next(keys), 3, 3, fpn_channels, fpn_channels)
    p["output_p4"] = conv_params(next(keys), 3, 3, fpn_channels, fpn_channels)
    p["output_p5"] = conv_params(next(keys), 3, 3, fpn_channels, fpn_channels)
    stem_cls, stem_box = [], []
    in_ch = fpn_channels
    for out_ch in stem_channels:  # normal(std=0.01) weights, zero bias (as in module)
        stem_cls.append(conv_params(next(keys), 3, 3, in_ch, out_ch))
        stem_box.append(conv_params(next(keys), 3, 3, in_ch, out_ch))
        in_ch = out_ch
    p["stem_cls"], p["stem_box"] = stem_cls, stem_box
    p["pred_cls"] = conv_params(next(keys), 3, 3, in_ch, num_classes,
                                bias_const=-math.log(99.0))
    p["pred_box"] = conv_params(next(keys), 3, 3, in_ch, 4)
    p["pred_ctr"] = conv_params(next(keys), 3, 3, in_ch, 1)
    return p


# ----------------------------------------------------------------------------
# FCOS forward
# ----------------------------------------------------------------------------
def fcos_forward(params, images_nchw):
    num_classes = params["pred_cls"]["w"].shape[-1]
    x = jnp.transpose(images_nchw, (0, 2, 3, 1))  # NCHW -> NHWC

    # ---- backbone (strides 8 / 16 / 32) ----
    feats = []
    for cp in params["backbone"]:
        x = conv2d(x, cp["w"], cp["b"], stride=2, relu=True)
        feats.append(x)
    c3, c4, c5 = feats[-3], feats[-2], feats[-1]

    # ---- FPN ----
    lat5 = conv2d(c5, params["lateral_c5"]["w"], params["lateral_c5"]["b"])
    p5 = conv2d(lat5, params["output_p5"]["w"], params["output_p5"]["b"])
    lat4 = conv2d(c4, params["lateral_c4"]["w"], params["lateral_c4"]["b"]) + upsample_nearest_2x(p5)
    p4 = conv2d(lat4, params["output_p4"]["w"], params["output_p4"]["b"])
    lat3 = conv2d(c3, params["lateral_c3"]["w"], params["lateral_c3"]["b"]) + upsample_nearest_2x(p4)
    p3 = conv2d(lat3, params["output_p3"]["w"], params["output_p3"]["b"])

    fpn_feats = {"p3": p3, "p4": p4, "p5": p5}
    strides = {"p3": 8, "p4": 16, "p5": 32}

    # ---- prediction head: shared weights -> one pallas_call per stem conv,
    # levels concatenated along M ----
    cls_f = dict(fpn_feats)
    box_f = dict(fpn_feats)
    for cp in params["stem_cls"]:
        cls_f = conv2d_levels(cls_f, cp["w"], cp["b"], relu=True)
    for cp in params["stem_box"]:
        box_f = conv2d_levels(box_f, cp["w"], cp["b"], relu=True)

    # Fused pred_cls / pred_box / pred_ctr (+ score map) over all levels.
    cls_patches, box_patches, meta = [], [], []
    for name in LEVELS:
        pc, (B, H, W) = _im2col(cls_f[name], 3, 3)
        pb, _ = _im2col(box_f[name], 3, 3)
        cls_patches.append(pc)
        box_patches.append(pb)
        meta.append((name, B, H, W))
    xc = jnp.concatenate(cls_patches, axis=0)
    xb = jnp.concatenate(box_patches, axis=0)

    K = xc.shape[1]
    w_cls = params["pred_cls"]["w"].reshape(K, -1)
    b_cls = params["pred_cls"]["b"]
    w_boxctr = jnp.concatenate(
        [params["pred_box"]["w"].reshape(K, -1),
         params["pred_ctr"]["w"].reshape(K, -1)], axis=1)      # (K, 5)
    b_boxctr = jnp.concatenate([params["pred_box"]["b"], params["pred_ctr"]["b"]])

    cls_all, boxctr_all, score_all = pallas_fcos_head(
        xc, xb, w_cls, b_cls, w_boxctr, b_boxctr)

    cls_logits, box_deltas, ctr_logits, locations, scores = {}, {}, {}, {}, {}
    off = 0
    for name, B, H, W in meta:
        n = B * H * W
        cls_logits[name] = cls_all[off:off + n].reshape(B, H * W, num_classes)
        bc = boxctr_all[off:off + n]
        box_deltas[name] = bc[:, :4].reshape(B, H * W, 4)
        ctr_logits[name] = bc[:, 4:5].reshape(B, H * W, 1)
        scores[name] = score_all[off:off + n].reshape(B, H * W, num_classes)
        locations[name] = fpn_locations((H, W), strides[name])
        off += n

    # TODO(synk): training losses (fcos_match_locations_to_gt, focal/L1/BCE) and
    # NMS-based inference post-processing are data-dependent host-side logic
    # with no clean Pallas equivalent; the dense per-location predictions above
    # are the Pallas-computed outputs.
    return cls_logits, box_deltas, ctr_logits, locations, scores


# ----------------------------------------------------------------------------
if __name__ == "__main__":
    key = jax.random.PRNGKey(0)
    pkey, ikey = jax.random.split(key)

    num_classes = 8
    fpn_channels = 32
    stem_channels = [32, 32]

    params = init_fcos_params(pkey, num_classes, fpn_channels, stem_channels)
    images = jax.random.normal(ikey, (2, 3, 64, 64), jnp.float32)  # (B, C, H, W)

    fcos_fn = jax.jit(fcos_forward)
    outs = fcos_fn(params, images)
    jax.block_until_ready(outs)

    cls_logits, box_deltas, ctr_logits, locations, scores = outs
    assert cls_logits["p3"].shape == (2, 64, num_classes)
    assert cls_logits["p4"].shape == (2, 16, num_classes)
    assert cls_logits["p5"].shape == (2, 4, num_classes)
    assert box_deltas["p3"].shape == (2, 64, 4)
    assert ctr_logits["p3"].shape == (2, 64, 1)
    assert locations["p3"].shape == (64, 2)
    assert scores["p5"].shape == (2, 4, num_classes)

    # fused score epilogue must equal sqrt(sigmoid(cls) * sigmoid(ctr))
    ref = jnp.sqrt(jax.nn.sigmoid(cls_logits["p3"]) * jax.nn.sigmoid(ctr_logits["p3"]))
    assert jnp.allclose(scores["p3"], ref, atol=1e-4)

    print("KERNEL_OK")
</pallas_src>

<mosaic_0001>
module attributes {stable_mosaic.version = 11 : i64} {
  func.func @_mm_kernel(%arg0: i32, %arg1: i32, %arg2: i32, %arg3: memref<256x128xbf16, #tpu.memory_space<vmem>>, %arg4: memref<128x128xbf16, #tpu.memory_space<vmem>>, %arg5: memref<1x128xf32, #tpu.memory_space<vmem>>, %arg6: memref<256x128xf32, #tpu.memory_space<vmem>>, %arg7: memref<256x128xf32, #tpu.memory_space<vmem>>) attributes {dimension_semantics = [#tpu.dimension_semantics<parallel>, #tpu.dimension_semantics<parallel>, #tpu.dimension_semantics<arbitrary>], iteration_bounds = array<i64: 8, 1, 1>, scalar_prefetch = 0 : i64, scratch_operands = 1 : i64, tpu.core_type = #tpu.core_type<tc>, window_params = [{transform_indices = @transform_0, window_bounds = array<i64: 256, 128>}, {transform_indices = @transform_1, window_bounds = array<i64: 128, 128>}, {transform_indices = @transform_2, window_bounds = array<i64: 1, 128>}, {transform_indices = @transform_3, window_bounds = array<i64: 256, 128>}]} {
    %c0_i32 = arith.constant 0 : i32
    %0 = arith.cmpi eq, %arg2, %c0_i32 : i32
    %1 = arith.extui %0 : i1 to i32
    %c0_i32_0 = arith.constant 0 : i32
    %2 = arith.cmpi ne, %1, %c0_i32_0 : i32
    scf.if %2 {
      %cst_10 = arith.constant 0.000000e+00 : f32
      %12 = vector.broadcast %cst_10 : f32 to vector<256x128xf32>
      %c0_11 = arith.constant 0 : index
      %c0_12 = arith.constant 0 : index
      %13 = vector.load %arg7[%c0_11, %c0_12] : memref<256x128xf32, #tpu.memory_space<vmem>>, vector<256x128xf32>
      tpu.vector_store %arg7[%c0_11, %c0_12], %12 {strides = array<i32>} : memref<256x128xf32, #tpu.memory_space<vmem>>, vector<256x128xf32>,
    } else {
    }
    %c0 = arith.constant 0 : index
    %c0_1 = arith.constant 0 : index
    %3 = vector.load %arg7[%c0, %c0_1] : memref<256x128xf32, #tpu.memory_space<vmem>>, vector<256x128xf32>
    %c0_2 = arith.constant 0 : index
    %c0_3 = arith.constant 0 : index
    %4 = vector.load %arg3[%c0_2, %c0_3] : memref<256x128xbf16, #tpu.memory_space<vmem>>, vector<256x128xbf16>
    %c0_4 = arith.constant 0 : index
    %c0_5 = arith.constant 0 : index
    %5 = vector.load %arg4[%c0_4, %c0_5] : memref<128x128xbf16, #tpu.memory_space<vmem>>, vector<128x128xbf16>
    %cst = arith.constant dense<0.000000e+00> : vector<256x128xf32>
    %6 = tpu.matmul %4, %5, %cst {dimension_numbers = #tpu.dot_dimension_numbers<[1], [0], [0], [1], [0, 0, 1, 1], [], []>} : vector<256x128xbf16>, vector<128x128xbf16>, vector<256x128xf32> -> vector<256x128xf32>
    %7 = arith.addf %3, %6 : vector<256x128xf32>
    %c0_6 = arith.constant 0 : index
    %c0_7 = arith.constant 0 : index
    %8 = vector.load %arg7[%c0_6, %c0_7] : memref<256x128xf32, #tpu.memory_space<vmem>>, vector<256x128xf32>
    tpu.vector_store %arg7[%c0_6, %c0_7], %7 {strides = array<i32>} : memref<256x128xf32, #tpu.memory_space<vmem>>, vector<256x128xf32>,
    %c0_i32_8 = arith.constant 0 : i32
    %9 = arith.cmpi eq, %arg2, %c0_i32_8 : i32
    %10 = arith.extui %9 : i1 to i32
    %c0_i32_9 = arith.constant 0 : i32
    %11 = arith.cmpi ne, %10, %c0_i32_9 : i32
    scf.if %11 {
      %c0_10 = arith.constant 0 : index
      %c0_11 = arith.constant 0 : index
      %12 = vector.load %arg7[%c0_10, %c0_11] : memref<256x128xf32, #tpu.memory_space<vmem>>, vector<256x128xf32>
      %c0_12 = arith.constant 0 : index
      %c0_13 = arith.constant 0 : index
      %13 = vector.load %arg5[%c0_12, %c0_13] : memref<1x128xf32, #tpu.memory_space<vmem>>, vector<1x128xf32>
      %14 = vector.broadcast %13 : vector<1x128xf32> to vector<256x128xf32>
      %15 = arith.addf %12, %14 : vector<256x128xf32>
      %cst_14 = arith.constant 0.000000e+00 : f32
      %16 = vector.broadcast %cst_14 : f32 to vector<256x128xf32>
      %17 = arith.maximumf %15, %16 : vector<256x128xf32>
      %c0_15 = arith.constant 0 : index
      %c0_16 = arith.constant 0 : index
      %18 = vector.load %arg6[%c0_15, %c0_16] : memref<256x128xf32, #tpu.memory_space<vmem>>, vector<256x128xf32>
      tpu.vector_store %arg6[%c0_15, %c0_16], %17 {strides = array<i32>} : memref<256x128xf32, #tpu.memory_space<vmem>>, vector<256x128xf32>,
    } else {
    }
    return
  }
  func.func @transform_0(%arg0: i32, %arg1: i32, %arg2: i32) -> (i32, i32) {
    %c0_i32 = arith.constant 0 : i32
    return %arg0, %arg2 : i32, i32
  }
  func.func @transform_1(%arg0: i32, %arg1: i32, %arg2: i32) -> (i32, i32) {
    %c0_i32 = arith.constant 0 : i32
    return %arg2, %arg1 : i32, i32
  }
  func.func @transform_2(%arg0: i32, %arg1: i32, %arg2: i32) -> (i32, i32) {
    %c0_i32 = arith.constant 0 : i32
    %c0_i32_0 = arith.constant 0 : i32
    return %c0_i32, %arg1 : i32, i32
  }
  func.func @transform_3(%arg0: i32, %arg1: i32, %arg2: i32) -> (i32, i32) {
    %c0_i32 = arith.constant 0 : i32
    return %arg0, %arg1 : i32, i32
  }
}

module attributes {stable_mosaic.version = 11 : i64} {
  func.func @_mm_kernel(%arg0: i32, %arg1: i32, %arg2: i32, %arg3: memref<256x128xbf16, #tpu.memory_space<vmem>>, %arg4: memref<128x128xbf16, #tpu.memory_space<vmem>>, %arg5: memref<1x128xf32, #tpu.memory_space<vmem>>, %arg6: memref<256x128xf32, #tpu.memory_space<vmem>>, %arg7: memref<256x128xf32, #tpu.memory_space<vmem>>) attributes {dimension_semantics = [#tpu.dimension_semantics<parallel>, #tpu.dimension_semantics<parallel>, #tpu.dimension_semantics<arbitrary>], iteration_bounds = array<i64: 2, 1, 1>, scalar_prefetch = 0 : i64, scratch_operands = 1 : i64, tpu.core_type = #tpu.core_type<tc>, window_params = [{transform_indices = @transform_0, window_bounds = array<i64: 256, 128>}, {transform_indices = @transform_1, window_bounds = array<i64: 128, 128>}, {transform_indices = @transform_2, window_bounds = array<i64: 1, 128>}, {transform_indices = @transform_3, window_bounds = array<i64: 256, 128>}]} {
    %c0_i32 = arith.constant 0 : i32
    %0 = arith.cmpi eq, %arg2, %c0_i32 : i32
    %1 = arith.extui %0 : i1 to i32
    %c0_i32_0 = arith.constant 0 : i32
    %2 = arith.cmpi ne, %1, %c0_i32_0 : i32
    scf.if %2 {
      %cst_10 = arith.constant 0.000000e+00 : f32
      %12 = vector.broadcast %cst_10 : f32 to vector<256x128xf32>
      %c0_11 = arith.constant 0 : index
      %c0_12 = arith.constant 0 : index
      %13 = vector.load %arg7[%c0_11, %c0_12] : memref<256x128xf32, #tpu.memory_space<vmem>>, vector<256x128xf32>
      tpu.vector_store %arg7[%c0_11, %c0_12], %12 {strides = array<i32>} : memref<256x128xf32, #tpu.memory_space<vmem>>, vector<256x128xf32>,
    } else {
    }
    %c0 = arith.constant 0 : index
    %c0_1 = arith.constant 0 : index
    %3 = vector.load %arg7[%c0, %c0_1] : memref<256x128xf32, #tpu.memory_space<vmem>>, vector<256x128xf32>
    %c0_2 = arith.constant 0 : index
    %c0_3 = arith.constant 0 : index
    %4 = vector.load %arg3[%c0_2, %c0_3] : memref<256x128xbf16, #tpu.memory_space<vmem>>, vector<256x128xbf16>
    %c0_4 = arith.constant 0 : index
    %c0_5 = arith.constant 0 : index
    %5 = vector.load %arg4[%c0_4, %c0_5] : memref<128x128xbf16, #tpu.memory_space<vmem>>, vector<128x128xbf16>
    %cst = arith.constant dense<0.000000e+00> : vector<256x128xf32>
    %6 = tpu.matmul %4, %5, %cst {dimension_numbers = #tpu.dot_dimension_numbers<[1], [0], [0], [1], [0, 0, 1, 1], [], []>} : vector<256x128xbf16>, vector<128x128xbf16>, vector<256x128xf32> -> vector<256x128xf32>
    %7 = arith.addf %3, %6 : vector<256x128xf32>
    %c0_6 = arith.constant 0 : index
    %c0_7 = arith.constant 0 : index
    %8 = vector.load %arg7[%c0_6, %c0_7] : memref<256x128xf32, #tpu.memory_space<vmem>>, vector<256x128xf32>
    tpu.vector_store %arg7[%c0_6, %c0_7], %7 {strides = array<i32>} : memref<256x128xf32, #tpu.memory_space<vmem>>, vector<256x128xf32>,
    %c0_i32_8 = arith.constant 0 : i32
    %9 = arith.cmpi eq, %arg2, %c0_i32_8 : i32
    %10 = arith.extui %9 : i1 to i32
    %c0_i32_9 = arith.constant 0 : i32
    %11 = arith.cmpi ne, %10, %c0_i32_9 : i32
    scf.if %11 {
      %c0_10 = arith.constant 0 : index
      %c0_11 = arith.constant 0 : index
      %12 = vector.load %arg7[%c0_10, %c0_11] : memref<256x128xf32, #tpu.memory_space<vmem>>, vector<256x128xf32>
      %c0_12 = arith.constant 0 : index
      %c0_13 = arith.constant 0 : index
      %13 = vector.load %arg5[%c0_12, %c0_13] : memref<1x128xf32, #tpu.memory_space<vmem>>, vector<1x128xf32>
      %14 = vector.broadcast %13 : vector<1x128xf32> to vector<256x128xf32>
      %15 = arith.addf %12, %14 : vector<256x128xf32>
      %cst_14 = arith.constant 0.000000e+00 : f32
      %16 = vector.broadcast %cst_14 : f32 to vector<256x128xf32>
      %17 = arith.maximumf %15, %16 : vector<256x128xf32>
      %c0_15 = arith.constant 0 : index
      %c0_16 = arith.constant 0 : index
      %18 = vector.load %arg6[%c0_15, %c0_16] : memref<256x128xf32, #tpu.memory_space<vmem>>, vector<256x128xf32>
      tpu.vector_store %arg6[%c0_15, %c0_16], %17 {strides = array<i32>} : memref<256x128xf32, #tpu.memory_space<vmem>>, vector<256x128xf32>,
    } else {
    }
    return
  }
  func.func @transform_0(%arg0: i32, %arg1: i32, %arg2: i32) -> (i32, i32) {
    %c0_i32 = arith.constant 0 : i32
    return %arg0, %arg2 : i32, i32
  }
  func.func @transform_1(%arg0: i32, %arg1: i32, %arg2: i32) -> (i32, i32) {
    %c0_i32 = arith.constant 0 : i32
    return %arg2, %arg1 : i32, i32
  }
  func.func @transform_2(%arg0: i32, %arg1: i32, %arg2: i32) -> (i32, i32) {
    %c0_i32 = arith.constant 0 : i32
    %c0_i32_0 = arith.constant 0 : i32
    return %c0_i32, %arg1 : i32, i32
  }
  func.func @transform_3(%arg0: i32, %arg1: i32, %arg2: i32) -> (i32, i32) {
    %c0_i32 = arith.constant 0 : i32
    return %arg0, %arg1 : i32, i32
  }
}

module attributes {stable_mosaic.version = 11 : i64} {
  func.func @_mm_kernel(%arg0: i32, %arg1: i32, %arg2: i32, %arg3: memref<128x256xbf16, #tpu.memory_space<vmem>>, %arg4: memref<256x128xbf16, #tpu.memory_space<vmem>>, %arg5: memref<1x128xf32, #tpu.memory_space<vmem>>, %arg6: memref<128x128xf32, #tpu.memory_space<vmem>>, %arg7: memref<128x128xf32, #tpu.memory_space<vmem>>) attributes {dimension_semantics = [#tpu.dimension_semantics<parallel>, #tpu.dimension_semantics<parallel>, #tpu.dimension_semantics<arbitrary>], iteration_bounds = array<i64: 1, 1, 1>, scalar_prefetch = 0 : i64, scratch_operands = 1 : i64, tpu.core_type = #tpu.core_type<tc>, window_params = [{transform_indices = @transform_0, window_bounds = array<i64: 128, 256>}, {transform_indices = @transform_1, window_bounds = array<i64: 256, 128>}, {transform_indices = @transform_2, window_bounds = array<i64: 1, 128>}, {transform_indices = @transform_3, window_bounds = array<i64: 128, 128>}]} {
    %c0_i32 = arith.constant 0 : i32
    %0 = arith.cmpi eq, %arg2, %c0_i32 : i32
    %1 = arith.extui %0 : i1 to i32
    %c0_i32_0 = arith.constant 0 : i32
    %2 = arith.cmpi ne, %1, %c0_i32_0 : i32
    scf.if %2 {
      %cst_10 = arith.constant 0.000000e+00 : f32
      %12 = vector.broadcast %cst_10 : f32 to vector<128x128xf32>
      %c0_11 = arith.constant 0 : index
      %c0_12 = arith.constant 0 : index
      %13 = vector.load %arg7[%c0_11, %c0_12] : memref<128x128xf32, #tpu.memory_space<vmem>>, vector<128x128xf32>
      tpu.vector_store %arg7[%c0_11, %c0_12], %12 {strides = array<i32>} : memref<128x128xf32, #tpu.memory_space<vmem>>, vector<128x128xf32>,
    } else {
    }
    %c0 = arith.constant 0 : index
    %c0_1 = arith.constant 0 : index
    %3 = vector.load %arg7[%c0, %c0_1] : memref<128x128xf32, #tpu.memory_space<vmem>>, vector<128x128xf32>
    %c0_2 = arith.constant 0 : index
    %c0_3 = arith.constant 0 : index
    %4 = vector.load %arg3[%c0_2, %c0_3] : memref<128x256xbf16, #tpu.memory_space<vmem>>, vector<128x256xbf16>
    %c0_4 = arith.constant 0 : index
    %c0_5 = arith.constant 0 : index
    %5 = vector.load %arg4[%c0_4, %c0_5] : memref<256x128xbf16, #tpu.memory_space<vmem>>, vector<256x128xbf16>
    %cst = arith.constant dense<0.000000e+00> : vector<128x128xf32>
    %6 = tpu.matmul %4, %5, %cst {dimension_numbers = #tpu.dot_dimension_numbers<[1], [0], [0], [1], [0, 0, 1, 1], [], []>} : vector<128x256xbf16>, vector<256x128xbf16>, vector<128x128xf32> -> vector<128x128xf32>
    %7 = arith.addf %3, %6 : vector<128x128xf32>
    %c0_6 = arith.constant 0 : index
    %c0_7 = arith.constant 0 : index
    %8 = vector.load %arg7[%c0_6, %c0_7] : memref<128x128xf32, #tpu.memory_space<vmem>>, vector<128x128xf32>
    tpu.vector_store %arg7[%c0_6, %c0_7], %7 {strides = array<i32>} : memref<128x128xf32, #tpu.memory_space<vmem>>, vector<128x128xf32>,
    %c0_i32_8 = arith.constant 0 : i32
    %9 = arith.cmpi eq, %arg2, %c0_i32_8 : i32
    %10 = arith.extui %9 : i1 to i32
    %c0_i32_9 = arith.constant 0 : i32
    %11 = arith.cmpi ne, %10, %c0_i32_9 : i32
    scf.if %11 {
      %c0_10 = arith.constant 0 : index
      %c0_11 = arith.constant 0 : index
      %12 = vector.load %arg7[%c0_10, %c0_11] : memref<128x128xf32, #tpu.memory_space<vmem>>, vector<128x128xf32>
      %c0_12 = arith.constant 0 : index
      %c0_13 = arith.constant 0 : index
      %13 = vector.load %arg5[%c0_12, %c0_13] : memref<1x128xf32, #tpu.memory_space<vmem>>, vector<1x128xf32>
      %14 = vector.broadcast %13 : vector<1x128xf32> to vector<128x128xf32>
      %15 = arith.addf %12, %14 : vector<128x128xf32>
      %cst_14 = arith.constant 0.000000e+00 : f32
      %16 = vector.broadcast %cst_14 : f32 to vector<128x128xf32>
      %17 = arith.maximumf %15, %16 : vector<128x128xf32>
      %c0_15 = arith.constant 0 : index
      %c0_16 = arith.constant 0 : index
      %18 = vector.load %arg6[%c0_15, %c0_16] : memref<128x128xf32, #tpu.memory_space<vmem>>, vector<128x128xf32>
      tpu.vector_store %arg6[%c0_15, %c0_16], %17 {strides = array<i32>} : memref<128x128xf32, #tpu.memory_space<vmem>>, vector<128x128xf32>,
    } else {
    }
    return
  }
  func.func @transform_0(%arg0: i32, %arg1: i32, %arg2: i32) -> (i32, i32) {
    %c0_i32 = arith.constant 0 : i32
    return %arg0, %arg2 : i32, i32
  }
  func.func @transform_1(%arg0: i32, %arg1: i32, %arg2: i32) -> (i32, i32) {
    %c0_i32 = arith.constant 0 : i32
    return %arg2, %arg1 : i32, i32
  }
  func.func @transform_2(%arg0: i32, %arg1: i32, %arg2: i32) -> (i32, i32) {
    %c0_i32 = arith.constant 0 : i32
    %c0_i32_0 = arith.constant 0 : i32
    return %c0_i32, %arg1 : i32, i32
  }
  func.func @transform_3(%arg0: i32, %arg1: i32, %arg2: i32) -> (i32, i32) {
    %c0_i32 = arith.constant 0 : i32
    return %arg0, %arg1 : i32, i32
  }
}

module attributes {stable_mosaic.version = 11 : i64} {
  func.func @_mm_kernel(%arg0: i32, %arg1: i32, %arg2: i32, %arg3: memref<32x384xbf16, #tpu.memory_space<vmem>>, %arg4: memref<384x128xbf16, #tpu.memory_space<vmem>>, %arg5: memref<1x128xf32, #tpu.memory_space<vmem>>, %arg6: memref<32x128xf32, #tpu.memory_space<vmem>>, %arg7: memref<32x128xf32, #tpu.memory_space<vmem>>) attributes {dimension_semantics = [#tpu.dimension_semantics<parallel>, #tpu.dimension_semantics<parallel>, #tpu.dimension_semantics<arbitrary>], iteration_bounds = array<i64: 1, 1, 1>, scalar_prefetch = 0 : i64, scratch_operands = 1 : i64, tpu.core_type = #tpu.core_type<tc>, window_params = [{transform_indices = @transform_0, window_bounds = array<i64: 32, 384>}, {transform_indices = @transform_1, window_bounds = array<i64: 384, 128>}, {transform_indices = @transform_2, window_bounds = array<i64: 1, 128>}, {transform_indices = @transform_3, window_bounds = array<i64: 32, 128>}]} {
    %c0_i32 = arith.constant 0 : i32
    %0 = arith.cmpi eq, %arg2, %c0_i32 : i32
    %1 = arith.extui %0 : i1 to i32
    %c0_i32_0 = arith.constant 0 : i32
    %2 = arith.cmpi ne, %1, %c0_i32_0 : i32
    scf.if %2 {
      %cst_10 = arith.constant 0.000000e+00 : f32
      %12 = vector.broadcast %cst_10 : f32 to vector<32x128xf32>
      %c0_11 = arith.constant 0 : index
      %c0_12 = arith.constant 0 : index
      %13 = vector.load %arg7[%c0_11, %c0_12] : memref<32x128xf32, #tpu.memory_space<vmem>>, vector<32x128xf32>
      tpu.vector_store %arg7[%c0_11, %c0_12], %12 {strides = array<i32>} : memref<32x128xf32, #tpu.memory_space<vmem>>, vector<32x128xf32>,
    } else {
    }
    %c0 = arith.constant 0 : index
    %c0_1 = arith.constant 0 : index
    %3 = vector.load %arg7[%c0, %c0_1] : memref<32x128xf32, #tpu.memory_space<vmem>>, vector<32x128xf32>
    %c0_2 = arith.constant 0 : index
    %c0_3 = arith.constant 0 : index
    %4 = vector.load %arg3[%c0_2, %c0_3] : memref<32x384xbf16, #tpu.memory_space<vmem>>, vector<32x384xbf16>
    %c0_4 = arith.constant 0 : index
    %c0_5 = arith.constant 0 : index
    %5 = vector.load %arg4[%c0_4, %c0_5] : memref<384x128xbf16, #tpu.memory_space<vmem>>, vector<384x128xbf16>
    %cst = arith.constant dense<0.000000e+00> : vector<32x128xf32>
    %6 = tpu.matmul %4, %5, %cst {dimension_numbers = #tpu.dot_dimension_numbers<[1], [0], [0], [1], [0, 0, 1, 1], [], []>} : vector<32x384xbf16>, vector<384x128xbf16>, vector<32x128xf32> -> vector<32x128xf32>
    %7 = arith.addf %3, %6 : vector<32x128xf32>
    %c0_6 = arith.constant 0 : index
    %c0_7 = arith.constant 0 : index
    %8 = vector.load %arg7[%c0_6, %c0_7] : memref<32x128xf32, #tpu.memory_space<vmem>>, vector<32x128xf32>
    tpu.vector_store %arg7[%c0_6, %c0_7], %7 {strides = array<i32>} : memref<32x128xf32, #tpu.memory_space<vmem>>, vector<32x128xf32>,
    %c0_i32_8 = arith.constant 0 : i32
    %9 = arith.cmpi eq, %arg2, %c0_i32_8 : i32
    %10 = arith.extui %9 : i1 to i32
    %c0_i32_9 = arith.constant 0 : i32
    %11 = arith.cmpi ne, %10, %c0_i32_9 : i32
    scf.if %11 {
      %c0_10 = arith.constant 0 : index
      %c0_11 = arith.constant 0 : index
      %12 = vector.load %arg7[%c0_10, %c0_11] : memref<32x128xf32, #tpu.memory_space<vmem>>, vector<32x128xf32>
      %c0_12 = arith.constant 0 : index
      %c0_13 = arith.constant 0 : index
      %13 = vector.load %arg5[%c0_12, %c0_13] : memref<1x128xf32, #tpu.memory_space<vmem>>, vector<1x128xf32>
      %14 = vector.broadcast %13 : vector<1x128xf32> to vector<32x128xf32>
      %15 = arith.addf %12, %14 : vector<32x128xf32>
      %cst_14 = arith.constant 0.000000e+00 : f32
      %16 = vector.broadcast %cst_14 : f32 to vector<32x128xf32>
      %17 = arith.maximumf %15, %16 : vector<32x128xf32>
      %c0_15 = arith.constant 0 : index
      %c0_16 = arith.constant 0 : index
      %18 = vector.load %arg6[%c0_15, %c0_16] : memref<32x128xf32, #tpu.memory_space<vmem>>, vector<32x128xf32>
      tpu.vector_store %arg6[%c0_15, %c0_16], %17 {strides = array<i32>} : memref<32x128xf32, #tpu.memory_space<vmem>>, vector<32x128xf32>,
    } else {
    }
    return
  }
  func.func @transform_0(%arg0: i32, %arg1: i32, %arg2: i32) -> (i32, i32) {
    %c0_i32 = arith.constant 0 : i32
    return %arg0, %arg2 : i32, i32
  }
  func.func @transform_1(%arg0: i32, %arg1: i32, %arg2: i32) -> (i32, i32) {
    %c0_i32 = arith.constant 0 : i32
    return %arg2, %arg1 : i32, i32
  }
  func.func @transform_2(%arg0: i32, %arg1: i32, %arg2: i32) -> (i32, i32) {
    %c0_i32 = arith.constant 0 : i32
    %c0_i32_0 = arith.constant 0 : i32
    return %c0_i32, %arg1 : i32, i32
  }
  func.func @transform_3(%arg0: i32, %arg1: i32, %arg2: i32) -> (i32, i32) {
    %c0_i32 = arith.constant 0 : i32
    return %arg0, %arg1 : i32, i32
  }
}

module attributes {stable_mosaic.version = 11 : i64} {
  func.func @_mm_kernel(%arg0: i32, %arg1: i32, %arg2: i32, %arg3: memref<8x128xbf16, #tpu.memory_space<vmem>>, %arg4: memref<128x128xbf16, #tpu.memory_space<vmem>>, %arg5: memref<1x128xf32, #tpu.memory_space<vmem>>, %arg6: memref<8x128xf32, #tpu.memory_space<vmem>>, %arg7: memref<8x128xf32, #tpu.memory_space<vmem>>) attributes {dimension_semantics = [#tpu.dimension_semantics<parallel>, #tpu.dimension_semantics<parallel>, #tpu.dimension_semantics<arbitrary>], iteration_bounds = array<i64: 1, 1, 5>, scalar_prefetch = 0 : i64, scratch_operands = 1 : i64, tpu.core_type = #tpu.core_type<tc>, window_params = [{transform_indices = @transform_0, window_bounds = array<i64: 8, 128>}, {transform_indices = @transform_1, window_bounds = array<i64: 128, 128>}, {transform_indices = @transform_2, window_bounds = array<i64: 1, 128>}, {transform_indices = @transform_3, window_bounds = array<i64: 8, 128>}]} {
    %c0_i32 = arith.constant 0 : i32
    %0 = arith.cmpi eq, %arg2, %c0_i32 : i32
    %1 = arith.extui %0 : i1 to i32
    %c0_i32_0 = arith.constant 0 : i32
    %2 = arith.cmpi ne, %1, %c0_i32_0 : i32
    scf.if %2 {
      %cst_9 = arith.constant 0.000000e+00 : f32
      %12 = vector.broadcast %cst_9 : f32 to vector<8x128xf32>
      %c0_10 = arith.constant 0 : index
      %c0_11 = arith.constant 0 : index
      %13 = vector.load %arg7[%c0_10, %c0_11] : memref<8x128xf32, #tpu.memory_space<vmem>>, vector<8x128xf32>
      tpu.vector_store %arg7[%c0_10, %c0_11], %12 {strides = array<i32>} : memref<8x128xf32, #tpu.memory_space<vmem>>, vector<8x128xf32>,
    } else {
    }
    %c0 = arith.constant 0 : index
    %c0_1 = arith.constant 0 : index
    %3 = vector.load %arg7[%c0, %c0_1] : memref<8x128xf32, #tpu.memory_space<vmem>>, vector<8x128xf32>
    %c0_2 = arith.constant 0 : index
    %c0_3 = arith.constant 0 : index
    %4 = vector.load %arg3[%c0_2, %c0_3] : memref<8x128xbf16, #tpu.memory_space<vmem>>, vector<8x128xbf16>
    %c0_4 = arith.constant 0 : index
    %c0_5 = arith.constant 0 : index
    %5 = vector.load %arg4[%c0_4, %c0_5] : memref<128x128xbf16, #tpu.memory_space<vmem>>, vector<128x128xbf16>
    %cst = arith.constant dense<0.000000e+00> : vector<8x128xf32>
    %6 = tpu.matmul %4, %5, %cst {dimension_numbers = #tpu.dot_dimension_numbers<[1], [0], [0], [1], [0, 0, 1, 1], [], []>} : vector<8x128xbf16>, vector<128x128xbf16>, vector<8x128xf32> -> vector<8x128xf32>
    %7 = arith.addf %3, %6 : vector<8x128xf32>
    %c0_6 = arith.constant 0 : index
    %c0_7 = arith.constant 0 : index
    %8 = vector.load %arg7[%c0_6, %c0_7] : memref<8x128xf32, #tpu.memory_space<vmem>>, vector<8x128xf32>
    tpu.vector_store %arg7[%c0_6, %c0_7], %7 {strides = array<i32>} : memref<8x128xf32, #tpu.memory_space<vmem>>, vector<8x128xf32>,
    %c4_i32 = arith.constant 4 : i32
    %9 = arith.cmpi eq, %arg2, %c4_i32 : i32
    %10 = arith.extui %9 : i1 to i32
    %c0_i32_8 = arith.constant 0 : i32
    %11 = arith.cmpi ne, %10, %c0_i32_8 : i32
    scf.if %11 {
      %c0_9 = arith.constant 0 : index
      %c0_10 = arith.constant 0 : index
      %12 = vector.load %arg7[%c0_9, %c0_10] : memref<8x128xf32, #tpu.memory_space<vmem>>, vector<8x128xf32>
      %c0_11 = arith.constant 0 : index
      %c0_12 = arith.constant 0 : index
      %13 = vector.load %arg5[%c0_11, %c0_12] : memref<1x128xf32, #tpu.memory_space<vmem>>, vector<1x128xf32>
      %14 = vector.broadcast %13 : vector<1x128xf32> to vector<8x128xf32>
      %15 = arith.addf %12, %14 : vector<8x128xf32>
      %cst_13 = arith.constant 0.000000e+00 : f32
      %16 = vector.broadcast %cst_13 : f32 to vector<8x128xf32>
      %17 = arith.maximumf %15, %16 : vector<8x128xf32>
      %c0_14 = arith.constant 0 : index
      %c0_15 = arith.constant 0 : index
      %18 = vector.load %arg6[%c0_14, %c0_15] : memref<8x128xf32, #tpu.memory_space<vmem>>, vector<8x128xf32>
      tpu.vector_store %arg6[%c0_14, %c0_15], %17 {strides = array<i32>} : memref<8x128xf32, #tpu.memory_space<vmem>>, vector<8x128xf32>,
    } else {
    }
    return
  }
  func.func @transform_0(%arg0: i32, %arg1: i32, %arg2: i32) -> (i32, i32) {
    %c0_i32 = arith.constant 0 : i32
    return %arg0, %arg2 : i32, i32
  }
  func.func @transform_1(%arg0: i32, %arg1: i32, %arg2: i32) -> (i32, i32) {
    %c0_i32 = arith.constant 0 : i32
    return %arg2, %arg1 : i32, i32
  }
  func.func @transform_2(%arg0: i32, %arg1: i32, %arg2: i32) -> (i32, i32) {
    %c0_i32 = arith.constant 0 : i32
    %c0_i32_0 = arith.constant 0 : i32
    return %c0_i32, %arg1 : i32, i32
  }
  func.func @transform_3(%arg0: i32, %arg1: i32, %arg2: i32) -> (i32, i32) {
    %c0_i32 = arith.constant 0 : i32
    return %arg0, %arg1 : i32, i32
  }
}

module attributes {stable_mosaic.version = 11 : i64} {
  func.func @_mm_kernel(%arg0: i32, %arg1: i32, %arg2: i32, %arg3: memref<8x128xbf16, #tpu.memory_space<vmem>>, %arg4: memref<128x128xbf16, #tpu.memory_space<vmem>>, %arg5: memref<1x128xf32, #tpu.memory_space<vmem>>, %arg6: memref<8x128xf32, #tpu.memory_space<vmem>>, %arg7: memref<8x128xf32, #tpu.memory_space<vmem>>) attributes {dimension_semantics = [#tpu.dimension_semantics<parallel>, #tpu.dimension_semantics<parallel>, #tpu.dimension_semantics<arbitrary>], iteration_bounds = array<i64: 1, 1, 1>, scalar_prefetch = 0 : i64, scratch_operands = 1 : i64, tpu.core_type = #tpu.core_type<tc>, window_params = [{transform_indices = @transform_0, window_bounds = array<i64: 8, 128>}, {transform_indices = @transform_1, window_bounds = array<i64: 128, 128>}, {transform_indices = @transform_2, window_bounds = array<i64: 1, 128>}, {transform_indices = @transform_3, window_bounds = array<i64: 8, 128>}]} {
    %c0_i32 = arith.constant 0 : i32
    %0 = arith.cmpi eq, %arg2, %c0_i32 : i32
    %1 = arith.extui %0 : i1 to i32
    %c0_i32_0 = arith.constant 0 : i32
    %2 = arith.cmpi ne, %1, %c0_i32_0 : i32
    scf.if %2 {
      %cst_10 = arith.constant 0.000000e+00 : f32
      %12 = vector.broadcast %cst_10 : f32 to vector<8x128xf32>
      %c0_11 = arith.constant 0 : index
      %c0_12 = arith.constant 0 : index
      %13 = vector.load %arg7[%c0_11, %c0_12] : memref<8x128xf32, #tpu.memory_space<vmem>>, vector<8x128xf32>
      tpu.vector_store %arg7[%c0_11, %c0_12], %12 {strides = array<i32>} : memref<8x128xf32, #tpu.memory_space<vmem>>, vector<8x128xf32>,
    } else {
    }
    %c0 = arith.constant 0 : index
    %c0_1 = arith.constant 0 : index
    %3 = vector.load %arg7[%c0, %c0_1] : memref<8x128xf32, #tpu.memory_space<vmem>>, vector<8x128xf32>
    %c0_2 = arith.constant 0 : index
    %c0_3 = arith.constant 0 : index
    %4 = vector.load %arg3[%c0_2, %c0_3] : memref<8x128xbf16, #tpu.memory_space<vmem>>, vector<8x128xbf16>
    %c0_4 = arith.constant 0 : index
    %c0_5 = arith.constant 0 : index
    %5 = vector.load %arg4[%c0_4, %c0_5] : memref<128x128xbf16, #tpu.memory_space<vmem>>, vector<128x128xbf16>
    %cst = arith.constant dense<0.000000e+00> : vector<8x128xf32>
    %6 = tpu.matmul %4, %5, %cst {dimension_numbers = #tpu.dot_dimension_numbers<[1], [0], [0], [1], [0, 0, 1, 1], [], []>} : vector<8x128xbf16>, vector<128x128xbf16>, vector<8x128xf32> -> vector<8x128xf32>
    %7 = arith.addf %3, %6 : vector<8x128xf32>
    %c0_6 = arith.constant 0 : index
    %c0_7 = arith.constant 0 : index
    %8 = vector.load %arg7[%c0_6, %c0_7] : memref<8x128xf32, #tpu.memory_space<vmem>>, vector<8x128xf32>
    tpu.vector_store %arg7[%c0_6, %c0_7], %7 {strides = array<i32>} : memref<8x128xf32, #tpu.memory_space<vmem>>, vector<8x128xf32>,
    %c0_i32_8 = arith.constant 0 : i32
    %9 = arith.cmpi eq, %arg2, %c0_i32_8 : i32
    %10 = arith.extui %9 : i1 to i32
    %c0_i32_9 = arith.constant 0 : i32
    %11 = arith.cmpi ne, %10, %c0_i32_9 : i32
    scf.if %11 {
      %c0_10 = arith.constant 0 : index
      %c0_11 = arith.constant 0 : index
      %12 = vector.load %arg7[%c0_10, %c0_11] : memref<8x128xf32, #tpu.memory_space<vmem>>, vector<8x128xf32>
      %c0_12 = arith.constant 0 : index
      %c0_13 = arith.constant 0 : index
      %13 = vector.load %arg5[%c0_12, %c0_13] : memref<1x128xf32, #tpu.memory_space<vmem>>, vector<1x128xf32>
      %14 = vector.broadcast %13 : vector<1x128xf32> to vector<8x128xf32>
      %15 = arith.addf %12, %14 : vector<8x128xf32>
      %c0_14 = arith.constant 0 : index
      %c0_15 = arith.constant 0 : index
      %16 = vector.load %arg6[%c0_14, %c0_15] : memref<8x128xf32, #tpu.memory_space<vmem>>, vector<8x128xf32>
      tpu.vector_store %arg6[%c0_14, %c0_15], %15 {strides = array<i32>} : memref<8x128xf32, #tpu.memory_space<vmem>>, vector<8x128xf32>,
    } else {
    }
    return
  }
  func.func @transform_0(%arg0: i32, %arg1: i32, %arg2: i32) -> (i32, i32) {
    %c0_i32 = arith.constant 0 : i32
    return %arg0, %arg2 : i32, i32
  }
  func.func @transform_1(%arg0: i32, %arg1: i32, %arg2: i32) -> (i32, i32) {
    %c0_i32 = arith.constant 0 : i32
    return %arg2, %arg1 : i32, i32
  }
  func.func @transform_2(%arg0: i32, %arg1: i32, %arg2: i32) -> (i32, i32) {
    %c0_i32 = arith.constant 0 : i32
    %c0_i32_0 = arith.constant 0 : i32
    return %c0_i32, %arg1 : i32, i32
  }
  func.func @transform_3(%arg0: i32, %arg1: i32, %arg2: i32) -> (i32, i32) {
    %c0_i32 = arith.constant 0 : i32
    return %arg0, %arg1 : i32, i32
  }
}

module attributes {stable_mosaic.version = 11 : i64} {
  func.func @_mm_kernel(%arg0: i32, %arg1: i32, %arg2: i32, %arg3: memref<8x384xbf16, #tpu.memory_space<vmem>>, %arg4: memref<384x128xbf16, #tpu.memory_space<vmem>>, %arg5: memref<1x128xf32, #tpu.memory_space<vmem>>, %arg6: memref<8x128xf32, #tpu.memory_space<vmem>>, %arg7: memref<8x128xf32, #tpu.memory_space<vmem>>) attributes {dimension_semantics = [#tpu.dimension_semantics<parallel>, #tpu.dimension_semantics<parallel>, #tpu.dimension_semantics<arbitrary>], iteration_bounds = array<i64: 1, 1, 1>, scalar_prefetch = 0 : i64, scratch_operands = 1 : i64, tpu.core_type = #tpu.core_type<tc>, window_params = [{transform_indices = @transform_0, window_bounds = array<i64: 8, 384>}, {transform_indices = @transform_1, window_bounds = array<i64: 384, 128>}, {transform_indices = @transform_2, window_bounds = array<i64: 1, 128>}, {transform_indices = @transform_3, window_bounds = array<i64: 8, 128>}]} {
    %c0_i32 = arith.constant 0 : i32
    %0 = arith.cmpi eq, %arg2, %c0_i32 : i32
    %1 = arith.extui %0 : i1 to i32
    %c0_i32_0 = arith.constant 0 : i32
    %2 = arith.cmpi ne, %1, %c0_i32_0 : i32
    scf.if %2 {
      %cst_10 = arith.constant 0.000000e+00 : f32
      %12 = vector.broadcast %cst_10 : f32 to vector<8x128xf32>
      %c0_11 = arith.constant 0 : index
      %c0_12 = arith.constant 0 : index
      %13 = vector.load %arg7[%c0_11, %c0_12] : memref<8x128xf32, #tpu.memory_space<vmem>>, vector<8x128xf32>
      tpu.vector_store %arg7[%c0_11, %c0_12], %12 {strides = array<i32>} : memref<8x128xf32, #tpu.memory_space<vmem>>, vector<8x128xf32>,
    } else {
    }
    %c0 = arith.constant 0 : index
    %c0_1 = arith.constant 0 : index
    %3 = vector.load %arg7[%c0, %c0_1] : memref<8x128xf32, #tpu.memory_space<vmem>>, vector<8x128xf32>
    %c0_2 = arith.constant 0 : index
    %c0_3 = arith.constant 0 : index
    %4 = vector.load %arg3[%c0_2, %c0_3] : memref<8x384xbf16, #tpu.memory_space<vmem>>, vector<8x384xbf16>
    %c0_4 = arith.constant 0 : index
    %c0_5 = arith.constant 0 : index
    %5 = vector.load %arg4[%c0_4, %c0_5] : memref<384x128xbf16, #tpu.memory_space<vmem>>, vector<384x128xbf16>
    %cst = arith.constant dense<0.000000e+00> : vector<8x128xf32>
    %6 = tpu.matmul %4, %5, %cst {dimension_numbers = #tpu.dot_dimension_numbers<[1], [0], [0], [1], [0, 0, 1, 1], [], []>} : vector<8x384xbf16>, vector<384x128xbf16>, vector<8x128xf32> -> vector<8x128xf32>
    %7 = arith.addf %3, %6 : vector<8x128xf32>
    %c0_6 = arith.constant 0 : index
    %c0_7 = arith.constant 0 : index
    %8 = vector.load %arg7[%c0_6, %c0_7] : memref<8x128xf32, #tpu.memory_space<vmem>>, vector<8x128xf32>
    tpu.vector_store %arg7[%c0_6, %c0_7], %7 {strides = array<i32>} : memref<8x128xf32, #tpu.memory_space<vmem>>, vector<8x128xf32>,
    %c0_i32_8 = arith.constant 0 : i32
    %9 = arith.cmpi eq, %arg2, %c0_i32_8 : i32
    %10 = arith.extui %9 : i1 to i32
    %c0_i32_9 = arith.constant 0 : i32
    %11 = arith.cmpi ne, %10, %c0_i32_9 : i32
    scf.if %11 {
      %c0_10 = arith.constant 0 : index
      %c0_11 = arith.constant 0 : index
      %12 = vector.load %arg7[%c0_10, %c0_11] : memref<8x128xf32, #tpu.memory_space<vmem>>, vector<8x128xf32>
      %c0_12 = arith.constant 0 : index
      %c0_13 = arith.constant 0 : index
      %13 = vector.load %arg5[%c0_12, %c0_13] : memref<1x128xf32, #tpu.memory_space<vmem>>, vector<1x128xf32>
      %14 = vector.broadcast %13 : vector<1x128xf32> to vector<8x128xf32>
      %15 = arith.addf %12, %14 : vector<8x128xf32>
      %c0_14 = arith.constant 0 : index
      %c0_15 = arith.constant 0 : index
      %16 = vector.load %arg6[%c0_14, %c0_15] : memref<8x128xf32, #tpu.memory_space<vmem>>, vector<8x128xf32>
      tpu.vector_store %arg6[%c0_14, %c0_15], %15 {strides = array<i32>} : memref<8x128xf32, #tpu.memory_space<vmem>>, vector<8x128xf32>,
    } else {
    }
    return
  }
  func.func @transform_0(%arg0: i32, %arg1: i32, %arg2: i32) -> (i32, i32) {
    %c0_i32 = arith.constant 0 : i32
    return %arg0, %arg2 : i32, i32
  }
  func.func @transform_1(%arg0: i32, %arg1: i32, %arg2: i32) -> (i32, i32) {
    %c0_i32 = arith.constant 0 : i32
    return %arg2, %arg1 : i32, i32
  }
  func.func @transform_2(%arg0: i32, %arg1: i32, %arg2: i32) -> (i32, i32) {
    %c0_i32 = arith.constant 0 : i32
    %c0_i32_0 = arith.constant 0 : i32
    return %c0_i32, %arg1 : i32, i32
  }
  func.func @transform_3(%arg0: i32, %arg1: i32, %arg2: i32) -> (i32, i32) {
    %c0_i32 = arith.constant 0 : i32
    return %arg0, %arg1 : i32, i32
  }
}

module attributes {stable_mosaic.version = 11 : i64} {
  func.func @_mm_kernel(%arg0: i32, %arg1: i32, %arg2: i32, %arg3: memref<32x128xbf16, #tpu.memory_space<vmem>>, %arg4: memref<128x128xbf16, #tpu.memory_space<vmem>>, %arg5: memref<1x128xf32, #tpu.memory_space<vmem>>, %arg6: memref<32x128xf32, #tpu.memory_space<vmem>>, %arg7: memref<32x128xf32, #tpu.memory_space<vmem>>) attributes {dimension_semantics = [#tpu.dimension_semantics<parallel>, #tpu.dimension_semantics<parallel>, #tpu.dimension_semantics<arbitrary>], iteration_bounds = array<i64: 1, 1, 1>, scalar_prefetch = 0 : i64, scratch_operands = 1 : i64, tpu.core_type = #tpu.core_type<tc>, window_params = [{transform_indices = @transform_0, window_bounds = array<i64: 32, 128>}, {transform_indices = @transform_1, window_bounds = array<i64: 128, 128>}, {transform_indices = @transform_2, window_bounds = array<i64: 1, 128>}, {transform_indices = @transform_3, window_bounds = array<i64: 32, 128>}]} {
    %c0_i32 = arith.constant 0 : i32
    %0 = arith.cmpi eq, %arg2, %c0_i32 : i32
    %1 = arith.extui %0 : i1 to i32
    %c0_i32_0 = arith.constant 0 : i32
    %2 = arith.cmpi ne, %1, %c0_i32_0 : i32
    scf.if %2 {
      %cst_10 = arith.constant 0.000000e+00 : f32
      %12 = vector.broadcast %cst_10 : f32 to vector<32x128xf32>
      %c0_11 = arith.constant 0 : index
      %c0_12 = arith.constant 0 : index
      %13 = vector.load %arg7[%c0_11, %c0_12] : memref<32x128xf32, #tpu.memory_space<vmem>>, vector<32x128xf32>
      tpu.vector_store %arg7[%c0_11, %c0_12], %12 {strides = array<i32>} : memref<32x128xf32, #tpu.memory_space<vmem>>, vector<32x128xf32>,
    } else {
    }
    %c0 = arith.constant 0 : index
    %c0_1 = arith.constant 0 : index
    %3 = vector.load %arg7[%c0, %c0_1] : memref<32x128xf32, #tpu.memory_space<vmem>>, vector<32x128xf32>
    %c0_2 = arith.constant 0 : index
    %c0_3 = arith.constant 0 : index
    %4 = vector.load %arg3[%c0_2, %c0_3] : memref<32x128xbf16, #tpu.memory_space<vmem>>, vector<32x128xbf16>
    %c0_4 = arith.constant 0 : index
    %c0_5 = arith.constant 0 : index
    %5 = vector.load %arg4[%c0_4, %c0_5] : memref<128x128xbf16, #tpu.memory_space<vmem>>, vector<128x128xbf16>
    %cst = arith.constant dense<0.000000e+00> : vector<32x128xf32>
    %6 = tpu.matmul %4, %5, %cst {dimension_numbers = #tpu.dot_dimension_numbers<[1], [0], [0], [1], [0, 0, 1, 1], [], []>} : vector<32x128xbf16>, vector<128x128xbf16>, vector<32x128xf32> -> vector<32x128xf32>
    %7 = arith.addf %3, %6 : vector<32x128xf32>
    %c0_6 = arith.constant 0 : index
    %c0_7 = arith.constant 0 : index
    %8 = vector.load %arg7[%c0_6, %c0_7] : memref<32x128xf32, #tpu.memory_space<vmem>>, vector<32x128xf32>
    tpu.vector_store %arg7[%c0_6, %c0_7], %7 {strides = array<i32>} : memref<32x128xf32, #tpu.memory_space<vmem>>, vector<32x128xf32>,
    %c0_i32_8 = arith.constant 0 : i32
    %9 = arith.cmpi eq, %arg2, %c0_i32_8 : i32
    %10 = arith.extui %9 : i1 to i32
    %c0_i32_9 = arith.constant 0 : i32
    %11 = arith.cmpi ne, %10, %c0_i32_9 : i32
    scf.if %11 {
      %c0_10 = arith.constant 0 : index
      %c0_11 = arith.constant 0 : index
      %12 = vector.load %arg7[%c0_10, %c0_11] : memref<32x128xf32, #tpu.memory_space<vmem>>, vector<32x128xf32>
      %c0_12 = arith.constant 0 : index
      %c0_13 = arith.constant 0 : index
      %13 = vector.load %arg5[%c0_12, %c0_13] : memref<1x128xf32, #tpu.memory_space<vmem>>, vector<1x128xf32>
      %14 = vector.broadcast %13 : vector<1x128xf32> to vector<32x128xf32>
      %15 = arith.addf %12, %14 : vector<32x128xf32>
      %c0_14 = arith.constant 0 : index
      %c0_15 = arith.constant 0 : index
      %16 = vector.load %arg6[%c0_14, %c0_15] : memref<32x128xf32, #tpu.memory_space<vmem>>, vector<32x128xf32>
      tpu.vector_store %arg6[%c0_14, %c0_15], %15 {strides = array<i32>} : memref<32x128xf32, #tpu.memory_space<vmem>>, vector<32x128xf32>,
    } else {
    }
    return
  }
  func.func @transform_0(%arg0: i32, %arg1: i32, %arg2: i32) -> (i32, i32) {
    %c0_i32 = arith.constant 0 : i32
    return %arg0, %arg2 : i32, i32
  }
  func.func @transform_1(%arg0: i32, %arg1: i32, %arg2: i32) -> (i32, i32) {
    %c0_i32 = arith.constant 0 : i32
    return %arg2, %arg1 : i32, i32
  }
  func.func @transform_2(%arg0: i32, %arg1: i32, %arg2: i32) -> (i32, i32) {
    %c0_i32 = arith.constant 0 : i32
    %c0_i32_0 = arith.constant 0 : i32
    return %c0_i32, %arg1 : i32, i32
  }
  func.func @transform_3(%arg0: i32, %arg1: i32, %arg2: i32) -> (i32, i32) {
    %c0_i32 = arith.constant 0 : i32
    return %arg0, %arg1 : i32, i32
  }
}

module attributes {stable_mosaic.version = 11 : i64} {
  func.func @_mm_kernel(%arg0: i32, %arg1: i32, %arg2: i32, %arg3: memref<32x384xbf16, #tpu.memory_space<vmem>>, %arg4: memref<384x128xbf16, #tpu.memory_space<vmem>>, %arg5: memref<1x128xf32, #tpu.memory_space<vmem>>, %arg6: memref<32x128xf32, #tpu.memory_space<vmem>>, %arg7: memref<32x128xf32, #tpu.memory_space<vmem>>) attributes {dimension_semantics = [#tpu.dimension_semantics<parallel>, #tpu.dimension_semantics<parallel>, #tpu.dimension_semantics<arbitrary>], iteration_bounds = array<i64: 1, 1, 1>, scalar_prefetch = 0 : i64, scratch_operands = 1 : i64, tpu.core_type = #tpu.core_type<tc>, window_params = [{transform_indices = @transform_0, window_bounds = array<i64: 32, 384>}, {transform_indices = @transform_1, window_bounds = array<i64: 384, 128>}, {transform_indices = @transform_2, window_bounds = array<i64: 1, 128>}, {transform_indices = @transform_3, window_bounds = array<i64: 32, 128>}]} {
    %c0_i32 = arith.constant 0 : i32
    %0 = arith.cmpi eq, %arg2, %c0_i32 : i32
    %1 = arith.extui %0 : i1 to i32
    %c0_i32_0 = arith.constant 0 : i32
    %2 = arith.cmpi ne, %1, %c0_i32_0 : i32
    scf.if %2 {
      %cst_10 = arith.constant 0.000000e+00 : f32
      %12 = vector.broadcast %cst_10 : f32 to vector<32x128xf32>
      %c0_11 = arith.constant 0 : index
      %c0_12 = arith.constant 0 : index
      %13 = vector.load %arg7[%c0_11, %c0_12] : memref<32x128xf32, #tpu.memory_space<vmem>>, vector<32x128xf32>
      tpu.vector_store %arg7[%c0_11, %c0_12], %12 {strides = array<i32>} : memref<32x128xf32, #tpu.memory_space<vmem>>, vector<32x128xf32>,
    } else {
    }
    %c0 = arith.constant 0 : index
    %c0_1 = arith.constant 0 : index
    %3 = vector.load %arg7[%c0, %c0_1] : memref<32x128xf32, #tpu.memory_space<vmem>>, vector<32x128xf32>
    %c0_2 = arith.constant 0 : index
    %c0_3 = arith.constant 0 : index
    %4 = vector.load %arg3[%c0_2, %c0_3] : memref<32x384xbf16, #tpu.memory_space<vmem>>, vector<32x384xbf16>
    %c0_4 = arith.constant 0 : index
    %c0_5 = arith.constant 0 : index
    %5 = vector.load %arg4[%c0_4, %c0_5] : memref<384x128xbf16, #tpu.memory_space<vmem>>, vector<384x128xbf16>
    %cst = arith.constant dense<0.000000e+00> : vector<32x128xf32>
    %6 = tpu.matmul %4, %5, %cst {dimension_numbers = #tpu.dot_dimension_numbers<[1], [0], [0], [1], [0, 0, 1, 1], [], []>} : vector<32x384xbf16>, vector<384x128xbf16>, vector<32x128xf32> -> vector<32x128xf32>
    %7 = arith.addf %3, %6 : vector<32x128xf32>
    %c0_6 = arith.constant 0 : index
    %c0_7 = arith.constant 0 : index
    %8 = vector.load %arg7[%c0_6, %c0_7] : memref<32x128xf32, #tpu.memory_space<vmem>>, vector<32x128xf32>
    tpu.vector_store %arg7[%c0_6, %c0_7], %7 {strides = array<i32>} : memref<32x128xf32, #tpu.memory_space<vmem>>, vector<32x128xf32>,
    %c0_i32_8 = arith.constant 0 : i32
    %9 = arith.cmpi eq, %arg2, %c0_i32_8 : i32
    %10 = arith.extui %9 : i1 to i32
    %c0_i32_9 = arith.constant 0 : i32
    %11 = arith.cmpi ne, %10, %c0_i32_9 : i32
    scf.if %11 {
      %c0_10 = arith.constant 0 : index
      %c0_11 = arith.constant 0 : index
      %12 = vector.load %arg7[%c0_10, %c0_11] : memref<32x128xf32, #tpu.memory_space<vmem>>, vector<32x128xf32>
      %c0_12 = arith.constant 0 : index
      %c0_13 = arith.constant 0 : index
      %13 = vector.load %arg5[%c0_12, %c0_13] : memref<1x128xf32, #tpu.memory_space<vmem>>, vector<1x128xf32>
      %14 = vector.broadcast %13 : vector<1x128xf32> to vector<32x128xf32>
      %15 = arith.addf %12, %14 : vector<32x128xf32>
      %c0_14 = arith.constant 0 : index
      %c0_15 = arith.constant 0 : index
      %16 = vector.load %arg6[%c0_14, %c0_15] : memref<32x128xf32, #tpu.memory_space<vmem>>, vector<32x128xf32>
      tpu.vector_store %arg6[%c0_14, %c0_15], %15 {strides = array<i32>} : memref<32x128xf32, #tpu.memory_space<vmem>>, vector<32x128xf32>,
    } else {
    }
    return
  }
  func.func @transform_0(%arg0: i32, %arg1: i32, %arg2: i32) -> (i32, i32) {
    %c0_i32 = arith.constant 0 : i32
    return %arg0, %arg2 : i32, i32
  }
  func.func @transform_1(%arg0: i32, %arg1: i32, %arg2: i32) -> (i32, i32) {
    %c0_i32 = arith.constant 0 : i32
    return %arg2, %arg1 : i32, i32
  }
  func.func @transform_2(%arg0: i32, %arg1: i32, %arg2: i32) -> (i32, i32) {
    %c0_i32 = arith.constant 0 : i32
    %c0_i32_0 = arith.constant 0 : i32
    return %c0_i32, %arg1 : i32, i32
  }
  func.func @transform_3(%arg0: i32, %arg1: i32, %arg2: i32) -> (i32, i32) {
    %c0_i32 = arith.constant 0 : i32
    return %arg0, %arg1 : i32, i32
  }
}

module attributes {stable_mosaic.version = 11 : i64} {
  func.func @_mm_kernel(%arg0: i32, %arg1: i32, %arg2: i32, %arg3: memref<128x128xbf16, #tpu.memory_space<vmem>>, %arg4: memref<128x128xbf16, #tpu.memory_space<vmem>>, %arg5: memref<1x128xf32, #tpu.memory_space<vmem>>, %arg6: memref<128x128xf32, #tpu.memory_space<vmem>>, %arg7: memref<128x128xf32, #tpu.memory_space<vmem>>) attributes {dimension_semantics = [#tpu.dimension_semantics<parallel>, #tpu.dimension_semantics<parallel>, #tpu.dimension_semantics<arbitrary>], iteration_bounds = array<i64: 1, 1, 1>, scalar_prefetch = 0 : i64, scratch_operands = 1 : i64, tpu.core_type = #tpu.core_type<tc>, window_params = [{transform_indices = @transform_0, window_bounds = array<i64: 128, 128>}, {transform_indices = @transform_1, window_bounds = array<i64: 128, 128>}, {transform_indices = @transform_2, window_bounds = array<i64: 1, 128>}, {transform_indices = @transform_3, window_bounds = array<i64: 128, 128>}]} {
    %c0_i32 = arith.constant 0 : i32
    %0 = arith.cmpi eq, %arg2, %c0_i32 : i32
    %1 = arith.extui %0 : i1 to i32
    %c0_i32_0 = arith.constant 0 : i32
    %2 = arith.cmpi ne, %1, %c0_i32_0 : i32
    scf.if %2 {
      %cst_10 = arith.constant 0.000000e+00 : f32
      %12 = vector.broadcast %cst_10 : f32 to vector<128x128xf32>
      %c0_11 = arith.constant 0 : index
      %c0_12 = arith.constant 0 : index
      %13 = vector.load %arg7[%c0_11, %c0_12] : memref<128x128xf32, #tpu.memory_space<vmem>>, vector<128x128xf32>
      tpu.vector_store %arg7[%c0_11, %c0_12], %12 {strides = array<i32>} : memref<128x128xf32, #tpu.memory_space<vmem>>, vector<128x128xf32>,
    } else {
    }
    %c0 = arith.constant 0 : index
    %c0_1 = arith.constant 0 : index
    %3 = vector.load %arg7[%c0, %c0_1] : memref<128x128xf32, #tpu.memory_space<vmem>>, vector<128x128xf32>
    %c0_2 = arith.constant 0 : index
    %c0_3 = arith.constant 0 : index
    %4 = vector.load %arg3[%c0_2, %c0_3] : memref<128x128xbf16, #tpu.memory_space<vmem>>, vector<128x128xbf16>
    %c0_4 = arith.constant 0 : index
    %c0_5 = arith.constant 0 : index
    %5 = vector.load %arg4[%c0_4, %c0_5] : memref<128x128xbf16, #tpu.memory_space<vmem>>, vector<128x128xbf16>
    %cst = arith.constant dense<0.000000e+00> : vector<128x128xf32>
    %6 = tpu.matmul %4, %5, %cst {dimension_numbers = #tpu.dot_dimension_numbers<[1], [0], [0], [1], [0, 0, 1, 1], [], []>} : vector<128x128xbf16>, vector<128x128xbf16>, vector<128x128xf32> -> vector<128x128xf32>
    %7 = arith.addf %3, %6 : vector<128x128xf32>
    %c0_6 = arith.constant 0 : index
    %c0_7 = arith.constant 0 : index
    %8 = vector.load %arg7[%c0_6, %c0_7] : memref<128x128xf32, #tpu.memory_space<vmem>>, vector<128x128xf32>
    tpu.vector_store %arg7[%c0_6, %c0_7], %7 {strides = array<i32>} : memref<128x128xf32, #tpu.memory_space<vmem>>, vector<128x128xf32>,
    %c0_i32_8 = arith.constant 0 : i32
    %9 = arith.cmpi eq, %arg2, %c0_i32_8 : i32
    %10 = arith.extui %9 : i1 to i32
    %c0_i32_9 = arith.constant 0 : i32
    %11 = arith.cmpi ne, %10, %c0_i32_9 : i32
    scf.if %11 {
      %c0_10 = arith.constant 0 : index
      %c0_11 = arith.constant 0 : index
      %12 = vector.load %arg7[%c0_10, %c0_11] : memref<128x128xf32, #tpu.memory_space<vmem>>, vector<128x128xf32>
      %c0_12 = arith.constant 0 : index
      %c0_13 = arith.constant 0 : index
      %13 = vector.load %arg5[%c0_12, %c0_13] : memref<1x128xf32, #tpu.memory_space<vmem>>, vector<1x128xf32>
      %14 = vector.broadcast %13 : vector<1x128xf32> to vector<128x128xf32>
      %15 = arith.addf %12, %14 : vector<128x128xf32>
      %c0_14 = arith.constant 0 : index
      %c0_15 = arith.constant 0 : index
      %16 = vector.load %arg6[%c0_14, %c0_15] : memref<128x128xf32, #tpu.memory_space<vmem>>, vector<128x128xf32>
      tpu.vector_store %arg6[%c0_14, %c0_15], %15 {strides = array<i32>} : memref<128x128xf32, #tpu.memory_space<vmem>>, vector<128x128xf32>,
    } else {
    }
    return
  }
  func.func @transform_0(%arg0: i32, %arg1: i32, %arg2: i32) -> (i32, i32) {
    %c0_i32 = arith.constant 0 : i32
    return %arg0, %arg2 : i32, i32
  }
  func.func @transform_1(%arg0: i32, %arg1: i32, %arg2: i32) -> (i32, i32) {
    %c0_i32 = arith.constant 0 : i32
    return %arg2, %arg1 : i32, i32
  }
  func.func @transform_2(%arg0: i32, %arg1: i32, %arg2: i32) -> (i32, i32) {
    %c0_i32 = arith.constant 0 : i32
    %c0_i32_0 = arith.constant 0 : i32
    return %c0_i32, %arg1 : i32, i32
  }
  func.func @transform_3(%arg0: i32, %arg1: i32, %arg2: i32) -> (i32, i32) {
    %c0_i32 = arith.constant 0 : i32
    return %arg0, %arg1 : i32, i32
  }
}

module attributes {stable_mosaic.version = 11 : i64} {
  func.func @_mm_kernel(%arg0: i32, %arg1: i32, %arg2: i32, %arg3: memref<128x384xbf16, #tpu.memory_space<vmem>>, %arg4: memref<384x128xbf16, #tpu.memory_space<vmem>>, %arg5: memref<1x128xf32, #tpu.memory_space<vmem>>, %arg6: memref<128x128xf32, #tpu.memory_space<vmem>>, %arg7: memref<128x128xf32, #tpu.memory_space<vmem>>) attributes {dimension_semantics = [#tpu.dimension_semantics<parallel>, #tpu.dimension_semantics<parallel>, #tpu.dimension_semantics<arbitrary>], iteration_bounds = array<i64: 1, 1, 1>, scalar_prefetch = 0 : i64, scratch_operands = 1 : i64, tpu.core_type = #tpu.core_type<tc>, window_params = [{transform_indices = @transform_0, window_bounds = array<i64: 128, 384>}, {transform_indices = @transform_1, window_bounds = array<i64: 384, 128>}, {transform_indices = @transform_2, window_bounds = array<i64: 1, 128>}, {transform_indices = @transform_3, window_bounds = array<i64: 128, 128>}]} {
    %c0_i32 = arith.constant 0 : i32
    %0 = arith.cmpi eq, %arg2, %c0_i32 : i32
    %1 = arith.extui %0 : i1 to i32
    %c0_i32_0 = arith.constant 0 : i32
    %2 = arith.cmpi ne, %1, %c0_i32_0 : i32
    scf.if %2 {
      %cst_10 = arith.constant 0.000000e+00 : f32
      %12 = vector.broadcast %cst_10 : f32 to vector<128x128xf32>
      %c0_11 = arith.constant 0 : index
      %c0_12 = arith.constant 0 : index
      %13 = vector.load %arg7[%c0_11, %c0_12] : memref<128x128xf32, #tpu.memory_space<vmem>>, vector<128x128xf32>
      tpu.vector_store %arg7[%c0_11, %c0_12], %12 {strides = array<i32>} : memref<128x128xf32, #tpu.memory_space<vmem>>, vector<128x128xf32>,
    } else {
    }
    %c0 = arith.constant 0 : index
    %c0_1 = arith.constant 0 : index
    %3 = vector.load %arg7[%c0, %c0_1] : memref<128x128xf32, #tpu.memory_space<vmem>>, vector<128x128xf32>
    %c0_2 = arith.constant 0 : index
    %c0_3 = arith.constant 0 : index
    %4 = vector.load %arg3[%c0_2, %c0_3] : memref<128x384xbf16, #tpu.memory_space<vmem>>, vector<128x384xbf16>
    %c0_4 = arith.constant 0 : index
    %c0_5 = arith.constant 0 : index
    %5 = vector.load %arg4[%c0_4, %c0_5] : memref<384x128xbf16, #tpu.memory_space<vmem>>, vector<384x128xbf16>
    %cst = arith.constant dense<0.000000e+00> : vector<128x128xf32>
    %6 = tpu.matmul %4, %5, %cst {dimension_numbers = #tpu.dot_dimension_numbers<[1], [0], [0], [1], [0, 0, 1, 1], [], []>} : vector<128x384xbf16>, vector<384x128xbf16>, vector<128x128xf32> -> vector<128x128xf32>
    %7 = arith.addf %3, %6 : vector<128x128xf32>
    %c0_6 = arith.constant 0 : index
    %c0_7 = arith.constant 0 : index
    %8 = vector.load %arg7[%c0_6, %c0_7] : memref<128x128xf32, #tpu.memory_space<vmem>>, vector<128x128xf32>
    tpu.vector_store %arg7[%c0_6, %c0_7], %7 {strides = array<i32>} : memref<128x128xf32, #tpu.memory_space<vmem>>, vector<128x128xf32>,
    %c0_i32_8 = arith.constant 0 : i32
    %9 = arith.cmpi eq, %arg2, %c0_i32_8 : i32
    %10 = arith.extui %9 : i1 to i32
    %c0_i32_9 = arith.constant 0 : i32
    %11 = arith.cmpi ne, %10, %c0_i32_9 : i32
    scf.if %11 {
      %c0_10 = arith.constant 0 : index
      %c0_11 = arith.constant 0 : index
      %12 = vector.load %arg7[%c0_10, %c0_11] : memref<128x128xf32, #tpu.memory_space<vmem>>, vector<128x128xf32>
      %c0_12 = arith.constant 0 : index
      %c0_13 = arith.constant 0 : index
      %13 = vector.load %arg5[%c0_12, %c0_13] : memref<1x128xf32, #tpu.memory_space<vmem>>, vector<1x128xf32>
      %14 = vector.broadcast %13 : vector<1x128xf32> to vector<128x128xf32>
      %15 = arith.addf %12, %14 : vector<128x128xf32>
      %c0_14 = arith.constant 0 : index
      %c0_15 = arith.constant 0 : index
      %16 = vector.load %arg6[%c0_14, %c0_15] : memref<128x128xf32, #tpu.memory_space<vmem>>, vector<128x128xf32>
      tpu.vector_store %arg6[%c0_14, %c0_15], %15 {strides = array<i32>} : memref<128x128xf32, #tpu.memory_space<vmem>>, vector<128x128xf32>,
    } else {
    }
    return
  }
  func.func @transform_0(%arg0: i32, %arg1: i32, %arg2: i32) -> (i32, i32) {
    %c0_i32 = arith.constant 0 : i32
    return %arg0, %arg2 : i32, i32
  }
  func.func @transform_1(%arg0: i32, %arg1: i32, %arg2: i32) -> (i32, i32) {
    %c0_i32 = arith.constant 0 : i32
    return %arg2, %arg1 : i32, i32
  }
  func.func @transform_2(%arg0: i32, %arg1: i32, %arg2: i32) -> (i32, i32) {
    %c0_i32 = arith.constant 0 : i32
    %c0_i32_0 = arith.constant 0 : i32
    return %c0_i32, %arg1 : i32, i32
  }
  func.func @transform_3(%arg0: i32, %arg1: i32, %arg2: i32) -> (i32, i32) {
    %c0_i32 = arith.constant 0 : i32
    return %arg0, %arg1 : i32, i32
  }
}

module attributes {stable_mosaic.version = 11 : i64} {
  func.func @_mm_kernel(%arg0: i32, %arg1: i32, %arg2: i32, %arg3: memref<168x384xbf16, #tpu.memory_space<vmem>>, %arg4: memref<384x128xbf16, #tpu.memory_space<vmem>>, %arg5: memref<1x128xf32, #tpu.memory_space<vmem>>, %arg6: memref<168x128xf32, #tpu.memory_space<vmem>>, %arg7: memref<168x128xf32, #tpu.memory_space<vmem>>) attributes {dimension_semantics = [#tpu.dimension_semantics<parallel>, #tpu.dimension_semantics<parallel>, #tpu.dimension_semantics<arbitrary>], iteration_bounds = array<i64: 1, 1, 1>, scalar_prefetch = 0 : i64, scratch_operands = 1 : i64, tpu.core_type = #tpu.core_type<tc>, window_params = [{transform_indices = @transform_0, window_bounds = array<i64: 168, 384>}, {transform_indices = @transform_1, window_bounds = array<i64: 384, 128>}, {transform_indices = @transform_2, window_bounds = array<i64: 1, 128>}, {transform_indices = @transform_3, window_bounds = array<i64: 168, 128>}]} {
    %c0_i32 = arith.constant 0 : i32
    %0 = arith.cmpi eq, %arg2, %c0_i32 : i32
    %1 = arith.extui %0 : i1 to i32
    %c0_i32_0 = arith.constant 0 : i32
    %2 = arith.cmpi ne, %1, %c0_i32_0 : i32
    scf.if %2 {
      %cst_10 = arith.constant 0.000000e+00 : f32
      %12 = vector.broadcast %cst_10 : f32 to vector<168x128xf32>
      %c0_11 = arith.constant 0 : index
      %c0_12 = arith.constant 0 : index
      %13 = vector.load %arg7[%c0_11, %c0_12] : memref<168x128xf32, #tpu.memory_space<vmem>>, vector<168x128xf32>
      tpu.vector_store %arg7[%c0_11, %c0_12], %12 {strides = array<i32>} : memref<168x128xf32, #tpu.memory_space<vmem>>, vector<168x128xf32>,
    } else {
    }
    %c0 = arith.constant 0 : index
    %c0_1 = arith.constant 0 : index
    %3 = vector.load %arg7[%c0, %c0_1] : memref<168x128xf32, #tpu.memory_space<vmem>>, vector<168x128xf32>
    %c0_2 = arith.constant 0 : index
    %c0_3 = arith.constant 0 : index
    %4 = vector.load %arg3[%c0_2, %c0_3] : memref<168x384xbf16, #tpu.memory_space<vmem>>, vector<168x384xbf16>
    %c0_4 = arith.constant 0 : index
    %c0_5 = arith.constant 0 : index
    %5 = vector.load %arg4[%c0_4, %c0_5] : memref<384x128xbf16, #tpu.memory_space<vmem>>, vector<384x128xbf16>
    %cst = arith.constant dense<0.000000e+00> : vector<168x128xf32>
    %6 = tpu.matmul %4, %5, %cst {dimension_numbers = #tpu.dot_dimension_numbers<[1], [0], [0], [1], [0, 0, 1, 1], [], []>} : vector<168x384xbf16>, vector<384x128xbf16>, vector<168x128xf32> -> vector<168x128xf32>
    %7 = arith.addf %3, %6 : vector<168x128xf32>
    %c0_6 = arith.constant 0 : index
    %c0_7 = arith.constant 0 : index
    %8 = vector.load %arg7[%c0_6, %c0_7] : memref<168x128xf32, #tpu.memory_space<vmem>>, vector<168x128xf32>
    tpu.vector_store %arg7[%c0_6, %c0_7], %7 {strides = array<i32>} : memref<168x128xf32, #tpu.memory_space<vmem>>, vector<168x128xf32>,
    %c0_i32_8 = arith.constant 0 : i32
    %9 = arith.cmpi eq, %arg2, %c0_i32_8 : i32
    %10 = arith.extui %9 : i1 to i32
    %c0_i32_9 = arith.constant 0 : i32
    %11 = arith.cmpi ne, %10, %c0_i32_9 : i32
    scf.if %11 {
      %c0_10 = arith.constant 0 : index
      %c0_11 = arith.constant 0 : index
      %12 = vector.load %arg7[%c0_10, %c0_11] : memref<168x128xf32, #tpu.memory_space<vmem>>, vector<168x128xf32>
      %c0_12 = arith.constant 0 : index
      %c0_13 = arith.constant 0 : index
      %13 = vector.load %arg5[%c0_12, %c0_13] : memref<1x128xf32, #tpu.memory_space<vmem>>, vector<1x128xf32>
      %14 = vector.broadcast %13 : vector<1x128xf32> to vector<168x128xf32>
      %15 = arith.addf %12, %14 : vector<168x128xf32>
      %cst_14 = arith.constant 0.000000e+00 : f32
      %16 = vector.broadcast %cst_14 : f32 to vector<168x128xf32>
      %17 = arith.maximumf %15, %16 : vector<168x128xf32>
      %c0_15 = arith.constant 0 : index
      %c0_16 = arith.constant 0 : index
      %18 = vector.load %arg6[%c0_15, %c0_16] : memref<168x128xf32, #tpu.memory_space<vmem>>, vector<168x128xf32>
      tpu.vector_store %arg6[%c0_15, %c0_16], %17 {strides = array<i32>} : memref<168x128xf32, #tpu.memory_space<vmem>>, vector<168x128xf32>,
    } else {
    }
    return
  }
  func.func @transform_0(%arg0: i32, %arg1: i32, %arg2: i32) -> (i32, i32) {
    %c0_i32 = arith.constant 0 : i32
    return %arg0, %arg2 : i32, i32
  }
  func.func @transform_1(%arg0: i32, %arg1: i32, %arg2: i32) -> (i32, i32) {
    %c0_i32 = arith.constant 0 : i32
    return %arg2, %arg1 : i32, i32
  }
  func.func @transform_2(%arg0: i32, %arg1: i32, %arg2: i32) -> (i32, i32) {
    %c0_i32 = arith.constant 0 : i32
    %c0_i32_0 = arith.constant 0 : i32
    return %c0_i32, %arg1 : i32, i32
  }
  func.func @transform_3(%arg0: i32, %arg1: i32, %arg2: i32) -> (i32, i32) {
    %c0_i32 = arith.constant 0 : i32
    return %arg0, %arg1 : i32, i32
  }
}

module attributes {stable_mosaic.version = 11 : i64} {
  func.func @_head_kernel(%arg0: i32, %arg1: i32, %arg2: memref<168x384xbf16, #tpu.memory_space<vmem>>, %arg3: memref<168x384xbf16, #tpu.memory_space<vmem>>, %arg4: memref<384x128xbf16, #tpu.memory_space<vmem>>, %arg5: memref<384x128xbf16, #tpu.memory_space<vmem>>, %arg6: memref<1x128xf32, #tpu.memory_space<vmem>>, %arg7: memref<1x128xf32, #tpu.memory_space<vmem>>, %arg8: memref<168x128xf32, #tpu.memory_space<vmem>>, %arg9: memref<168x128xf32, #tpu.memory_space<vmem>>, %arg10: memref<168x128xf32, #tpu.memory_space<vmem>>, %arg11: memref<168x128xf32, #tpu.memory_space<vmem>>, %arg12: memref<168x128xf32, #tpu.memory_space<vmem>>) attributes {dimension_semantics = [#tpu.dimension_semantics<parallel>, #tpu.dimension_semantics<arbitrary>], iteration_bounds = array<i64: 1, 1>, scalar_prefetch = 0 : i64, scratch_operands = 2 : i64, tpu.core_type = #tpu.core_type<tc>, window_params = [{transform_indices = @transform_0, window_bounds = array<i64: 168, 384>}, {transform_indices = @transform_1, window_bounds = array<i64: 168, 384>}, {transform_indices = @transform_2, window_bounds = array<i64: 384, 128>}, {transform_indices = @transform_3, window_bounds = array<i64: 384, 128>}, {pipeline_mode = #tpu.pipeline_mode<synchronous>, transform_indices = @transform_4, window_bounds = array<i64: 1, 128>}, {pipeline_mode = #tpu.pipeline_mode<synchronous>, transform_indices = @transform_5, window_bounds = array<i64: 1, 128>}, {transform_indices = @transform_6, window_bounds = array<i64: 168, 128>}, {transform_indices = @transform_7, window_bounds = array<i64: 168, 128>}, {transform_indices = @transform_8, window_bounds = array<i64: 168, 128>}]} {
    %c0_i32 = arith.constant 0 : i32
    %0 = arith.cmpi eq, %arg1, %c0_i32 : i32
    %1 = arith.extui %0 : i1 to i32
    %c0_i32_0 = arith.constant 0 : i32
    %2 = arith.cmpi ne, %1, %c0_i32_0 : i32
    scf.if %2 {
      %cst_19 = arith.constant 0.000000e+00 : f32
      %18 = vector.broadcast %cst_19 : f32 to vector<168x128xf32>
      %c0_20 = arith.constant 0 : index
      %c0_21 = arith.constant 0 : index
      %19 = vector.load %arg11[%c0_20, %c0_21] : memref<168x128xf32, #tpu.memory_space<vmem>>, vector<168x128xf32>
      tpu.vector_store %arg11[%c0_20, %c0_21], %18 {strides = array<i32>} : memref<168x128xf32, #tpu.memory_space<vmem>>, vector<168x128xf32>,
      %cst_22 = arith.constant 0.000000e+00 : f32
      %20 = vector.broadcast %cst_22 : f32 to vector<168x128xf32>
      %c0_23 = arith.constant 0 : index
      %c0_24 = arith.constant 0 : index
      %21 = vector.load %arg12[%c0_23, %c0_24] : memref<168x128xf32, #tpu.memory_space<vmem>>, vector<168x128xf32>
      tpu.vector_store %arg12[%c0_23, %c0_24], %20 {strides = array<i32>} : memref<168x128xf32, #tpu.memory_space<vmem>>, vector<168x128xf32>,
    } else {
    }
    %c0 = arith.constant 0 : index
    %c0_1 = arith.constant 0 : index
    %3 = vector.load %arg11[%c0, %c0_1] : memref<168x128xf32, #tpu.memory_space<vmem>>, vector<168x128xf32>
    %c0_2 = arith.constant 0 : index
    %c0_3 = arith.constant 0 : index
    %4 = vector.load %arg2[%c0_2, %c0_3] : memref<168x384xbf16, #tpu.memory_space<vmem>>, vector<168x384xbf16>
    %c0_4 = arith.constant 0 : index
    %c0_5 = arith.constant 0 : index
    %5 = vector.load %arg4[%c0_4, %c0_5] : memref<384x128xbf16, #tpu.memory_space<vmem>>, vector<384x128xbf16>
    %cst = arith.constant dense<0.000000e+00> : vector<168x128xf32>
    %6 = tpu.matmul %4, %5, %cst {dimension_numbers = #tpu.dot_dimension_numbers<[1], [0], [0], [1], [0, 0, 1, 1], [], []>} : vector<168x384xbf16>, vector<384x128xbf16>, vector<168x128xf32> -> vector<168x128xf32>
    %7 = arith.addf %3, %6 : vector<168x128xf32>
    %c0_6 = arith.constant 0 : index
    %c0_7 = arith.constant 0 : index
    %8 = vector.load %arg11[%c0_6, %c0_7] : memref<168x128xf32, #tpu.memory_space<vmem>>, vector<168x128xf32>
    tpu.vector_store %arg11[%c0_6, %c0_7], %7 {strides = array<i32>} : memref<168x128xf32, #tpu.memory_space<vmem>>, vector<168x128xf32>,
    %c0_8 = arith.constant 0 : index
    %c0_9 = arith.constant 0 : index
    %9 = vector.load %arg12[%c0_8, %c0_9] : memref<168x128xf32, #tpu.memory_space<vmem>>, vector<168x128xf32>
    %c0_10 = arith.constant 0 : index
    %c0_11 = arith.constant 0 : index
    %10 = vector.load %arg3[%c0_10, %c0_11] : memref<168x384xbf16, #tpu.memory_space<vmem>>, vector<168x384xbf16>
    %c0_12 = arith.constant 0 : index
    %c0_13 = arith.constant 0 : index
    %11 = vector.load %arg5[%c0_12, %c0_13] : memref<384x128xbf16, #tpu.memory_space<vmem>>, vector<384x128xbf16>
    %cst_14 = arith.constant dense<0.000000e+00> : vector<168x128xf32>
    %12 = tpu.matmul %10, %11, %cst_14 {dimension_numbers = #tpu.dot_dimension_numbers<[1], [0], [0], [1], [0, 0, 1, 1], [], []>} : vector<168x384xbf16>, vector<384x128xbf16>, vector<168x128xf32> -> vector<168x128xf32>
    %13 = arith.addf %9, %12 : vector<168x128xf32>
    %c0_15 = arith.constant 0 : index
    %c0_16 = arith.constant 0 : index
    %14 = vector.load %arg12[%c0_15, %c0_16] : memref<168x128xf32, #tpu.memory_space<vmem>>, vector<168x128xf32>
    tpu.vector_store %arg12[%c0_15, %c0_16], %13 {strides = array<i32>} : memref<168x128xf32, #tpu.memory_space<vmem>>, vector<168x128xf32>,
    %c0_i32_17 = arith.constant 0 : i32
    %15 = arith.cmpi eq, %arg1, %c0_i32_17 : i32
    %16 = arith.extui %15 : i1 to i32
    %c0_i32_18 = arith.constant 0 : i32
    %17 = arith.cmpi ne, %16, %c0_i32_18 : i32
    scf.if %17 {
      %c0_19 = arith.constant 0 : index
      %c0_20 = arith.constant 0 : index
      %18 = vector.load %arg11[%c0_19, %c0_20] : memref<168x128xf32, #tpu.memory_space<vmem>>, vector<168x128xf32>
      %c0_21 = arith.constant 0 : index
      %c0_22 = arith.constant 0 : index
      %19 = vector.load %arg6[%c0_21, %c0_22] : memref<1x128xf32, #tpu.memory_space<vmem>>, vector<1x128xf32>
      %20 = vector.broadcast %19 : vector<1x128xf32> to vector<168x128xf32>
      %21 = arith.addf %18, %20 : vector<168x128xf32>
      %c0_23 = arith.constant 0 : index
      %c0_24 = arith.constant 0 : index
      %22 = vector.load %arg12[%c0_23, %c0_24] : memref<168x128xf32, #tpu.memory_space<vmem>>, vector<168x128xf32>
      %c0_25 = arith.constant 0 : index
      %c0_26 = arith.constant 0 : index
      %23 = vector.load %arg7[%c0_25, %c0_26] : memref<1x128xf32, #tpu.memory_space<vmem>>, vector<1x128xf32>
      %24 = vector.broadcast %23 : vector<1x128xf32> to vector<168x128xf32>
      %25 = arith.addf %22, %24 : vector<168x128xf32>
      %c0_27 = arith.constant 0 : index
      %c0_28 = arith.constant 0 : index
      %26 = vector.load %arg8[%c0_27, %c0_28] : memref<168x128xf32, #tpu.memory_space<vmem>>, vector<168x128xf32>
      tpu.vector_store %arg8[%c0_27, %c0_28], %21 {strides = array<i32>} : memref<168x128xf32, #tpu.memory_space<vmem>>, vector<168x128xf32>,
      %c0_29 = arith.constant 0 : index
      %c0_30 = arith.constant 0 : index
      %27 = vector.load %arg9[%c0_29, %c0_30] : memref<168x128xf32, #tpu.memory_space<vmem>>, vector<168x128xf32>
      tpu.vector_store %arg9[%c0_29, %c0_30], %25 {strides = array<i32>} : memref<168x128xf32, #tpu.memory_space<vmem>>, vector<168x128xf32>,
      %28 = vector.extract_strided_slice %25 {offsets = [0, 4], sizes = [168, 1], strides = [1, 1]} : vector<168x128xf32> to vector<168x1xf32>
      %29 = arith.negf %21 : vector<168x128xf32>
      %30 = math.exp %29 : vector<168x128xf32>
      %cst_31 = arith.constant 1.000000e+00 : f32
      %31 = vector.broadcast %cst_31 : f32 to vector<168x128xf32>
      %32 = arith.addf %31, %30 : vector<168x128xf32>
      %33 = arith.divf %31, %32 : vector<168x128xf32>
      %34 = arith.negf %28 : vector<168x1xf32>
      %35 = math.exp %34 : vector<168x1xf32>
      %cst_32 = arith.constant 1.000000e+00 : f32
      %36 = vector.broadcast %cst_32 : f32 to vector<168x1xf32>
      %37 = arith.addf %36, %35 : vector<168x1xf32>
      %38 = arith.divf %36, %37 : vector<168x1xf32>
      %39 = vector.broadcast %38 : vector<168x1xf32> to vector<168x128xf32>
      %40 = arith.mulf %33, %39 : vector<168x128xf32>
      %41 = math.sqrt %40 : vector<168x128xf32>
      %c0_33 = arith.constant 0 : index
      %c0_34 = arith.constant 0 : index
      %42 = vector.load %arg10[%c0_33, %c0_34] : memref<168x128xf32, #tpu.memory_space<vmem>>, vector<168x128xf32>
      tpu.vector_store %arg10[%c0_33, %c0_34], %41 {strides = array<i32>} : memref<168x128xf32, #tpu.memory_space<vmem>>, vector<168x128xf32>,
    } else {
    }
    return
  }
  func.func @transform_0(%arg0: i32, %arg1: i32) -> (i32, i32) {
    %c0_i32 = arith.constant 0 : i32
    return %arg0, %arg1 : i32, i32
  }
  func.func @transform_1(%arg0: i32, %arg1: i32) -> (i32, i32) {
    %c0_i32 = arith.constant 0 : i32
    return %arg0, %arg1 : i32, i32
  }
  func.func @transform_2(%arg0: i32, %arg1: i32) -> (i32, i32) {
    %c0_i32 = arith.constant 0 : i32
    %c0_i32_0 = arith.constant 0 : i32
    return %arg1, %c0_i32 : i32, i32
  }
  func.func @transform_3(%arg0: i32, %arg1: i32) -> (i32, i32) {
    %c0_i32 = arith.constant 0 : i32
    %c0_i32_0 = arith.constant 0 : i32
    return %arg1, %c0_i32 : i32, i32
  }
  func.func @transform_4(%arg0: i32, %arg1: i32) -> (i32, i32) {
    %c0_i32 = arith.constant 0 : i32
    %c0_i32_0 = arith.constant 0 : i32
    %c0_i32_1 = arith.constant 0 : i32
    return %c0_i32, %c0_i32_0 : i32, i32
  }
  func.func @transform_5(%arg0: i32, %arg1: i32) -> (i32, i32) {
    %c0_i32 = arith.constant 0 : i32
    %c0_i32_0 = arith.constant 0 : i32
    %c0_i32_1 = arith.constant 0 : i32
    return %c0_i32, %c0_i32_0 : i32, i32
  }
  func.func @transform_6(%arg0: i32, %arg1: i32) -> (i32, i32) {
    %c0_i32 = arith.constant 0 : i32
    %c0_i32_0 = arith.constant 0 : i32
    return %arg0, %c0_i32 : i32, i32
  }
  func.func @transform_7(%arg0: i32, %arg1: i32) -> (i32, i32) {
    %c0_i32 = arith.constant 0 : i32
    %c0_i32_0 = arith.constant 0 : i32
    return %arg0, %c0_i32 : i32, i32
  }
  func.func @transform_8(%arg0: i32, %arg1: i32) -> (i32, i32) {
    %c0_i32 = arith.constant 0 : i32
    %c0_i32_0 = arith.constant 0 : i32
    return %arg0, %c0_i32 : i32, i32
  }
}

</mosaic_0001>

<bundles_post_ra>
// kernel: fcos_forward.16
= control target key start
LH: loop header
LB: loop body
LE: loop exit
PB: predicated region body
PF: predicated region fallthrough
CT: control target
= control target key end

     0   :  { %s1212_s12 = smov 0   ;;  %s1214_s13 = smov 0   ;;  %s1362_s0 = inlined_call_operand.vmem [shape: bf16[2048,128], index: 0, kind: input, shape index: {}]   ;;  %s1363_s1 = inlined_call_operand.vmem [shape: bf16[128,128], index: 1, kind: input, shape index: {}]   ;;  %s1364_s2 = inlined_call_operand.vmem [shape: f32[1,128], index: 2, kind: input, shape index: {}]   ;;  %s1365_s3 = inlined_call_operand.vmem [shape: f32[2048,128], index: 3, kind: output, shape index: {}]  }
   0x1   :  { %s1216_s14 = smov 0  }
   0x2 LB: > { %s32_s15 = sadd.s32 1, %s1186_s13  ;;  %p1000_p0 = scmp.ge.s32.totalorder %s1190_s14, 1  ;;  %s1190_s14 = sphi %s1216_s14, %s13_s14   ;;  %s1186_s13 = sphi %s1214_s13, %s1367_s13   ;;  %s1182_s12 = sphi %s1212_s12, %s1366_s12  }
   0x3   : > { %p34_p1 = scmp.ge.s32.totalorder %s32_s15, 8  ;;  %p188_p2 = scmp.lt.s32.totalorder %s1190_s14, 9 }
   0x5   : > { %s1369_s15 = smov (%p34_p1, %s32_s15), 0  ;;  %p189_p3 = pnand %p1000_p0, %p188_p2 }
   0x6   : > { %v1144_v0 = vld [vmem:[%s1363_s1] sm:$0xff] (!%p189_p3)   ;;  %s1001_s18 = sshll.u32 (!%p189_p3), %s1182_s12, 5  ;;  %v1145_v1 = vld [vmem:[%s1363_s1 + $0x8] sm:$0xff] (!%p189_p3)   ;;  %v1146_v2 = vld [vmem:[%s1363_s1 + $0x10] sm:$0xff] (!%p189_p3)  }
   0x7   : > { %192 = sbr.rel (%p189_p3) target bundleno = 283 (0x11b), region = 32  ;;  %p230_p4 = scmp.lt.s32.totalorder (!%p189_p3), %s1001_s18, 255  ;;  %1056 = vmatprep.subr.bf16.mxu0 (!%p189_p3), %v1144_v0  ;;  %1104 = vmatprep.subr.bf16.mxu1 (!%p189_p3), %v1144_v0  ;;  %v1147_v3 = vld [vmem:[%s1363_s1 + $0x18] sm:$0xff] (!%p189_p3)   ;;  %v1148_v6 = vld [vmem:[%s1363_s1 + $0x20] sm:$0xff] (!%p189_p3)   ;;  %v1149_v7 = vld [vmem:[%s1363_s1 + $0x28] sm:$0xff] (!%p189_p3)  }
   0x8   : > { %1057 = vmatpush3.bf16.msra.mxu0 (!%p189_p3), %v1144_v0  ;;  %1112 = vmatpush3.bf16.msra.mxu1 (!%p189_p3), %v1144_v0  ;;  %v1150_v8 = vld [vmem:[%s1363_s1 + $0x30] sm:$0xff] (!%p189_p3)   ;;  %v1151_v9 = vld [vmem:[%s1363_s1 + $0x38] sm:$0xff] (!%p189_p3)   ;;  %v1281_v24 = vld [vmem:[%s1364_s2] ss:$0 sm:$0xff] (!%p189_p3) }
   0x9   : > { %1058 = vmatprep.subr.bf16.mxu0 (!%p189_p3), %v1145_v1  ;;  %1105 = vmatprep.subr.bf16.mxu1 (!%p189_p3), %v1145_v1 }
   0xc   : > { %1059 = vmatpush3.bf16.msra.mxu0 (!%p189_p3), %v1145_v1  ;;  %1113 = vmatpush3.bf16.msra.mxu1 (!%p189_p3), %v1145_v1 }
   0xd   : > { %1060 = vmatprep.subr.bf16.mxu0 (!%p189_p3), %v1146_v2  ;;  %1106 = vmatprep.subr.bf16.mxu1 (!%p189_p3), %v1146_v2 }
   0xe   : > { %s1371_s18 = smov (!%p230_p4, %s1001_s18), 255 }
   0xf   : > { %s1002_s23 = sshll.u32 %s1371_s18, 2  ;;  %s1004_s12 = sshll.u32 %s1371_s18, 3 }
  0x10   : > { %s1245_s26 = scalar_lea.vmem %s1362_s0, %s1002_s23  ;;  %1061 = vmatpush3.bf16.msra.mxu0 %v1146_v2  ;;  %1114 = vmatpush3.bf16.msra.mxu1 %v1146_v2  ;;  %s1289_s19 = scalar_lea.vmem %s1365_s3, %s1004_s12 }
  0x11   : > { %v1152_v4 = vld [vmem:[%s1245_s26] sm:$0xff]   ;;  %1062 = vmatprep.subr.bf16.mxu0 %v1147_v3  ;;  %1107 = vmatprep.subr.bf16.mxu1 %v1147_v3  ;;  %v1154_v10 = vld [vmem:[%s1245_s26 + $0x8] sm:$0xff]   ;;  %v1156_v12 = vld [vmem:[%s1245_s26 + $0x10] sm:$0xff]  }
  0x12   : > { %v1153_v5 = vld [vmem:[%s1245_s26 + $0x40] sm:$0xff]   ;;  %1072 = vmatprep.mubr.bf16.mxu0 %v1152_v4  ;;  %v1155_v11 = vld [vmem:[%s1245_s26 + $0x48] sm:$0xff]   ;;  %v1157_v13 = vld [vmem:[%s1245_s26 + $0x50] sm:$0xff]  }
  0x13   : > { %1088 = vmatprep.mubr.bf16.mxu1 %v1153_v5  ;;  %v1158_v14 = vld [vmem:[%s1245_s26 + $0x18] sm:$0xff]   ;;  %v1160_v16 = vld [vmem:[%s1245_s26 + $0x20] sm:$0xff]   ;;  %v1162_v18 = vld [vmem:[%s1245_s26 + $0x28] sm:$0xff]  }
  0x14   : > { %1063 = vmatpush3.bf16.msra.mxu0 %v1147_v3  ;;  %1115 = vmatpush3.bf16.msra.mxu1 %v1147_v3  ;;  %v1159_v15 = vld [vmem:[%s1245_s26 + $0x58] sm:$0xff]   ;;  %v1161_v17 = vld [vmem:[%s1245_s26 + $0x60] sm:$0xff]   ;;  %v1163_v19 = vld [vmem:[%s1245_s26 + $0x68] sm:$0xff]  }
  0x15   : > { %1064 = vmatprep.subr.bf16.mxu0 %v1148_v6  ;;  %1108 = vmatprep.subr.bf16.mxu1 %v1148_v6  ;;  %v1164_v20 = vld [vmem:[%s1245_s26 + $0x30] sm:$0xff]   ;;  %v1166_v22 = vld [vmem:[%s1245_s26 + $0x38] sm:$0xff]  }
  0x16   : > { %v1165_v21 = vld [vmem:[%s1245_s26 + $0x70] sm:$0xff]   ;;  %v1167_v23 = vld [vmem:[%s1245_s26 + $0x78] sm:$0xff]  }
  0x18   : > { %1065 = vmatpush3.bf16.msra.mxu0 %v1148_v6  ;;  %1116 = vmatpush3.bf16.msra.mxu1 %v1148_v6 }
  0x19   : > { %1066 = vmatprep.subr.bf16.mxu0 %v1149_v7  ;;  %1109 = vmatprep.subr.bf16.mxu1 %v1149_v7 }
  0x1c   : > { %1067 = vmatpush3.bf16.msra.mxu0 %v1149_v7  ;;  %1117 = vmatpush3.bf16.msra.mxu1 %v1149_v7 }
  0x1d   : > { %1068 = vmatprep.subr.bf16.mxu0 %v1150_v8  ;;  %1110 = vmatprep.subr.bf16.mxu1 %v1150_v8 }
  0x20   : > { %1069 = vmatpush3.bf16.msra.mxu0 %v1150_v8  ;;  %1118 = vmatpush3.bf16.msra.mxu1 %v1150_v8 }
  0x21   : > { %1070 = vmatprep.subr.bf16.mxu0 %v1151_v9  ;;  %1111 = vmatprep.subr.bf16.mxu1 %v1151_v9 }
  0x24   : > { %1071 = vmatpush3.bf16.msra.mxu0 %v1151_v9  ;;  %1119 = vmatpush3.bf16.msra.mxu1 %v1151_v9 }
  0x27   : > { %1073 = vmatmul.mubr.bf16.vlgmr.msra.gmra.mrb[0].mxu0 %v1154_v10  ;;  %1089 = vmatmul.mubr.bf16.vlgmr.msra.gmra.mrb[0].mxu1 %v1155_v11 }
  0x28   : > { %1076 = vmatprep.mubr.bf16.mxu0 %v1156_v12  ;;  %1092 = vmatprep.mubr.bf16.mxu1 %v1157_v13 }
  0x2f   : > { %1077 = vmatmul.mubr.bf16.gmra.mrb[4].mxu0 %v1158_v14  ;;  %1093 = vmatmul.mubr.bf16.gmra.mrb[4].mxu1 %v1159_v15 }
  0x30   : > { %1080 = vmatprep.mubr.bf16.mxu0 %v1160_v16  ;;  %1096 = vmatprep.mubr.bf16.mxu1 %v1161_v17 }
  0x37   : > { %1081 = vmatmul.mubr.bf16.gmra.mrb[8].mxu0 %v1162_v18  ;;  %1097 = vmatmul.mubr.bf16.gmra.mrb[8].mxu1 %v1163_v19 }
  0x38   : > { %1084 = vmatprep.mubr.bf16.mxu0 %v1164_v20  ;;  %1100 = vmatprep.mubr.bf16.mxu1 %v1165_v21 }
  0x3f   : > { %1085 = vmatmul.mubr.bf16.gmra.mrb[12].mxu0 %v1166_v22  ;;  %1101 = vmatmul.mubr.bf16.gmra.mrb[12].mxu1 %v1167_v23 }
  0xfa   : > { %v1074_v25 = vpop.f32.mrb[0].mxu0  ;;  %v1090_v26 = vpop.f32.mrb[0].mxu1 }
  0xfb   : > { %v789_v27 = vadd.f32 %v1074_v25, %v1281_v24  ;;  %v805_v28 = vadd.f32 %v1090_v26, %v1281_v24  ;;  %v554_v29 = vpop.f32.mrb[1].mxu0  ;;  %v618_v30 = vpop.f32.mrb[1].mxu1 }
  0xfc   : > { %v787_v31 = vadd.f32 %v1281_v24, %v554_v29  ;;  %v803_v32 = vadd.f32 %v1281_v24, %v618_v30  ;;  %v1075_v33 = vpop.f32.mrb[2].mxu0  ;;  %v1091_v34 = vpop.f32.mrb[2].mxu1 }
  0xfd   : > { %v821_v35 = vmax.f32 %v789_v27, 0.0  ;;  %v837_v36 = vmax.f32 %v805_v28, 0.0  ;;  %v790_v37 = vadd.f32 %v1075_v33, %v1281_v24  ;;  %v806_v38 = vadd.f32 %v1091_v34, %v1281_v24  ;;  %v557_v39 = vpop.f32.mrb[3].mxu0  ;;  %v621_v40 = vpop.f32.mrb[3].mxu1 }
  0xfe   : > { %v819_v41 = vmax.f32 %v787_v31, 0.0  ;;  %v835_v42 = vmax.f32 %v803_v32, 0.0  ;;  %v788_v43 = vadd.f32 %v1281_v24, %v557_v39  ;;  %v804_v44 = vadd.f32 %v1281_v24, %v621_v40 }
  0xff   : > { %853 = vst [vmem:[%s1289_s19 + $0x10] sm:$0xff] %v821_v35  ;;  %869 = vst [vmem:[%s1289_s19 + $0x90] sm:$0xff] %v837_v36  ;;  %v822_v45 = vmax.f32 %v790_v37, 0.0  ;;  %v838_v46 = vmax.f32 %v806_v38, 0.0 }
 0x100   : > { %851 = vst [vmem:[%s1289_s19] sm:$0xff] %v819_v41  ;;  %867 = vst [vmem:[%s1289_s19 + $0x80] sm:$0xff] %v835_v42  ;;  %v820_v47 = vmax.f32 %v788_v43, 0.0  ;;  %v836_v48 = vmax.f32 %v804_v44, 0.0 }
 0x101   : > { %854 = vst [vmem:[%s1289_s19 + $0x18] sm:$0xff] %v822_v45  ;;  %870 = vst [vmem:[%s1289_s19 + $0x98] sm:$0xff] %v838_v46 }
 0x102   : > { %852 = vst [vmem:[%s1289_s19 + $0x8] sm:$0xff] %v820_v47  ;;  %868 = vst [vmem:[%s1289_s19 + $0x88] sm:$0xff] %v836_v48  ;;  %v1078_v49 = vpop.f32.mrb[4].mxu0  ;;  %v1094_v50 = vpop.f32.mrb[4].mxu1 }
 0x103   : > { %v793_v51 = vadd.f32 %v1078_v49, %v1281_v24  ;;  %v809_v52 = vadd.f32 %v1094_v50, %v1281_v24  ;;  %v570_v53 = vpop.f32.mrb[5].mxu0  ;;  %v634_v54 = vpop.f32.mrb[5].mxu1 }
 0x104   : > { %v791_v55 = vadd.f32 %v1281_v24, %v570_v53  ;;  %v807_v56 = vadd.f32 %v1281_v24, %v634_v54  ;;  %v1079_v57 = vpop.f32.mrb[6].mxu0  ;;  %v1095_v58 = vpop.f32.mrb[6].mxu1 }
 0x105   : > { %v825_v59 = vmax.f32 %v793_v51, 0.0  ;;  %v841_v60 = vmax.f32 %v809_v52, 0.0  ;;  %v794_v61 = vadd.f32 %v1079_v57, %v1281_v24  ;;  %v810_v62 = vadd.f32 %v1095_v58, %v1281_v24  ;;  %v573_v63 = vpop.f32.mrb[7].mxu0  ;;  %v637_v0 = vpop.f32.mrb[7].mxu1 }
 0x106   : > { %v823_v1 = vmax.f32 %v791_v55, 0.0  ;;  %v839_v2 = vmax.f32 %v807_v56, 0.0  ;;  %v792_v3 = vadd.f32 %v1281_v24, %v573_v63  ;;  %v808_v4 = vadd.f32 %v1281_v24, %v637_v0 }
 0x107   : > { %857 = vst [vmem:[%s1289_s19 + $0x30] sm:$0xff] %v825_v59  ;;  %873 = vst [vmem:[%s1289_s19 + $0xb0] sm:$0xff] %v841_v60  ;;  %v826_v5 = vmax.f32 %v794_v61, 0.0  ;;  %v842_v6 = vmax.f32 %v810_v62, 0.0 }
 0x108   : > { %855 = vst [vmem:[%s1289_s19 + $0x20] sm:$0xff] %v823_v1  ;;  %871 = vst [vmem:[%s1289_s19 + $0xa0] sm:$0xff] %v839_v2  ;;  %v824_v7 = vmax.f32 %v792_v3, 0.0  ;;  %v840_v8 = vmax.f32 %v808_v4, 0.0 }
 0x109   : > { %858 = vst [vmem:[%s1289_s19 + $0x38] sm:$0xff] %v826_v5  ;;  %874 = vst [vmem:[%s1289_s19 + $0xb8] sm:$0xff] %v842_v6 }
 0x10a   : > { %856 = vst [vmem:[%s1289_s19 + $0x28] sm:$0xff] %v824_v7  ;;  %872 = vst [vmem:[%s1289_s19 + $0xa8] sm:$0xff] %v840_v8  ;;  %v1082_v9 = vpop.f32.mrb[8].mxu0  ;;  %v1098_v10 = vpop.f32.mrb[8].mxu1 }
 0x10b   : > { %v797_v11 = vadd.f32 %v1082_v9, %v1281_v24  ;;  %v813_v12 = vadd.f32 %v1098_v10, %v1281_v24  ;;  %v586_v13 = vpop.f32.mrb[9].mxu0  ;;  %v650_v14 = vpop.f32.mrb[9].mxu1 }
 0x10c   : > { %v795_v15 = vadd.f32 %v1281_v24, %v586_v13  ;;  %v811_v16 = vadd.f32 %v1281_v24, %v650_v14  ;;  %v1083_v17 = vpop.f32.mrb[10].mxu0  ;;  %v1099_v18 = vpop.f32.mrb[10].mxu1 }
 0x10d   : > { %v829_v19 = vmax.f32 %v797_v11, 0.0  ;;  %v845_v20 = vmax.f32 %v813_v12, 0.0  ;;  %v798_v21 = vadd.f32 %v1083_v17, %v1281_v24  ;;  %v814_v22 = vadd.f32 %v1099_v18, %v1281_v24  ;;  %v589_v23 = vpop.f32.mrb[11].mxu0  ;;  %v653_v25 = vpop.f32.mrb[11].mxu1 }
 0x10e   : > { %v827_v26 = vmax.f32 %v795_v15, 0.0  ;;  %v843_v27 = vmax.f32 %v811_v16, 0.0  ;;  %v796_v28 = vadd.f32 %v1281_v24, %v589_v23  ;;  %v812_v29 = vadd.f32 %v1281_v24, %v653_v25 }
 0x10f   : > { %861 = vst [vmem:[%s1289_s19 + $0x50] sm:$0xff] %v829_v19  ;;  %877 = vst [vmem:[%s1289_s19 + $0xd0] sm:$0xff] %v845_v20  ;;  %v830_v30 = vmax.f32 %v798_v21, 0.0  ;;  %v846_v31 = vmax.f32 %v814_v22, 0.0 }
 0x110   : > { %859 = vst [vmem:[%s1289_s19 + $0x40] sm:$0xff] %v827_v26  ;;  %875 = vst [vmem:[%s1289_s19 + $0xc0] sm:$0xff] %v843_v27  ;;  %v828_v32 = vmax.f32 %v796_v28, 0.0  ;;  %v844_v33 = vmax.f32 %v812_v29, 0.0 }
 0x111   : > { %862 = vst [vmem:[%s1289_s19 + $0x58] sm:$0xff] %v830_v30  ;;  %878 = vst [vmem:[%s1289_s19 + $0xd8] sm:$0xff] %v846_v31 }
 0x112   : > { %860 = vst [vmem:[%s1289_s19 + $0x48] sm:$0xff] %v828_v32  ;;  %876 = vst [vmem:[%s1289_s19 + $0xc8] sm:$0xff] %v844_v33  ;;  %v1086_v34 = vpop.f32.mrb[12].mxu0  ;;  %v1102_v35 = vpop.f32.mrb[12].mxu1 }
 0x113   : > { %v801_v36 = vadd.f32 %v1086_v34, %v1281_v24  ;;  %v817_v37 = vadd.f32 %v1102_v35, %v1281_v24  ;;  %v602_v38 = vpop.f32.mrb[13].mxu0  ;;  %v666_v39 = vpop.f32.mrb[13].mxu1 }
 0x114   : > { %v799_v40 = vadd.f32 %v1281_v24, %v602_v38  ;;  %v815_v41 = vadd.f32 %v1281_v24, %v666_v39  ;;  %v1087_v42 = vpop.f32.mrb[14].mxu0  ;;  %v1103_v43 = vpop.f32.mrb[14].mxu1 }
 0x115   : > { %v833_v44 = vmax.f32 %v801_v36, 0.0  ;;  %v849_v45 = vmax.f32 %v817_v37, 0.0  ;;  %v802_v46 = vadd.f32 %v1087_v42, %v1281_v24  ;;  %v818_v47 = vadd.f32 %v1103_v43, %v1281_v24  ;;  %v605_v48 = vpop.f32.mrb[15].mxu0  ;;  %v669_v49 = vpop.f32.mrb[15].mxu1 }
 0x116   : > { %v831_v50 = vmax.f32 %v799_v40, 0.0  ;;  %v847_v51 = vmax.f32 %v815_v41, 0.0  ;;  %v800_v52 = vadd.f32 %v1281_v24, %v605_v48  ;;  %v816_v53 = vadd.f32 %v1281_v24, %v669_v49 }
 0x117   : > { %865 = vst [vmem:[%s1289_s19 + $0x70] sm:$0xff] %v833_v44  ;;  %881 = vst [vmem:[%s1289_s19 + $0xf0] sm:$0xff] %v849_v45  ;;  %v834_v54 = vmax.f32 %v802_v46, 0.0  ;;  %v850_v55 = vmax.f32 %v818_v47, 0.0 }
 0x118   : > { %863 = vst [vmem:[%s1289_s19 + $0x60] sm:$0xff] %v831_v50  ;;  %879 = vst [vmem:[%s1289_s19 + $0xe0] sm:$0xff] %v847_v51  ;;  %v832_v56 = vmax.f32 %v800_v52, 0.0  ;;  %v848_v57 = vmax.f32 %v816_v53, 0.0 }
 0x119   : > { %866 = vst [vmem:[%s1289_s19 + $0x78] sm:$0xff] %v834_v54  ;;  %882 = vst [vmem:[%s1289_s19 + $0xf8] sm:$0xff] %v850_v55 }
 0x11a   : > { %864 = vst [vmem:[%s1289_s19 + $0x68] sm:$0xff] %v832_v56  ;;  %880 = vst [vmem:[%s1289_s19 + $0xe8] sm:$0xff] %v848_v57 }
 0x11b PF: > { %s13_s14 = sadd.s32 1, %s1190_s14   ;;  %s1366_s12 = smov %s1186_s13 }
 0x11c   : > { %p10_p5 = scmp.ge.s32.totalorder %s13_s14, 10   ;;  %s1367_s13 = smov %s1369_s15 }
 0x11e   :  { %12 = sbr.rel (!%p10_p5) target bundleno = 2 (0x2), region = 76 }

// kernel: fcos_forward.17
= control target key start
LH: loop header
LB: loop body
LE: loop exit
PB: predicated region body
PF: predicated region fallthrough
CT: control target
= control target key end

     0   :  { %s1212_s12 = smov 0   ;;  %s1214_s13 = smov 0   ;;  %s1362_s0 = inlined_call_operand.vmem [shape: bf16[512,128], index: 0, kind: input, shape index: {}]   ;;  %s1363_s1 = inlined_call_operand.vmem [shape: bf16[128,128], index: 1, kind: input, shape index: {}]   ;;  %s1364_s2 = inlined_call_operand.vmem [shape: f32[1,128], index: 2, kind: input, shape index: {}]   ;;  %s1365_s3 = inlined_call_operand.vmem [shape: f32[512,128], index: 3, kind: output, shape index: {}]  }
   0x1   :  { %s1216_s14 = smov 0  }
   0x2 LB: > { %s32_s15 = sadd.s32 1, %s1186_s13  ;;  %p1000_p0 = scmp.ge.s32.totalorder %s1190_s14, 1  ;;  %s1190_s14 = sphi %s1216_s14, %s13_s14   ;;  %s1186_s13 = sphi %s1214_s13, %s1367_s13   ;;  %s1182_s12 = sphi %s1212_s12, %s1366_s12  }
   0x3   : > { %p34_p1 = scmp.ge.s32.totalorder %s32_s15, 2  ;;  %p188_p2 = scmp.lt.s32.totalorder %s1190_s14, 3 }
   0x5   : > { %s1369_s15 = smov (%p34_p1, %s32_s15), 0  ;;  %p189_p3 = pnand %p1000_p0, %p188_p2 }
   0x6   : > { %v1144_v0 = vld [vmem:[%s1363_s1] sm:$0xff] (!%p189_p3)   ;;  %s1001_s18 = sshll.u32 (!%p189_p3), %s1182_s12, 5  ;;  %v1145_v1 = vld [vmem:[%s1363_s1 + $0x8] sm:$0xff] (!%p189_p3)   ;;  %v1146_v2 = vld [vmem:[%s1363_s1 + $0x10] sm:$0xff] (!%p189_p3)  }
   0x7   : > { %192 = sbr.rel (%p189_p3) target bundleno = 283 (0x11b), region = 32  ;;  %p230_p4 = scmp.lt.s32.totalorder (!%p189_p3), %s1001_s18, 63  ;;  %1056 = vmatprep.subr.bf16.mxu0 (!%p189_p3), %v1144_v0  ;;  %1104 = vmatprep.subr.bf16.mxu1 (!%p189_p3), %v1144_v0  ;;  %v1147_v3 = vld [vmem:[%s1363_s1 + $0x18] sm:$0xff] (!%p189_p3)   ;;  %v1148_v6 = vld [vmem:[%s1363_s1 + $0x20] sm:$0xff] (!%p189_p3)   ;;  %v1149_v7 = vld [vmem:[%s1363_s1 + $0x28] sm:$0xff] (!%p189_p3)  }
   0x8   : > { %1057 = vmatpush3.bf16.msra.mxu0 (!%p189_p3), %v1144_v0  ;;  %1112 = vmatpush3.bf16.msra.mxu1 (!%p189_p3), %v1144_v0  ;;  %v1150_v8 = vld [vmem:[%s1363_s1 + $0x30] sm:$0xff] (!%p189_p3)   ;;  %v1151_v9 = vld [vmem:[%s1363_s1 + $0x38] sm:$0xff] (!%p189_p3)   ;;  %v1281_v24 = vld [vmem:[%s1364_s2] ss:$0 sm:$0xff] (!%p189_p3) }
   0x9   : > { %1058 = vmatprep.subr.bf16.mxu0 (!%p189_p3), %v1145_v1  ;;  %1105 = vmatprep.subr.bf16.mxu1 (!%p189_p3), %v1145_v1 }
   0xc   : > { %1059 = vmatpush3.bf16.msra.mxu0 (!%p189_p3), %v1145_v1  ;;  %1113 = vmatpush3.bf16.msra.mxu1 (!%p189_p3), %v1145_v1 }
   0xd   : > { %1060 = vmatprep.subr.bf16.mxu0 (!%p189_p3), %v1146_v2  ;;  %1106 = vmatprep.subr.bf16.mxu1 (!%p189_p3), %v1146_v2 }
   0xe   : > { %s1371_s18 = smov (!%p230_p4, %s1001_s18), 63 }
   0xf   : > { %s1002_s23 = sshll.u32 %s1371_s18, 2  ;;  %s1004_s12 = sshll.u32 %s1371_s18, 3 }
  0x10   : > { %s1245_s26 = scalar_lea.vmem %s1362_s0, %s1002_s23  ;;  %1061 = vmatpush3.bf16.msra.mxu0 %v1146_v2  ;;  %1114 = vmatpush3.bf16.msra.mxu1 %v1146_v2  ;;  %s1289_s19 = scalar_lea.vmem %s1365_s3, %s1004_s12 }
  0x11   : > { %v1152_v4 = vld [vmem:[%s1245_s26] sm:$0xff]   ;;  %1062 = vmatprep.subr.bf16.mxu0 %v1147_v3  ;;  %1107 = vmatprep.subr.bf16.mxu1 %v1147_v3  ;;  %v1154_v10 = vld [vmem:[%s1245_s26 + $0x8] sm:$0xff]   ;;  %v1156_v12 = vld [vmem:[%s1245_s26 + $0x10] sm:$0xff]  }
  0x12   : > { %v1153_v5 = vld [vmem:[%s1245_s26 + $0x40] sm:$0xff]   ;;  %1072 = vmatprep.mubr.bf16.mxu0 %v1152_v4  ;;  %v1155_v11 = vld [vmem:[%s1245_s26 + $0x48] sm:$0xff]   ;;  %v1157_v13 = vld [vmem:[%s1245_s26 + $0x50] sm:$0xff]  }
  0x13   : > { %1088 = vmatprep.mubr.bf16.mxu1 %v1153_v5  ;;  %v1158_v14 = vld [vmem:[%s1245_s26 + $0x18] sm:$0xff]   ;;  %v1160_v16 = vld [vmem:[%s1245_s26 + $0x20] sm:$0xff]   ;;  %v1162_v18 = vld [vmem:[%s1245_s26 + $0x28] sm:$0xff]  }
  0x14   : > { %1063 = vmatpush3.bf16.msra.mxu0 %v1147_v3  ;;  %1115 = vmatpush3.bf16.msra.mxu1 %v1147_v3  ;;  %v1159_v15 = vld [vmem:[%s1245_s26 + $0x58] sm:$0xff]   ;;  %v1161_v17 = vld [vmem:[%s1245_s26 + $0x60] sm:$0xff]   ;;  %v1163_v19 = vld [vmem:[%s1245_s26 + $0x68] sm:$0xff]  }
  0x15   : > { %1064 = vmatprep.subr.bf16.mxu0 %v1148_v6  ;;  %1108 = vmatprep.subr.bf16.mxu1 %v1148_v6  ;;  %v1164_v20 = vld [vmem:[%s1245_s26 + $0x30] sm:$0xff]   ;;  %v1166_v22 = vld [vmem:[%s1245_s26 + $0x38] sm:$0xff]  }
  0x16   : > { %v1165_v21 = vld [vmem:[%s1245_s26 + $0x70] sm:$0xff]   ;;  %v1167_v23 = vld [vmem:[%s1245_s26 + $0x78] sm:$0xff]  }
  0x18   : > { %1065 = vmatpush3.bf16.msra.mxu0 %v1148_v6  ;;  %1116 = vmatpush3.bf16.msra.mxu1 %v1148_v6 }
  0x19   : > { %1066 = vmatprep.subr.bf16.mxu0 %v1149_v7  ;;  %1109 = vmatprep.subr.bf16.mxu1 %v1149_v7 }
  0x1c   : > { %1067 = vmatpush3.bf16.msra.mxu0 %v1149_v7  ;;  %1117 = vmatpush3.bf16.msra.mxu1 %v1149_v7 }
  0x1d   : > { %1068 = vmatprep.subr.bf16.mxu0 %v1150_v8  ;;  %1110 = vmatprep.subr.bf16.mxu1 %v1150_v8 }
  0x20   : > { %1069 = vmatpush3.bf16.msra.mxu0 %v1150_v8  ;;  %1118 = vmatpush3.bf16.msra.mxu1 %v1150_v8 }
  0x21   : > { %1070 = vmatprep.subr.bf16.mxu0 %v1151_v9  ;;  %1111 = vmatprep.subr.bf16.mxu1 %v1151_v9 }
  0x24   : > { %1071 = vmatpush3.bf16.msra.mxu0 %v1151_v9  ;;  %1119 = vmatpush3.bf16.msra.mxu1 %v1151_v9 }
  0x27   : > { %1073 = vmatmul.mubr.bf16.vlgmr.msra.gmra.mrb[0].mxu0 %v1154_v10  ;;  %1089 = vmatmul.mubr.bf16.vlgmr.msra.gmra.mrb[0].mxu1 %v1155_v11 }
  0x28   : > { %1076 = vmatprep.mubr.bf16.mxu0 %v1156_v12  ;;  %1092 = vmatprep.mubr.bf16.mxu1 %v1157_v13 }
  0x2f   : > { %1077 = vmatmul.mubr.bf16.gmra.mrb[4].mxu0 %v1158_v14  ;;  %1093 = vmatmul.mubr.bf16.gmra.mrb[4].mxu1 %v1159_v15 }
  0x30   : > { %1080 = vmatprep.mubr.bf16.mxu0 %v1160_v16  ;;  %1096 = vmatprep.mubr.bf16.mxu1 %v1161_v17 }
  0x37   : > { %1081 = vmatmul.mubr.bf16.gmra.mrb[8].mxu0 %v1162_v18  ;;  %1097 = vmatmul.mubr.bf16.gmra.mrb[8].mxu1 %v1163_v19 }
  0x38   : > { %1084 = vmatprep.mubr.bf16.mxu0 %v1164_v20  ;;  %1100 = vmatprep.mubr.bf16.mxu1 %v1165_v21 }
  0x3f   : > { %1085 = vmatmul.mubr.bf16.gmra.mrb[12].mxu0 %v1166_v22  ;;  %1101 = vmatmul.mubr.bf16.gmra.mrb[12].mxu1 %v1167_v23 }
  0xfa   : > { %v1074_v25 = vpop.f32.mrb[0].mxu0  ;;  %v1090_v26 = vpop.f32.mrb[0].mxu1 }
  0xfb   : > { %v789_v27 = vadd.f32 %v1074_v25, %v1281_v24  ;;  %v805_v28 = vadd.f32 %v1090_v26, %v1281_v24  ;;  %v554_v29 = vpop.f32.mrb[1].mxu0  ;;  %v618_v30 = vpop.f32.mrb[1].mxu1 }
  0xfc   : > { %v787_v31 = vadd.f32 %v1281_v24, %v554_v29  ;;  %v803_v32 = vadd.f32 %v1281_v24, %v618_v30  ;;  %v1075_v33 = vpop.f32.mrb[2].mxu0  ;;  %v1091_v34 = vpop.f32.mrb[2].mxu1 }
  0xfd   : > { %v821_v35 = vmax.f32 %v789_v27, 0.0  ;;  %v837_v36 = vmax.f32 %v805_v28, 0.0  ;;  %v790_v37 = vadd.f32 %v1075_v33, %v1281_v24  ;;  %v806_v38 = vadd.f32 %v1091_v34, %v1281_v24  ;;  %v557_v39 = vpop.f32.mrb[3].mxu0  ;;  %v621_v40 = vpop.f32.mrb[3].mxu1 }
  0xfe   : > { %v819_v41 = vmax.f32 %v787_v31, 0.0  ;;  %v835_v42 = vmax.f32 %v803_v32, 0.0  ;;  %v788_v43 = vadd.f32 %v1281_v24, %v557_v39  ;;  %v804_v44 = vadd.f32 %v1281_v24, %v621_v40 }
  0xff   : > { %853 = vst [vmem:[%s1289_s19 + $0x10] sm:$0xff] %v821_v35  ;;  %869 = vst [vmem:[%s1289_s19 + $0x90] sm:$0xff] %v837_v36  ;;  %v822_v45 = vmax.f32 %v790_v37, 0.0  ;;  %v838_v46 = vmax.f32 %v806_v38, 0.0 }
 0x100   : > { %851 = vst [vmem:[%s1289_s19] sm:$0xff] %v819_v41  ;;  %867 = vst [vmem:[%s1289_s19 + $0x80] sm:$0xff] %v835_v42  ;;  %v820_v47 = vmax.f32 %v788_v43, 0.0  ;;  %v836_v48 = vmax.f32 %v804_v44, 0.0 }
 0x101   : > { %854 = vst [vmem:[%s1289_s19 + $0x18] sm:$0xff] %v822_v45  ;;  %870 = vst [vmem:[%s1289_s19 + $0x98] sm:$0xff] %v838_v46 }
 0x102   : > { %852 = vst [vmem:[%s1289_s19 + $0x8] sm:$0xff] %v820_v47  ;;  %868 = vst [vmem:[%s1289_s19 + $0x88] sm:$0xff] %v836_v48  ;;  %v1078_v49 = vpop.f32.mrb[4].mxu0  ;;  %v1094_v50 = vpop.f32.mrb[4].mxu1 }
 0x103   : > { %v793_v51 = vadd.f32 %v1078_v49, %v1281_v24  ;;  %v809_v52 = vadd.f32 %v1094_v50, %v1281_v24  ;;  %v570_v53 = vpop.f32.mrb[5].mxu0  ;;  %v634_v54 = vpop.f32.mrb[5].mxu1 }
 0x104   : > { %v791_v55 = vadd.f32 %v1281_v24, %v570_v53  ;;  %v807_v56 = vadd.f32 %v1281_v24, %v634_v54  ;;  %v1079_v57 = vpop.f32.mrb[6].mxu0  ;;  %v1095_v58 = vpop.f32.mrb[6].mxu1 }
 0x105   : > { %v825_v59 = vmax.f32 %v793_v51, 0.0  ;;  %v841_v60 = vmax.f32 %v809_v52, 0.0  ;;  %v794_v61 = vadd.f32 %v1079_v57, %v1281_v24  ;;  %v810_v62 = vadd.f32 %v1095_v58, %v1281_v24  ;;  %v573_v63 = vpop.f32.mrb[7].mxu0  ;;  %v637_v0 = vpop.f32.mrb[7].mxu1 }
 0x106   : > { %v823_v1 = vmax.f32 %v791_v55, 0.0  ;;  %v839_v2 = vmax.f32 %v807_v56, 0.0  ;;  %v792_v3 = vadd.f32 %v1281_v24, %v573_v63  ;;  %v808_v4 = vadd.f32 %v1281_v24, %v637_v0 }
 0x107   : > { %857 = vst [vmem:[%s1289_s19 + $0x30] sm:$0xff] %v825_v59  ;;  %873 = vst [vmem:[%s1289_s19 + $0xb0] sm:$0xff] %v841_v60  ;;  %v826_v5 = vmax.f32 %v794_v61, 0.0  ;;  %v842_v6 = vmax.f32 %v810_v62, 0.0 }
 0x108   : > { %855 = vst [vmem:[%s1289_s19 + $0x20] sm:$0xff] %v823_v1  ;;  %871 = vst [vmem:[%s1289_s19 + $0xa0] sm:$0xff] %v839_v2  ;;  %v824_v7 = vmax.f32 %v792_v3, 0.0  ;;  %v840_v8 = vmax.f32 %v808_v4, 0.0 }
 0x109   : > { %858 = vst [vmem:[%s1289_s19 + $0x38] sm:$0xff] %v826_v5  ;;  %874 = vst [vmem:[%s1289_s19 + $0xb8] sm:$0xff] %v842_v6 }
 0x10a   : > { %856 = vst [vmem:[%s1289_s19 + $0x28] sm:$0xff] %v824_v7  ;;  %872 = vst [vmem:[%s1289_s19 + $0xa8] sm:$0xff] %v840_v8  ;;  %v1082_v9 = vpop.f32.mrb[8].mxu0  ;;  %v1098_v10 = vpop.f32.mrb[8].mxu1 }
 0x10b   : > { %v797_v11 = vadd.f32 %v1082_v9, %v1281_v24  ;;  %v813_v12 = vadd.f32 %v1098_v10, %v1281_v24  ;;  %v586_v13 = vpop.f32.mrb[9].mxu0  ;;  %v650_v14 = vpop.f32.mrb[9].mxu1 }
 0x10c   : > { %v795_v15 = vadd.f32 %v1281_v24, %v586_v13  ;;  %v811_v16 = vadd.f32 %v1281_v24, %v650_v14  ;;  %v1083_v17 = vpop.f32.mrb[10].mxu0  ;;  %v1099_v18 = vpop.f32.mrb[10].mxu1 }
 0x10d   : > { %v829_v19 = vmax.f32 %v797_v11, 0.0  ;;  %v845_v20 = vmax.f32 %v813_v12, 0.0  ;;  %v798_v21 = vadd.f32 %v1083_v17, %v1281_v24  ;;  %v814_v22 = vadd.f32 %v1099_v18, %v1281_v24  ;;  %v589_v23 = vpop.f32.mrb[11].mxu0  ;;  %v653_v25 = vpop.f32.mrb[11].mxu1 }
 0x10e   : > { %v827_v26 = vmax.f32 %v795_v15, 0.0  ;;  %v843_v27 = vmax.f32 %v811_v16, 0.0  ;;  %v796_v28 = vadd.f32 %v1281_v24, %v589_v23  ;;  %v812_v29 = vadd.f32 %v1281_v24, %v653_v25 }
 0x10f   : > { %861 = vst [vmem:[%s1289_s19 + $0x50] sm:$0xff] %v829_v19  ;;  %877 = vst [vmem:[%s1289_s19 + $0xd0] sm:$0xff] %v845_v20  ;;  %v830_v30 = vmax.f32 %v798_v21, 0.0  ;;  %v846_v31 = vmax.f32 %v814_v22, 0.0 }
 0x110   : > { %859 = vst [vmem:[%s1289_s19 + $0x40] sm:$0xff] %v827_v26  ;;  %875 = vst [vmem:[%s1289_s19 + $0xc0] sm:$0xff] %v843_v27  ;;  %v828_v32 = vmax.f32 %v796_v28, 0.0  ;;  %v844_v33 = vmax.f32 %v812_v29, 0.0 }
 0x111   : > { %862 = vst [vmem:[%s1289_s19 + $0x58] sm:$0xff] %v830_v30  ;;  %878 = vst [vmem:[%s1289_s19 + $0xd8] sm:$0xff] %v846_v31 }
 0x112   : > { %860 = vst [vmem:[%s1289_s19 + $0x48] sm:$0xff] %v828_v32  ;;  %876 = vst [vmem:[%s1289_s19 + $0xc8] sm:$0xff] %v844_v33  ;;  %v1086_v34 = vpop.f32.mrb[12].mxu0  ;;  %v1102_v35 = vpop.f32.mrb[12].mxu1 }
 0x113   : > { %v801_v36 = vadd.f32 %v1086_v34, %v1281_v24  ;;  %v817_v37 = vadd.f32 %v1102_v35, %v1281_v24  ;;  %v602_v38 = vpop.f32.mrb[13].mxu0  ;;  %v666_v39 = vpop.f32.mrb[13].mxu1 }
 0x114   : > { %v799_v40 = vadd.f32 %v1281_v24, %v602_v38  ;;  %v815_v41 = vadd.f32 %v1281_v24, %v666_v39  ;;  %v1087_v42 = vpop.f32.mrb[14].mxu0  ;;  %v1103_v43 = vpop.f32.mrb[14].mxu1 }
 0x115   : > { %v833_v44 = vmax.f32 %v801_v36, 0.0  ;;  %v849_v45 = vmax.f32 %v817_v37, 0.0  ;;  %v802_v46 = vadd.f32 %v1087_v42, %v1281_v24  ;;  %v818_v47 = vadd.f32 %v1103_v43, %v1281_v24  ;;  %v605_v48 = vpop.f32.mrb[15].mxu0  ;;  %v669_v49 = vpop.f32.mrb[15].mxu1 }
 0x116   : > { %v831_v50 = vmax.f32 %v799_v40, 0.0  ;;  %v847_v51 = vmax.f32 %v815_v41, 0.0  ;;  %v800_v52 = vadd.f32 %v1281_v24, %v605_v48  ;;  %v816_v53 = vadd.f32 %v1281_v24, %v669_v49 }
 0x117   : > { %865 = vst [vmem:[%s1289_s19 + $0x70] sm:$0xff] %v833_v44  ;;  %881 = vst [vmem:[%s1289_s19 + $0xf0] sm:$0xff] %v849_v45  ;;  %v834_v54 = vmax.f32 %v802_v46, 0.0  ;;  %v850_v55 = vmax.f32 %v818_v47, 0.0 }
 0x118   : > { %863 = vst [vmem:[%s1289_s19 + $0x60] sm:$0xff] %v831_v50  ;;  %879 = vst [vmem:[%s1289_s19 + $0xe0] sm:$0xff] %v847_v51  ;;  %v832_v56 = vmax.f32 %v800_v52, 0.0  ;;  %v848_v57 = vmax.f32 %v816_v53, 0.0 }
 0x119   : > { %866 = vst [vmem:[%s1289_s19 + $0x78] sm:$0xff] %v834_v54  ;;  %882 = vst [vmem:[%s1289_s19 + $0xf8] sm:$0xff] %v850_v55 }
 0x11a   : > { %864 = vst [vmem:[%s1289_s19 + $0x68] sm:$0xff] %v832_v56  ;;  %880 = vst [vmem:[%s1289_s19 + $0xe8] sm:$0xff] %v848_v57 }
 0x11b PF: > { %s13_s14 = sadd.s32 1, %s1190_s14   ;;  %s1366_s12 = smov %s1186_s13 }
 0x11c   : > { %p10_p5 = scmp.ge.s32.totalorder %s13_s14, 4   ;;  %s1367_s13 = smov %s1369_s15 }
 0x11e   :  { %12 = sbr.rel (!%p10_p5) target bundleno = 2 (0x2), region = 76 }

// kernel: fcos_forward.18
= control target key start
LH: loop header
LB: loop body
LE: loop exit
PB: predicated region body
PF: predicated region fallthrough
CT: control target
= control target key end

     0   :  { %s820_s1 = inlined_call_operand.vmem [shape: bf16[256,128], index: 1, kind: input, shape index: {}]   ;;  %s821_s0 = inlined_call_operand.vmem [shape: bf16[128,256], index: 0, kind: input, shape index: {}]   ;;  %s822_s2 = inlined_call_operand.vmem [shape: f32[1,128], index: 2, kind: input, shape index: {}]   ;;  %s823_s3 = inlined_call_operand.vmem [shape: f32[128,128], index: 3, kind: output, shape index: {}]  }
   0x1   :  { %v595_v0 = vld [vmem:[%s820_s1 + $0x40] sm:$0xff]   ;;  %v597_v2 = vld [vmem:[%s820_s1 + $0x48] sm:$0xff]   ;;  %v599_v4 = vld [vmem:[%s820_s1 + $0x50] sm:$0xff]  }
   0x2   :  { %v596_v1 = vld [vmem:[%s820_s1] sm:$0xff]   ;;  %515 = vmatprep.subr.bf16.mxu0 %v595_v0  ;;  %579 = vmatprep.subr.bf16.mxu1 %v595_v0  ;;  %v598_v3 = vld [vmem:[%s820_s1 + $0x8] sm:$0xff]   ;;  %v600_v5 = vld [vmem:[%s820_s1 + $0x10] sm:$0xff]  }
   0x3   :  { %516 = vmatpush3.bf16.msra.mxu0 %v596_v1  ;;  %587 = vmatpush3.bf16.msra.mxu1 %v596_v1  ;;  %v601_v6 = vld [vmem:[%s820_s1 + $0x58] sm:$0xff]   ;;  %v603_v8 = vld [vmem:[%s820_s1 + $0x60] sm:$0xff]   ;;  %v605_v10 = vld [vmem:[%s820_s1 + $0x68] sm:$0xff]  }
   0x4   :  { %517 = vmatprep.subr.bf16.mxu0 %v597_v2  ;;  %580 = vmatprep.subr.bf16.mxu1 %v597_v2  ;;  %v602_v7 = vld [vmem:[%s820_s1 + $0x18] sm:$0xff]   ;;  %v604_v9 = vld [vmem:[%s820_s1 + $0x20] sm:$0xff]   ;;  %v606_v13 = vld [vmem:[%s820_s1 + $0x28] sm:$0xff]  }
   0x5   :  { %v613_v11 = vld [vmem:[%s821_s0 + $0x4] ss:$8 sps:$4 sm:$0xff]   ;;  %v607_v14 = vld [vmem:[%s820_s1 + $0x70] sm:$0xff]   ;;  %v609_v16 = vld [vmem:[%s820_s1 + $0x78] sm:$0xff]  }
   0x6   :  { %v616_v12 = vld [vmem:[%s821_s0 + $0x44] ss:$8 sps:$4 sm:$0xff]   ;;  %307 = vmatprep.mubr.bf16.mxu0 %v613_v11  ;;  %v608_v15 = vld [vmem:[%s820_s1 + $0x30] sm:$0xff]   ;;  %v610_v17 = vld [vmem:[%s820_s1 + $0x38] sm:$0xff]  }
   0x7   :  { %518 = vmatpush3.bf16.msra.mxu0 %v598_v3  ;;  %588 = vmatpush3.bf16.msra.mxu1 %v598_v3  ;;  %v611_v18 = vld [vmem:[%s821_s0] ss:$8 sps:$4 sm:$0xff]   ;;  %v617_v20 = vld [vmem:[%s821_s0 + $0x14] ss:$8 sps:$4 sm:$0xff]   ;;  %v621_v22 = vld [vmem:[%s821_s0 + $0x10] ss:$8 sps:$4 sm:$0xff]  }
   0x8   :  { %519 = vmatprep.subr.bf16.mxu0 %v599_v4  ;;  %581 = vmatprep.subr.bf16.mxu1 %v599_v4  ;;  %v614_v19 = vld [vmem:[%s821_s0 + $0x40] ss:$8 sps:$4 sm:$0xff]   ;;  %v619_v21 = vld [vmem:[%s821_s0 + $0x54] ss:$8 sps:$4 sm:$0xff]   ;;  %v622_v23 = vld [vmem:[%s821_s0 + $0x50] ss:$8 sps:$4 sm:$0xff]  }
   0x9   :  { %339 = vmatprep.mubr.bf16.mxu1 %v616_v12  ;;  %v623_v24 = vld [vmem:[%s821_s0 + $0x24] ss:$8 sps:$4 sm:$0xff]   ;;  %v627_v26 = vld [vmem:[%s821_s0 + $0x20] ss:$8 sps:$4 sm:$0xff]   ;;  %v629_v28 = vld [vmem:[%s821_s0 + $0x34] ss:$8 sps:$4 sm:$0xff]  }
   0xa   :  { %v625_v25 = vld [vmem:[%s821_s0 + $0x64] ss:$8 sps:$4 sm:$0xff]   ;;  %v628_v27 = vld [vmem:[%s821_s0 + $0x60] ss:$8 sps:$4 sm:$0xff]   ;;  %v631_v29 = vld [vmem:[%s821_s0 + $0x74] ss:$8 sps:$4 sm:$0xff]  }
   0xb   :  { %520 = vmatpush3.bf16.msra.mxu0 %v600_v5  ;;  %589 = vmatpush3.bf16.msra.mxu1 %v600_v5  ;;  %v633_v30 = vld [vmem:[%s821_s0 + $0x30] ss:$8 sps:$4 sm:$0xff]   ;;  %v754_v35 = vld [vmem:[%s822_s2] ss:$0 sm:$0xff] }
   0xc   :  { %521 = vmatprep.subr.bf16.mxu0 %v601_v6  ;;  %582 = vmatprep.subr.bf16.mxu1 %v601_v6  ;;  %v634_v31 = vld [vmem:[%s821_s0 + $0x70] ss:$8 sps:$4 sm:$0xff]  }
   0xf   :  { %522 = vmatpush3.bf16.msra.mxu0 %v602_v7  ;;  %590 = vmatpush3.bf16.msra.mxu1 %v602_v7 }
  0x10   :  { %523 = vmatprep.subr.bf16.mxu0 %v603_v8  ;;  %583 = vmatprep.subr.bf16.mxu1 %v603_v8 }
  0x13   :  { %524 = vmatpush3.bf16.msra.mxu0 %v604_v9  ;;  %591 = vmatpush3.bf16.msra.mxu1 %v604_v9 }
  0x14   :  { %525 = vmatprep.subr.bf16.mxu0 %v605_v10  ;;  %584 = vmatprep.subr.bf16.mxu1 %v605_v10 }
  0x17   :  { %526 = vmatpush3.bf16.msra.mxu0 %v606_v13  ;;  %592 = vmatpush3.bf16.msra.mxu1 %v606_v13 }
  0x18   :  { %527 = vmatprep.subr.bf16.mxu0 %v607_v14  ;;  %585 = vmatprep.subr.bf16.mxu1 %v607_v14 }
  0x1b   :  { %528 = vmatpush3.bf16.msra.mxu0 %v608_v15  ;;  %593 = vmatpush3.bf16.msra.mxu1 %v608_v15 }
  0x1c   :  { %529 = vmatprep.subr.bf16.mxu0 %v609_v16  ;;  %586 = vmatprep.subr.bf16.mxu1 %v609_v16 }
  0x1f   :  { %530 = vmatpush3.bf16.msra.mxu0 %v610_v17  ;;  %594 = vmatpush3.bf16.msra.mxu1 %v610_v17 }
  0x22   :  { %308 = vmatmul.mubr.bf16.vlgmr.msra.gmra.mrb[0].mxu0 %v611_v18  ;;  %340 = vmatmul.mubr.bf16.vlgmr.msra.gmra.mrb[0].mxu1 %v614_v19 }
  0x23   :  { %315 = vmatprep.mubr.bf16.mxu0 %v617_v20  ;;  %347 = vmatprep.mubr.bf16.mxu1 %v619_v21 }
  0x2a   :  { %316 = vmatmul.mubr.bf16.gmra.mrb[4].mxu0 %v621_v22  ;;  %348 = vmatmul.mubr.bf16.gmra.mrb[4].mxu1 %v622_v23 }
  0x2b   :  { %323 = vmatprep.mubr.bf16.mxu0 %v623_v24  ;;  %355 = vmatprep.mubr.bf16.mxu1 %v625_v25 }
  0x32   :  { %324 = vmatmul.mubr.bf16.gmra.mrb[8].mxu0 %v627_v26  ;;  %356 = vmatmul.mubr.bf16.gmra.mrb[8].mxu1 %v628_v27 }
  0x33   :  { %331 = vmatprep.mubr.bf16.mxu0 %v629_v28  ;;  %363 = vmatprep.mubr.bf16.mxu1 %v631_v29 }
  0x3a   :  { %332 = vmatmul.mubr.bf16.gmra.mrb[12].mxu0 %v633_v30  ;;  %364 = vmatmul.mubr.bf16.gmra.mrb[12].mxu1 %v634_v31 }
  0xf5   :  { %v531_v32 = vpop.f32.mrb[0].mxu0  ;;  %v555_v33 = vpop.f32.mrb[0].mxu1 }
  0xf6   :  { %v532_v34 = vpop.f32.mrb[1].mxu0  ;;  %v556_v36 = vpop.f32.mrb[1].mxu1 }
  0xf7   :  { %v533_v37 = vadd.f32 %v532_v34, %v531_v32  ;;  %v557_v38 = vadd.f32 %v556_v36, %v555_v33  ;;  %v534_v39 = vpop.f32.mrb[2].mxu0  ;;  %v558_v40 = vpop.f32.mrb[2].mxu1 }
  0xf8   :  { %v535_v41 = vpop.f32.mrb[3].mxu0  ;;  %v559_v42 = vpop.f32.mrb[3].mxu1 }
  0xf9   :  { %v430_v43 = vadd.f32 %v533_v37, %v754_v35  ;;  %v438_v44 = vadd.f32 %v557_v38, %v754_v35  ;;  %v536_v45 = vadd.f32 %v535_v41, %v534_v39  ;;  %v560_v46 = vadd.f32 %v559_v42, %v558_v40 }
  0xfb   :  { %v446_v47 = vmax.f32 %v430_v43, 0.0  ;;  %v454_v48 = vmax.f32 %v438_v44, 0.0  ;;  %v431_v49 = vadd.f32 %v536_v45, %v754_v35  ;;  %v439_v50 = vadd.f32 %v560_v46, %v754_v35 }
  0xfd   :  { %462 = vst [vmem:[%s823_s3] sm:$0xff] %v446_v47  ;;  %470 = vst [vmem:[%s823_s3 + $0x40] sm:$0xff] %v454_v48  ;;  %v447_v51 = vmax.f32 %v431_v49, 0.0  ;;  %v455_v52 = vmax.f32 %v439_v50, 0.0  ;;  %v537_v53 = vpop.f32.mrb[4].mxu0  ;;  %v561_v54 = vpop.f32.mrb[4].mxu1 }
  0xfe   :  { %v538_v55 = vpop.f32.mrb[5].mxu0  ;;  %v562_v56 = vpop.f32.mrb[5].mxu1 }
  0xff   :  { %463 = vst [vmem:[%s823_s3 + $0x8] sm:$0xff] %v447_v51  ;;  %471 = vst [vmem:[%s823_s3 + $0x48] sm:$0xff] %v455_v52  ;;  %v539_v57 = vadd.f32 %v538_v55, %v537_v53  ;;  %v563_v58 = vadd.f32 %v562_v56, %v561_v54  ;;  %v540_v59 = vpop.f32.mrb[6].mxu0  ;;  %v564_v60 = vpop.f32.mrb[6].mxu1 }
 0x100   :  { %v541_v61 = vpop.f32.mrb[7].mxu0  ;;  %v565_v62 = vpop.f32.mrb[7].mxu1 }
 0x101   :  { %v432_v63 = vadd.f32 %v539_v57, %v754_v35  ;;  %v440_v0 = vadd.f32 %v563_v58, %v754_v35  ;;  %v542_v1 = vadd.f32 %v541_v61, %v540_v59  ;;  %v566_v2 = vadd.f32 %v565_v62, %v564_v60 }
 0x103   :  { %v448_v3 = vmax.f32 %v432_v63, 0.0  ;;  %v456_v4 = vmax.f32 %v440_v0, 0.0  ;;  %v433_v5 = vadd.f32 %v542_v1, %v754_v35  ;;  %v441_v6 = vadd.f32 %v566_v2, %v754_v35 }
 0x105   :  { %464 = vst [vmem:[%s823_s3 + $0x10] sm:$0xff] %v448_v3  ;;  %472 = vst [vmem:[%s823_s3 + $0x50] sm:$0xff] %v456_v4  ;;  %v449_v7 = vmax.f32 %v433_v5, 0.0  ;;  %v457_v8 = vmax.f32 %v441_v6, 0.0  ;;  %v543_v9 = vpop.f32.mrb[8].mxu0  ;;  %v567_v10 = vpop.f32.mrb[8].mxu1 }
 0x106   :  { %v544_v11 = vpop.f32.mrb[9].mxu0  ;;  %v568_v12 = vpop.f32.mrb[9].mxu1 }
 0x107   :  { %465 = vst [vmem:[%s823_s3 + $0x18] sm:$0xff] %v449_v7  ;;  %473 = vst [vmem:[%s823_s3 + $0x58] sm:$0xff] %v457_v8  ;;  %v545_v13 = vadd.f32 %v544_v11, %v543_v9  ;;  %v569_v14 = vadd.f32 %v568_v12, %v567_v10  ;;  %v546_v15 = vpop.f32.mrb[10].mxu0  ;;  %v570_v16 = vpop.f32.mrb[10].mxu1 }
 0x108   :  { %v547_v17 = vpop.f32.mrb[11].mxu0  ;;  %v571_v18 = vpop.f32.mrb[11].mxu1 }
 0x109   :  { %v434_v19 = vadd.f32 %v545_v13, %v754_v35  ;;  %v442_v20 = vadd.f32 %v569_v14, %v754_v35  ;;  %v548_v21 = vadd.f32 %v547_v17, %v546_v15  ;;  %v572_v22 = vadd.f32 %v571_v18, %v570_v16 }
 0x10b   :  { %v450_v23 = vmax.f32 %v434_v19, 0.0  ;;  %v458_v24 = vmax.f32 %v442_v20, 0.0  ;;  %v435_v25 = vadd.f32 %v548_v21, %v754_v35  ;;  %v443_v26 = vadd.f32 %v572_v22, %v754_v35 }
 0x10d   :  { %466 = vst [vmem:[%s823_s3 + $0x20] sm:$0xff] %v450_v23  ;;  %474 = vst [vmem:[%s823_s3 + $0x60] sm:$0xff] %v458_v24  ;;  %v451_v27 = vmax.f32 %v435_v25, 0.0  ;;  %v459_v28 = vmax.f32 %v443_v26, 0.0  ;;  %v549_v29 = vpop.f32.mrb[12].mxu0  ;;  %v573_v30 = vpop.f32.mrb[12].mxu1 }
 0x10e   :  { %v550_v31 = vpop.f32.mrb[13].mxu0  ;;  %v574_v32 = vpop.f32.mrb[13].mxu1 }
 0x10f   :  { %467 = vst [vmem:[%s823_s3 + $0x28] sm:$0xff] %v451_v27  ;;  %475 = vst [vmem:[%s823_s3 + $0x68] sm:$0xff] %v459_v28  ;;  %v551_v33 = vadd.f32 %v550_v31, %v549_v29  ;;  %v575_v34 = vadd.f32 %v574_v32, %v573_v30  ;;  %v552_v36 = vpop.f32.mrb[14].mxu0  ;;  %v576_v37 = vpop.f32.mrb[14].mxu1 }
 0x110   :  { %v553_v38 = vpop.f32.mrb[15].mxu0  ;;  %v577_v39 = vpop.f32.mrb[15].mxu1 }
 0x111   :  { %v436_v40 = vadd.f32 %v551_v33, %v754_v35  ;;  %v444_v41 = vadd.f32 %v575_v34, %v754_v35  ;;  %v554_v42 = vadd.f32 %v553_v38, %v552_v36  ;;  %v578_v43 = vadd.f32 %v577_v39, %v576_v37 }
 0x113   :  { %v452_v44 = vmax.f32 %v436_v40, 0.0  ;;  %v460_v45 = vmax.f32 %v444_v41, 0.0  ;;  %v437_v46 = vadd.f32 %v554_v42, %v754_v35  ;;  %v445_v47 = vadd.f32 %v578_v43, %v754_v35 }
 0x115   :  { %468 = vst [vmem:[%s823_s3 + $0x30] sm:$0xff] %v452_v44  ;;  %476 = vst [vmem:[%s823_s3 + $0x70] sm:$0xff] %v460_v45  ;;  %v453_v48 = vmax.f32 %v437_v46, 0.0  ;;  %v461_v49 = vmax.f32 %v445_v47, 0.0 }
 0x117   :  { %469 = vst [vmem:[%s823_s3 + $0x38] sm:$0xff] %v453_v48  ;;  %477 = vst [vmem:[%s823_s3 + $0x78] sm:$0xff] %v461_v49 }

// kernel: fcos_forward.19
= control target key start
LH: loop header
LB: loop body
LE: loop exit
PB: predicated region body
PF: predicated region fallthrough
CT: control target
= control target key end

     0   :  { %s641_s1 = inlined_call_operand.vmem [shape: bf16[384,128], index: 1, kind: input, shape index: {}]   ;;  %s642_s0 = inlined_call_operand.vmem [shape: bf16[32,384], index: 0, kind: input, shape index: {}]   ;;  %s643_s2 = inlined_call_operand.vmem [shape: f32[1,128], index: 2, kind: input, shape index: {}]   ;;  %s644_s3 = inlined_call_operand.vmem [shape: f32[32,128], index: 3, kind: output, shape index: {}]  }
   0x1   :  { %v484_v0 = vld [vmem:[%s641_s1 + $0x40] sm:$0xff]   ;;  %v487_v3 = vld [vmem:[%s641_s1 + $0x48] sm:$0xff]   ;;  %v490_v6 = vld [vmem:[%s641_s1 + $0x50] sm:$0xff]  }
   0x2   :  { %v485_v1 = vld [vmem:[%s641_s1] sm:$0xff]   ;;  %426 = vmatprep.subr.bf16.mxu0 %v484_v0  ;;  %v488_v4 = vld [vmem:[%s641_s1 + $0x8] sm:$0xff]   ;;  %v491_v7 = vld [vmem:[%s641_s1 + $0x10] sm:$0xff]  }
   0x3   :  { %v486_v2 = vld [vmem:[%s641_s1 + $0x80] sm:$0xff]   ;;  %427 = vmatpush3.bf16.msra.mxu0 %v485_v1  ;;  %v489_v5 = vld [vmem:[%s641_s1 + $0x88] sm:$0xff]   ;;  %v492_v8 = vld [vmem:[%s641_s1 + $0x90] sm:$0xff]  }
   0x4   :  { %464 = vmatprep.subr.bf16.mxu1 %v486_v2  ;;  %428 = vmatprep.subr.bf16.mxu0 %v487_v3  ;;  %v493_v9 = vld [vmem:[%s641_s1 + $0x58] sm:$0xff]   ;;  %v496_v12 = vld [vmem:[%s641_s1 + $0x60] sm:$0xff]   ;;  %v499_v15 = vld [vmem:[%s641_s1 + $0x68] sm:$0xff]  }
   0x5   :  { %465 = vmatpush3.bf16.msra.mxu1 %v486_v2  ;;  %v494_v10 = vld [vmem:[%s641_s1 + $0x18] sm:$0xff]   ;;  %v498_v13 = vld [vmem:[%s641_s1 + $0xa0] sm:$0xff]   ;;  %v501_v16 = vld [vmem:[%s641_s1 + $0xa8] sm:$0xff]  }
   0x6   :  { %466 = vmatprep.subr.bf16.mxu1 %v489_v5  ;;  %v495_v11 = vld [vmem:[%s641_s1 + $0x98] sm:$0xff]   ;;  %v497_v14 = vld [vmem:[%s641_s1 + $0x20] sm:$0xff]   ;;  %v500_v17 = vld [vmem:[%s641_s1 + $0x28] sm:$0xff]  }
   0x7   :  { %429 = vmatpush3.bf16.msra.mxu0 %v488_v4  ;;  %v502_v18 = vld [vmem:[%s641_s1 + $0x70] sm:$0xff]   ;;  %v505_v21 = vld [vmem:[%s641_s1 + $0x78] sm:$0xff]   ;;  %v508_v26 = vld [vmem:[%s642_s0] ss:$12 sps:$4 sm:$0xff]  }
   0x8   :  { %430 = vmatprep.subr.bf16.mxu0 %v490_v6  ;;  %v503_v19 = vld [vmem:[%s641_s1 + $0x30] sm:$0xff]   ;;  %v507_v22 = vld [vmem:[%s641_s1 + $0xb8] sm:$0xff]   ;;  %v512_v28 = vld [vmem:[%s642_s0 + $0x20] ss:$12 sps:$4 sm:$0xff]  }
   0x9   :  { %467 = vmatpush3.bf16.msra.mxu1 %v489_v5  ;;  %v504_v20 = vld [vmem:[%s641_s1 + $0xb0] sm:$0xff]   ;;  %v506_v25 = vld [vmem:[%s641_s1 + $0x38] sm:$0xff]   ;;  %v425_v37 = vld [vmem:[%s643_s2] ss:$0 sm:$0xff] }
   0xa   :  { %468 = vmatprep.subr.bf16.mxu1 %v492_v8  ;;  %v510_v23 = vld [vmem:[%s642_s0 + $0x4] ss:$12 sps:$4 sm:$0xff]   ;;  %v511_v24 = vld [vmem:[%s642_s0 + $0x8] ss:$12 sps:$4 sm:$0xff]  }
   0xb   :  { %431 = vmatpush3.bf16.msra.mxu0 %v491_v7  ;;  %291 = vmatprep.mubr.bf16.mxu0 %v510_v23  ;;  %v513_v27 = vld [vmem:[%s642_s0 + $0x1c] ss:$12 sps:$4 sm:$0xff]   ;;  %v515_v29 = vld [vmem:[%s642_s0 + $0x18] ss:$12 sps:$4 sm:$0xff]  }
   0xc   :  { %432 = vmatprep.subr.bf16.mxu0 %v493_v9  ;;  %480 = vmatprep.mubr.bf16.mxu1 %v511_v24 }
   0xd   :  { %469 = vmatpush3.bf16.msra.mxu1 %v492_v8 }
   0xe   :  { %470 = vmatprep.subr.bf16.mxu1 %v495_v11 }
   0xf   :  { %433 = vmatpush3.bf16.msra.mxu0 %v494_v10 }
  0x10   :  { %434 = vmatprep.subr.bf16.mxu0 %v496_v12 }
  0x11   :  { %471 = vmatpush3.bf16.msra.mxu1 %v495_v11 }
  0x12   :  { %472 = vmatprep.subr.bf16.mxu1 %v498_v13 }
  0x13   :  { %435 = vmatpush3.bf16.msra.mxu0 %v497_v14 }
  0x14   :  { %436 = vmatprep.subr.bf16.mxu0 %v499_v15 }
  0x15   :  { %473 = vmatpush3.bf16.msra.mxu1 %v498_v13 }
  0x16   :  { %474 = vmatprep.subr.bf16.mxu1 %v501_v16 }
  0x17   :  { %437 = vmatpush3.bf16.msra.mxu0 %v500_v17 }
  0x18   :  { %438 = vmatprep.subr.bf16.mxu0 %v502_v18 }
  0x19   :  { %475 = vmatpush3.bf16.msra.mxu1 %v501_v16 }
  0x1a   :  { %476 = vmatprep.subr.bf16.mxu1 %v504_v20 }
  0x1b   :  { %439 = vmatpush3.bf16.msra.mxu0 %v503_v19 }
  0x1c   :  { %440 = vmatprep.subr.bf16.mxu0 %v505_v21 }
  0x1d   :  { %477 = vmatpush3.bf16.msra.mxu1 %v504_v20 }
  0x1e   :  { %478 = vmatprep.subr.bf16.mxu1 %v507_v22 }
  0x1f   :  { %441 = vmatpush3.bf16.msra.mxu0 %v506_v25 }
  0x21   :  { %479 = vmatpush3.bf16.msra.mxu1 %v507_v22 }
  0x22   :  { %292 = vmatmul.mubr.bf16.vlgmr.msra.gmra.mrb[0].mxu0 %v508_v26 }
  0x23   :  { %299 = vmatprep.mubr.bf16.mxu0 %v513_v27 }
  0x24   :  { %481 = vmatmul.mubr.bf16.vlgmr.msra.gmra.mrb[0].mxu1 %v512_v28 }
  0x2a   :  { %300 = vmatmul.mubr.bf16.gmra.mrb[4].mxu0 %v515_v29 }
  0xf5   :  { %v442_v30 = vpop.f32.mrb[0].mxu0 }
  0xf6   :  { %v443_v31 = vpop.f32.mrb[1].mxu0 }
  0xf7   :  { %v444_v32 = vadd.f32 %v443_v31, %v442_v30  ;;  %v445_v33 = vpop.f32.mrb[2].mxu0  ;;  %v482_v34 = vpop.f32.mrb[0].mxu1 }
  0xf8   :  { %v446_v35 = vpop.f32.mrb[3].mxu0  ;;  %v342_v36 = vpop.f32.mrb[1].mxu1 }
  0xf9   :  { %v447_v38 = vadd.f32 %v446_v35, %v445_v33  ;;  %v343_v39 = vadd.f32 %v444_v32, %v342_v36  ;;  %v483_v40 = vpop.f32.mrb[2].mxu1 }
  0xfa   :  { %v345_v41 = vpop.f32.mrb[3].mxu1 }
  0xfb   :  { %v379_v42 = vadd.f32 %v425_v37, %v343_v39  ;;  %v346_v43 = vadd.f32 %v447_v38, %v345_v41 }
  0xfd   :  { %v383_v44 = vmax.f32 %v379_v42, 0.0  ;;  %v380_v45 = vadd.f32 %v425_v37, %v346_v43  ;;  %v448_v46 = vpop.f32.mrb[4].mxu0 }
  0xfe   :  { %v449_v47 = vpop.f32.mrb[5].mxu0 }
  0xff   :  { %387 = vst [vmem:[%s644_s3] sm:$0xff] %v383_v44  ;;  %v384_v48 = vmax.f32 %v380_v45, 0.0  ;;  %v450_v49 = vadd.f32 %v449_v47, %v448_v46  ;;  %v451_v50 = vpop.f32.mrb[6].mxu0 }
 0x100   :  { %v452_v51 = vpop.f32.mrb[7].mxu0 }
 0x101   :  { %388 = vst [vmem:[%s644_s3 + $0x8] sm:$0xff] %v384_v48  ;;  %v351_v52 = vadd.f32 %v482_v34, %v450_v49  ;;  %v453_v53 = vadd.f32 %v452_v51, %v451_v50 }
 0x103   :  { %v381_v54 = vadd.f32 %v425_v37, %v351_v52  ;;  %v354_v55 = vadd.f32 %v483_v40, %v453_v53 }
 0x105   :  { %v385_v56 = vmax.f32 %v381_v54, 0.0  ;;  %v382_v57 = vadd.f32 %v425_v37, %v354_v55 }
 0x107   :  { %389 = vst [vmem:[%s644_s3 + $0x10] sm:$0xff] %v385_v56  ;;  %v386_v58 = vmax.f32 %v382_v57, 0.0 }
 0x109   :  { %390 = vst [vmem:[%s644_s3 + $0x18] sm:$0xff] %v386_v58 }

// kernel: fcos_forward.20
= control target key start
LH: loop header
LB: loop body
LE: loop exit
PB: predicated region body
PF: predicated region fallthrough
CT: control target
= control target key end

     0   :  { %s621_s12 = smov 0   ;;  %s623_s13 = smov 0   ;;  %s670_s0 = inlined_call_operand.vmem [shape: bf16[8,640], index: 0, kind: input, shape index: {}]   ;;  %s671_s1 = inlined_call_operand.vmem [shape: bf16[640,128], index: 1, kind: input, shape index: {}]   ;;  %s672_s2 = inlined_call_operand.vmem [shape: f32[1,128], index: 2, kind: input, shape index: {}]   ;;  %s673_s3 = inlined_call_operand.vmem [shape: f32[8,128], index: 3, kind: output, shape index: {}]  }
   0x1   :  { %s625_s14 = smov 0  }
   0x2 LB: > { %s25_s15 = sadd.s32 1, %s592_s13  ;;  %p492_p0 = scmp.ge.s32.totalorder %s596_s14, 1  ;;  %s596_s14 = sphi %s625_s14, %s13_s14   ;;  %s592_s13 = sphi %s623_s13, %s675_s13   ;;  %s588_s12 = sphi %s621_s12, %s674_s12  }
   0x3   : > { %p26_p1 = scmp.ge.s32.totalorder %s25_s15, 5  ;;  %p187_p2 = scmp.lt.s32.totalorder %s596_s14, 6 }
   0x5   : > { %s677_s15 = smov (%p26_p1, %s25_s15), 0  ;;  %p188_p3 = pnand %p492_p0, %p187_p2 }
   0x6   : > { %p229_p4 = scmp.lt.s32.totalorder (!%p188_p3), %s588_s12, 4  ;;  %s494_s16 = sshll.u32 (!%p188_p3), %s588_s12, 4 }
   0x7   : > { %191 = sbr.rel (%p188_p3) target bundleno = 282 (0x11a), region = 32  ;;  %p236_p5 = scmp.lt.s32.totalorder (!%p188_p3), %s494_s16, 79 }
   0x8   : > { %p496_p6 = scmp.ne.s32.totalorder (!%p188_p3), %s588_s12, 0 }
   0xe   : > { %s230_s17 = scalar_select %p229_p4, %s588_s12, 4 }
   0xf   : > { %s679_s16 = smov (!%p236_p5, %s494_s16), 79  ;;  %258 = sbr.rel (%p496_p6) target bundleno = 22 (0x16), region = 36 }
  0x10   : > { %s493_s18 = sshll.u32 %s230_s17, 2  ;;  %s495_s22 = sshll.u32 %s679_s16, 2  ;;  %v598_v0 = vmov (!%p496_p6), 0.0  }
  0x11   : > { %s647_s21 = scalar_lea.vmem %s670_s0, %s493_s18  ;;  %s242_s25 = scalar_lea.vmem %s671_s1, %s495_s22  ;;  %259 = vst [vmem:[#allocation2] sm:$0xff] (!%p496_p6), %v598_v0 }
  0x16 PF: > { %v566_v1 = vld [vmem:[%s242_s25] sm:$0xff]   ;;  %v599_v2 = vmov 0.0   ;;  %v567_v3 = vld [vmem:[%s242_s25 + $0x8] sm:$0xff]   ;;  %vm600_vm0 = vmmov 0   ;;  %v568_v4 = vld [vmem:[%s242_s25 + $0x10] sm:$0xff]   ;;  %p505_p7 = scmp.ne.s32.totalorder %s588_s12, 4 }
  0x17   : > { %519 = vmatprep.subr.bf16.mxu0 %v599_v2  ;;  %535 = vmatprep.mubr.msk.bf16.mxu0 %vm600_vm0, %v599_v2  ;;  %v569_v5 = vld [vmem:[%s242_s25 + $0x18] sm:$0xff]   ;;  %v570_v6 = vld [vmem:[%s242_s25 + $0x20] sm:$0xff]   ;;  %v571_v7 = vld [vmem:[%s242_s25 + $0x28] sm:$0xff]  }
  0x18   : > { %520 = vmatpush3.bf16.msra.mxu0 %v566_v1  ;;  %v572_v8 = vld [vmem:[%s242_s25 + $0x30] sm:$0xff]   ;;  %v573_v9 = vld [vmem:[%s242_s25 + $0x38] sm:$0xff]   ;;  %v261_v10 = vld [vmem:[%s647_s21] sm:$0xf] }
  0x19   : > { %521 = vmatprep.subr.bf16.mxu0 %v599_v2  ;;  %v260_v11 = vld [vmem:[#allocation2] sm:$0xff] }
  0x1a   : > { %v506_v18 = vld [vmem:[%s672_s2] ss:$0 sm:$0xff] (!%p505_p7) }
  0x1c   : > { %522 = vmatpush3.bf16.msra.mxu0 %v567_v3 }
  0x1d   : > { %523 = vmatprep.subr.bf16.mxu0 %v599_v2 }
  0x20   : > { %524 = vmatpush3.bf16.msra.mxu0 %v568_v4 }
  0x21   : > { %525 = vmatprep.subr.bf16.mxu0 %v599_v2 }
  0x24   : > { %526 = vmatpush3.bf16.msra.mxu0 %v569_v5 }
  0x25   : > { %527 = vmatprep.subr.bf16.mxu0 %v599_v2 }
  0x28   : > { %528 = vmatpush3.bf16.msra.mxu0 %v570_v6 }
  0x29   : > { %529 = vmatprep.subr.bf16.mxu0 %v599_v2 }
  0x2c   : > { %530 = vmatpush3.bf16.msra.mxu0 %v571_v7 }
  0x2d   : > { %531 = vmatprep.subr.bf16.mxu0 %v599_v2 }
  0x30   : > { %532 = vmatpush3.bf16.msra.mxu0 %v572_v8 }
  0x31   : > { %533 = vmatprep.subr.bf16.mxu0 %v599_v2 }
  0x34   : > { %534 = vmatpush3.bf16.msra.mxu0 %v573_v9 }
  0x37   : > { %536 = vmatmul.mubr.bf16.vlgmr.msra.gmra.mrb[0].mxu0 %v261_v10 }
 0x107   : > { %371 = sbr.rel (%p505_p7) target bundleno = 282 (0x11a), region = 40 }
 0x10a   : > { %v360_v12 = vpop.f32.mrb[0].mxu0 }
 0x10b   : > { %v366_v13 = vadd.f32 %v360_v12, %v260_v11  ;;  %v537_v14 = vpop.f32.mrb[1].mxu0 }
 0x10c   : > { %v363_v15 = vpop.f32.mrb[2].mxu0 }
 0x10d   : > { %367 = vst [vmem:[#allocation2] sm:$0xff] %v366_v13  ;;  %v538_v16 = vpop.f32.mrb[3].mxu0 }
 0x114   : > { %v372_v17 = vld [vmem:[#allocation2] sm:$0xff] }
 0x115   : > { %v380_v19 = vadd.f32 %v506_v18, %v372_v17 }
 0x117   : > { %v381_v20 = vmax.f32 %v380_v19, 0.0 }
 0x119   : > { %382 = vst [vmem:[%s673_s3] sm:$0xff] %v381_v20 }
 0x11a PF: > { %s13_s14 = sadd.s32 1, %s596_s14   ;;  %s674_s12 = smov %s592_s13 }
 0x11b   : > { %p10_p8 = scmp.ge.s32.totalorder %s13_s14, 7   ;;  %s675_s13 = smov %s677_s15 }
 0x11d   :  { %12 = sbr.rel (!%p10_p8) target bundleno = 2 (0x2), region = 76 }

// kernel: fcos_forward.21
= control target key start
LH: loop header
LB: loop body
LE: loop exit
PB: predicated region body
PF: predicated region fallthrough
CT: control target
= control target key end

     0   :  { %v193_v0 = vmov 0.0   ;;  %vm194_vm0 = vmmov 0   ;;  %s248_s1 = inlined_call_operand.vmem [shape: bf16[128,128], index: 1, kind: input, shape index: {}]   ;;  %s249_s0 = inlined_call_operand.vmem [shape: bf16[8,128], index: 0, kind: input, shape index: {}]   ;;  %s250_s2 = inlined_call_operand.vmem [shape: f32[1,128], index: 2, kind: input, shape index: {}]   ;;  %s251_s3 = inlined_call_operand.vmem [shape: f32[8,128], index: 3, kind: output, shape index: {}]  }
   0x1   :  { %163 = vmatprep.subr.bf16.mxu0 %v193_v0  ;;  %v185_v1 = vld [vmem:[%s248_s1] sm:$0xff]   ;;  %179 = vmatprep.mubr.msk.bf16.mxu0 %vm194_vm0, %v193_v0  ;;  %v186_v2 = vld [vmem:[%s248_s1 + $0x8] sm:$0xff]   ;;  %v187_v3 = vld [vmem:[%s248_s1 + $0x10] sm:$0xff]  }
   0x2   :  { %164 = vmatpush3.bf16.msra.mxu0 %v185_v1  ;;  %v188_v4 = vld [vmem:[%s248_s1 + $0x18] sm:$0xff]   ;;  %v189_v5 = vld [vmem:[%s248_s1 + $0x20] sm:$0xff]   ;;  %v190_v6 = vld [vmem:[%s248_s1 + $0x28] sm:$0xff]  }
   0x3   :  { %165 = vmatprep.subr.bf16.mxu0 %v193_v0  ;;  %v191_v7 = vld [vmem:[%s248_s1 + $0x30] sm:$0xff]   ;;  %v192_v8 = vld [vmem:[%s248_s1 + $0x38] sm:$0xff]   ;;  %v21_v9 = vld [vmem:[%s249_s0] sm:$0xf] }
   0x4   :  { %v153_v10 = vld [vmem:[%s250_s2] ss:$0 sm:$0xff] }
   0x6   :  { %166 = vmatpush3.bf16.msra.mxu0 %v186_v2 }
   0x7   :  { %167 = vmatprep.subr.bf16.mxu0 %v193_v0 }
   0xa   :  { %168 = vmatpush3.bf16.msra.mxu0 %v187_v3 }
   0xb   :  { %169 = vmatprep.subr.bf16.mxu0 %v193_v0 }
   0xe   :  { %170 = vmatpush3.bf16.msra.mxu0 %v188_v4 }
   0xf   :  { %171 = vmatprep.subr.bf16.mxu0 %v193_v0 }
  0x12   :  { %172 = vmatpush3.bf16.msra.mxu0 %v189_v5 }
  0x13   :  { %173 = vmatprep.subr.bf16.mxu0 %v193_v0 }
  0x16   :  { %174 = vmatpush3.bf16.msra.mxu0 %v190_v6 }
  0x17   :  { %175 = vmatprep.subr.bf16.mxu0 %v193_v0 }
  0x1a   :  { %176 = vmatpush3.bf16.msra.mxu0 %v191_v7 }
  0x1b   :  { %177 = vmatprep.subr.bf16.mxu0 %v193_v0 }
  0x1e   :  { %178 = vmatpush3.bf16.msra.mxu0 %v192_v8 }
  0x21   :  { %180 = vmatmul.mubr.bf16.vlgmr.msra.gmra.mrb[0].mxu0 %v21_v9 }
  0xf4   :  { %v120_v11 = vpop.f32.mrb[0].mxu0 }
  0xf5   :  { %v139_v12 = vadd.f32 %v153_v10, %v120_v11  ;;  %v181_v13 = vpop.f32.mrb[1].mxu0 }
  0xf6   :  { %v123_v14 = vpop.f32.mrb[2].mxu0 }
  0xf7   :  { %140 = vst [vmem:[%s251_s3] sm:$0xff] %v139_v12  ;;  %v182_v15 = vpop.f32.mrb[3].mxu0 }

// kernel: fcos_forward.22
= control target key start
LH: loop header
LB: loop body
LE: loop exit
PB: predicated region body
PF: predicated region fallthrough
CT: control target
= control target key end

     0   :  { %v433_v1 = vmov 0.0   ;;  %vm434_vm0 = vmmov 0   ;;  %s539_s1 = inlined_call_operand.vmem [shape: bf16[384,128], index: 1, kind: input, shape index: {}]   ;;  %s540_s0 = inlined_call_operand.vmem [shape: bf16[8,384], index: 0, kind: input, shape index: {}]   ;;  %s541_s2 = inlined_call_operand.vmem [shape: f32[1,128], index: 2, kind: input, shape index: {}]   ;;  %s542_s3 = inlined_call_operand.vmem [shape: f32[8,128], index: 3, kind: output, shape index: {}]  }
   0x1   :  { %v406_v0 = vld [vmem:[%s539_s1 + $0x40] sm:$0xff]   ;;  %384 = vmatprep.subr.bf16.mxu1 %v433_v1  ;;  %400 = vmatprep.mubr.msk.bf16.mxu1 %vm434_vm0, %v433_v1  ;;  %v409_v4 = vld [vmem:[%s539_s1 + $0x48] sm:$0xff]   ;;  %v412_v7 = vld [vmem:[%s539_s1 + $0x50] sm:$0xff]  }
   0x2   :  { %v407_v2 = vld [vmem:[%s539_s1] sm:$0xff]   ;;  %353 = vmatprep.subr.bf16.mxu0 %v406_v0  ;;  %v410_v5 = vld [vmem:[%s539_s1 + $0x8] sm:$0xff]   ;;  %v413_v8 = vld [vmem:[%s539_s1 + $0x10] sm:$0xff]  }
   0x3   :  { %v408_v3 = vld [vmem:[%s539_s1 + $0x80] sm:$0xff]   ;;  %354 = vmatpush3.bf16.msra.mxu0 %v407_v2  ;;  %v411_v6 = vld [vmem:[%s539_s1 + $0x88] sm:$0xff]   ;;  %v414_v9 = vld [vmem:[%s539_s1 + $0x90] sm:$0xff]  }
   0x4   :  { %385 = vmatpush3.bf16.msra.mxu1 %v408_v3  ;;  %355 = vmatprep.subr.bf16.mxu0 %v409_v4  ;;  %v415_v10 = vld [vmem:[%s539_s1 + $0x58] sm:$0xff]   ;;  %v418_v13 = vld [vmem:[%s539_s1 + $0x60] sm:$0xff]   ;;  %v421_v16 = vld [vmem:[%s539_s1 + $0x68] sm:$0xff]  }
   0x5   :  { %386 = vmatprep.subr.bf16.mxu1 %v433_v1  ;;  %v416_v11 = vld [vmem:[%s539_s1 + $0x18] sm:$0xff]   ;;  %v419_v14 = vld [vmem:[%s539_s1 + $0x20] sm:$0xff]   ;;  %v422_v17 = vld [vmem:[%s539_s1 + $0x28] sm:$0xff]  }
   0x6   :  { %v417_v12 = vld [vmem:[%s539_s1 + $0x98] sm:$0xff]   ;;  %v420_v15 = vld [vmem:[%s539_s1 + $0xa0] sm:$0xff]   ;;  %v423_v18 = vld [vmem:[%s539_s1 + $0xa8] sm:$0xff]  }
   0x7   :  { %356 = vmatpush3.bf16.msra.mxu0 %v410_v5  ;;  %v424_v19 = vld [vmem:[%s539_s1 + $0x70] sm:$0xff]   ;;  %v427_v22 = vld [vmem:[%s539_s1 + $0x78] sm:$0xff]   ;;  %v21_v23 = vld [vmem:[%s540_s0] sm:$0xff] }
   0x8   :  { %387 = vmatpush3.bf16.msra.mxu1 %v411_v6  ;;  %357 = vmatprep.subr.bf16.mxu0 %v412_v7  ;;  %v425_v20 = vld [vmem:[%s539_s1 + $0x30] sm:$0xff]   ;;  %v326_v24 = vcombine.high %v21_v23, %v21_v23  ;;  %v428_v25 = vld [vmem:[%s539_s1 + $0x38] sm:$0xff]   ;;  %v325_v27 = vcombine.low %v21_v23, %v21_v23  ;;  %v432_v28 = vld [vmem:[%s540_s0 + $0x8] ss:$0 sps:$4 sm:$0xff]  }
   0x9   :  { %388 = vmatprep.subr.bf16.mxu1 %v433_v1  ;;  %v426_v21 = vld [vmem:[%s539_s1 + $0xb0] sm:$0xff]   ;;  %v429_v26 = vld [vmem:[%s539_s1 + $0xb8] sm:$0xff]   ;;  %v352_v35 = vld [vmem:[%s541_s2] ss:$0 sm:$0xff] }
   0xa   :  { %258 = vmatprep.mubr.bf16.mxu0 %v326_v24 }
   0xb   :  { %358 = vmatpush3.bf16.msra.mxu0 %v413_v8 }
   0xc   :  { %389 = vmatpush3.bf16.msra.mxu1 %v414_v9  ;;  %359 = vmatprep.subr.bf16.mxu0 %v415_v10 }
   0xd   :  { %390 = vmatprep.subr.bf16.mxu1 %v433_v1 }
   0xf   :  { %360 = vmatpush3.bf16.msra.mxu0 %v416_v11 }
  0x10   :  { %391 = vmatpush3.bf16.msra.mxu1 %v417_v12  ;;  %361 = vmatprep.subr.bf16.mxu0 %v418_v13 }
  0x11   :  { %392 = vmatprep.subr.bf16.mxu1 %v433_v1 }
  0x13   :  { %362 = vmatpush3.bf16.msra.mxu0 %v419_v14 }
  0x14   :  { %393 = vmatpush3.bf16.msra.mxu1 %v420_v15  ;;  %363 = vmatprep.subr.bf16.mxu0 %v421_v16 }
  0x15   :  { %394 = vmatprep.subr.bf16.mxu1 %v433_v1 }
  0x17   :  { %364 = vmatpush3.bf16.msra.mxu0 %v422_v17 }
  0x18   :  { %395 = vmatpush3.bf16.msra.mxu1 %v423_v18  ;;  %365 = vmatprep.subr.bf16.mxu0 %v424_v19 }
  0x19   :  { %396 = vmatprep.subr.bf16.mxu1 %v433_v1 }
  0x1b   :  { %366 = vmatpush3.bf16.msra.mxu0 %v425_v20 }
  0x1c   :  { %397 = vmatpush3.bf16.msra.mxu1 %v426_v21  ;;  %367 = vmatprep.subr.bf16.mxu0 %v427_v22 }
  0x1d   :  { %398 = vmatprep.subr.bf16.mxu1 %v433_v1 }
  0x1f   :  { %368 = vmatpush3.bf16.msra.mxu0 %v428_v25 }
  0x20   :  { %399 = vmatpush3.bf16.msra.mxu1 %v429_v26 }
  0x22   :  { %259 = vmatmul.mubr.bf16.vlgmr.msra.gmra.mrb[0].mxu0 %v325_v27 }
  0x23   :  { %401 = vmatmul.mubr.bf16.vlgmr.msra.gmra.mrb[0].mxu1 %v432_v28 }
  0xf5   :  { %v369_v29 = vpop.f32.mrb[0].mxu0 }
  0xf6   :  { %v300_v30 = vpop.f32.mrb[0].mxu1  ;;  %v370_v31 = vpop.f32.mrb[1].mxu0 }
  0xf7   :  { %v371_v32 = vadd.f32 %v370_v31, %v369_v29  ;;  %v402_v33 = vpop.f32.mrb[1].mxu1  ;;  %v372_v34 = vpop.f32.mrb[2].mxu0 }
  0xf8   :  { %v303_v36 = vpop.f32.mrb[2].mxu1  ;;  %v373_v37 = vpop.f32.mrb[3].mxu0 }
  0xf9   :  { %v301_v38 = vadd.f32 %v371_v32, %v300_v30  ;;  %v403_v39 = vpop.f32.mrb[3].mxu1 }
  0xfb   :  { %v319_v40 = vadd.f32 %v352_v35, %v301_v38 }
  0xfd   :  { %320 = vst [vmem:[%s542_s3] sm:$0xff] %v319_v40 }

// kernel: fcos_forward.23
= control target key start
LH: loop header
LB: loop body
LE: loop exit
PB: predicated region body
PF: predicated region fallthrough
CT: control target
= control target key end

     0   :  { %s306_s1 = inlined_call_operand.vmem [shape: bf16[128,128], index: 1, kind: input, shape index: {}]   ;;  %s307_s0 = inlined_call_operand.vmem [shape: bf16[32,128], index: 0, kind: input, shape index: {}]   ;;  %s308_s2 = inlined_call_operand.vmem [shape: f32[1,128], index: 2, kind: input, shape index: {}]   ;;  %s309_s3 = inlined_call_operand.vmem [shape: f32[32,128], index: 3, kind: output, shape index: {}]  }
   0x1   :  { %v231_v0 = vld [vmem:[%s306_s1] sm:$0xff]   ;;  %v232_v1 = vld [vmem:[%s306_s1 + $0x8] sm:$0xff]   ;;  %v233_v2 = vld [vmem:[%s306_s1 + $0x10] sm:$0xff]  }
   0x2   :  { %211 = vmatprep.subr.bf16.mxu0 %v231_v0  ;;  %v234_v3 = vld [vmem:[%s306_s1 + $0x18] sm:$0xff]   ;;  %v239_v4 = vld [vmem:[%s307_s0] sm:$0xff]   ;;  %v236_v6 = vld [vmem:[%s306_s1 + $0x28] sm:$0xff]  }
   0x3   :  { %212 = vmatpush3.bf16.msra.mxu0 %v231_v0  ;;  %227 = vmatprep.mubr.bf16.mxu0 %v239_v4  ;;  %v235_v5 = vld [vmem:[%s306_s1 + $0x20] sm:$0xff]   ;;  %v237_v7 = vld [vmem:[%s306_s1 + $0x30] sm:$0xff]   ;;  %v238_v8 = vld [vmem:[%s306_s1 + $0x38] sm:$0xff]  }
   0x4   :  { %213 = vmatprep.subr.bf16.mxu0 %v232_v1  ;;  %v240_v9 = vld [vmem:[%s307_s0 + $0x8] sm:$0xff]   ;;  %v200_v10 = vld [vmem:[%s308_s2] ss:$0 sm:$0xff] }
   0x7   :  { %214 = vmatpush3.bf16.msra.mxu0 %v232_v1 }
   0x8   :  { %215 = vmatprep.subr.bf16.mxu0 %v233_v2 }
   0xb   :  { %216 = vmatpush3.bf16.msra.mxu0 %v233_v2 }
   0xc   :  { %217 = vmatprep.subr.bf16.mxu0 %v234_v3 }
   0xf   :  { %218 = vmatpush3.bf16.msra.mxu0 %v234_v3 }
  0x10   :  { %219 = vmatprep.subr.bf16.mxu0 %v235_v5 }
  0x13   :  { %220 = vmatpush3.bf16.msra.mxu0 %v235_v5 }
  0x14   :  { %221 = vmatprep.subr.bf16.mxu0 %v236_v6 }
  0x17   :  { %222 = vmatpush3.bf16.msra.mxu0 %v236_v6 }
  0x18   :  { %223 = vmatprep.subr.bf16.mxu0 %v237_v7 }
  0x1b   :  { %224 = vmatpush3.bf16.msra.mxu0 %v237_v7 }
  0x1c   :  { %225 = vmatprep.subr.bf16.mxu0 %v238_v8 }
  0x1f   :  { %226 = vmatpush3.bf16.msra.mxu0 %v238_v8 }
  0x22   :  { %228 = vmatmul.mubr.bf16.vlgmr.msra.gmra.mrb[0].mxu0 %v240_v9 }
  0xf5   :  { %v229_v11 = vpop.f32.mrb[0].mxu0 }
  0xf6   :  { %v180_v12 = vadd.f32 %v229_v11, %v200_v10  ;;  %v141_v13 = vpop.f32.mrb[1].mxu0 }
  0xf7   :  { %v178_v14 = vadd.f32 %v200_v10, %v141_v13  ;;  %v230_v15 = vpop.f32.mrb[2].mxu0 }
  0xf8   :  { %184 = vst [vmem:[%s309_s3 + $0x10] sm:$0xff] %v180_v12  ;;  %v181_v16 = vadd.f32 %v230_v15, %v200_v10  ;;  %v144_v17 = vpop.f32.mrb[3].mxu0 }
  0xf9   :  { %182 = vst [vmem:[%s309_s3] sm:$0xff] %v178_v14  ;;  %v179_v18 = vadd.f32 %v200_v10, %v144_v17 }
  0xfa   :  { %185 = vst [vmem:[%s309_s3 + $0x18] sm:$0xff] %v181_v16 }
  0xfb   :  { %183 = vst [vmem:[%s309_s3 + $0x8] sm:$0xff] %v179_v18 }

// kernel: fcos_forward.24
= control target key start
LH: loop header
LB: loop body
LE: loop exit
PB: predicated region body
PF: predicated region fallthrough
CT: control target
= control target key end

     0   :  { %s637_s1 = inlined_call_operand.vmem [shape: bf16[384,128], index: 1, kind: input, shape index: {}]   ;;  %s638_s0 = inlined_call_operand.vmem [shape: bf16[32,384], index: 0, kind: input, shape index: {}]   ;;  %s639_s2 = inlined_call_operand.vmem [shape: f32[1,128], index: 2, kind: input, shape index: {}]   ;;  %s640_s3 = inlined_call_operand.vmem [shape: f32[32,128], index: 3, kind: output, shape index: {}]  }
   0x1   :  { %v480_v0 = vld [vmem:[%s637_s1 + $0x40] sm:$0xff]   ;;  %v483_v3 = vld [vmem:[%s637_s1 + $0x48] sm:$0xff]   ;;  %v486_v6 = vld [vmem:[%s637_s1 + $0x50] sm:$0xff]  }
   0x2   :  { %v481_v1 = vld [vmem:[%s637_s1] sm:$0xff]   ;;  %422 = vmatprep.subr.bf16.mxu0 %v480_v0  ;;  %v484_v4 = vld [vmem:[%s637_s1 + $0x8] sm:$0xff]   ;;  %v487_v7 = vld [vmem:[%s637_s1 + $0x10] sm:$0xff]  }
   0x3   :  { %v482_v2 = vld [vmem:[%s637_s1 + $0x80] sm:$0xff]   ;;  %423 = vmatpush3.bf16.msra.mxu0 %v481_v1  ;;  %v485_v5 = vld [vmem:[%s637_s1 + $0x88] sm:$0xff]   ;;  %v488_v8 = vld [vmem:[%s637_s1 + $0x90] sm:$0xff]  }
   0x4   :  { %460 = vmatprep.subr.bf16.mxu1 %v482_v2  ;;  %424 = vmatprep.subr.bf16.mxu0 %v483_v3  ;;  %v489_v9 = vld [vmem:[%s637_s1 + $0x58] sm:$0xff]   ;;  %v492_v12 = vld [vmem:[%s637_s1 + $0x60] sm:$0xff]   ;;  %v495_v15 = vld [vmem:[%s637_s1 + $0x68] sm:$0xff]  }
   0x5   :  { %461 = vmatpush3.bf16.msra.mxu1 %v482_v2  ;;  %v490_v10 = vld [vmem:[%s637_s1 + $0x18] sm:$0xff]   ;;  %v494_v13 = vld [vmem:[%s637_s1 + $0xa0] sm:$0xff]   ;;  %v497_v16 = vld [vmem:[%s637_s1 + $0xa8] sm:$0xff]  }
   0x6   :  { %462 = vmatprep.subr.bf16.mxu1 %v485_v5  ;;  %v491_v11 = vld [vmem:[%s637_s1 + $0x98] sm:$0xff]   ;;  %v493_v14 = vld [vmem:[%s637_s1 + $0x20] sm:$0xff]   ;;  %v496_v17 = vld [vmem:[%s637_s1 + $0x28] sm:$0xff]  }
   0x7   :  { %425 = vmatpush3.bf16.msra.mxu0 %v484_v4  ;;  %v498_v18 = vld [vmem:[%s637_s1 + $0x70] sm:$0xff]   ;;  %v501_v21 = vld [vmem:[%s637_s1 + $0x78] sm:$0xff]   ;;  %v504_v26 = vld [vmem:[%s638_s0] ss:$12 sps:$4 sm:$0xff]  }
   0x8   :  { %426 = vmatprep.subr.bf16.mxu0 %v486_v6  ;;  %v499_v19 = vld [vmem:[%s637_s1 + $0x30] sm:$0xff]   ;;  %v503_v22 = vld [vmem:[%s637_s1 + $0xb8] sm:$0xff]   ;;  %v508_v28 = vld [vmem:[%s638_s0 + $0x20] ss:$12 sps:$4 sm:$0xff]  }
   0x9   :  { %463 = vmatpush3.bf16.msra.mxu1 %v485_v5  ;;  %v500_v20 = vld [vmem:[%s637_s1 + $0xb0] sm:$0xff]   ;;  %v502_v25 = vld [vmem:[%s637_s1 + $0x38] sm:$0xff]   ;;  %v421_v37 = vld [vmem:[%s639_s2] ss:$0 sm:$0xff] }
   0xa   :  { %464 = vmatprep.subr.bf16.mxu1 %v488_v8  ;;  %v506_v23 = vld [vmem:[%s638_s0 + $0x4] ss:$12 sps:$4 sm:$0xff]   ;;  %v507_v24 = vld [vmem:[%s638_s0 + $0x8] ss:$12 sps:$4 sm:$0xff]  }
   0xb   :  { %427 = vmatpush3.bf16.msra.mxu0 %v487_v7  ;;  %291 = vmatprep.mubr.bf16.mxu0 %v506_v23  ;;  %v509_v27 = vld [vmem:[%s638_s0 + $0x1c] ss:$12 sps:$4 sm:$0xff]   ;;  %v511_v29 = vld [vmem:[%s638_s0 + $0x18] ss:$12 sps:$4 sm:$0xff]  }
   0xc   :  { %428 = vmatprep.subr.bf16.mxu0 %v489_v9  ;;  %476 = vmatprep.mubr.bf16.mxu1 %v507_v24 }
   0xd   :  { %465 = vmatpush3.bf16.msra.mxu1 %v488_v8 }
   0xe   :  { %466 = vmatprep.subr.bf16.mxu1 %v491_v11 }
   0xf   :  { %429 = vmatpush3.bf16.msra.mxu0 %v490_v10 }
  0x10   :  { %430 = vmatprep.subr.bf16.mxu0 %v492_v12 }
  0x11   :  { %467 = vmatpush3.bf16.msra.mxu1 %v491_v11 }
  0x12   :  { %468 = vmatprep.subr.bf16.mxu1 %v494_v13 }
  0x13   :  { %431 = vmatpush3.bf16.msra.mxu0 %v493_v14 }
  0x14   :  { %432 = vmatprep.subr.bf16.mxu0 %v495_v15 }
  0x15   :  { %469 = vmatpush3.bf16.msra.mxu1 %v494_v13 }
  0x16   :  { %470 = vmatprep.subr.bf16.mxu1 %v497_v16 }
  0x17   :  { %433 = vmatpush3.bf16.msra.mxu0 %v496_v17 }
  0x18   :  { %434 = vmatprep.subr.bf16.mxu0 %v498_v18 }
  0x19   :  { %471 = vmatpush3.bf16.msra.mxu1 %v497_v16 }
  0x1a   :  { %472 = vmatprep.subr.bf16.mxu1 %v500_v20 }
  0x1b   :  { %435 = vmatpush3.bf16.msra.mxu0 %v499_v19 }
  0x1c   :  { %436 = vmatprep.subr.bf16.mxu0 %v501_v21 }
  0x1d   :  { %473 = vmatpush3.bf16.msra.mxu1 %v500_v20 }
  0x1e   :  { %474 = vmatprep.subr.bf16.mxu1 %v503_v22 }
  0x1f   :  { %437 = vmatpush3.bf16.msra.mxu0 %v502_v25 }
  0x21   :  { %475 = vmatpush3.bf16.msra.mxu1 %v503_v22 }
  0x22   :  { %292 = vmatmul.mubr.bf16.vlgmr.msra.gmra.mrb[0].mxu0 %v504_v26 }
  0x23   :  { %299 = vmatprep.mubr.bf16.mxu0 %v509_v27 }
  0x24   :  { %477 = vmatmul.mubr.bf16.vlgmr.msra.gmra.mrb[0].mxu1 %v508_v28 }
  0x2a   :  { %300 = vmatmul.mubr.bf16.gmra.mrb[4].mxu0 %v511_v29 }
  0xf5   :  { %v438_v30 = vpop.f32.mrb[0].mxu0 }
  0xf6   :  { %v439_v31 = vpop.f32.mrb[1].mxu0 }
  0xf7   :  { %v440_v32 = vadd.f32 %v439_v31, %v438_v30  ;;  %v441_v33 = vpop.f32.mrb[2].mxu0  ;;  %v478_v34 = vpop.f32.mrb[0].mxu1 }
  0xf8   :  { %v442_v35 = vpop.f32.mrb[3].mxu0  ;;  %v342_v36 = vpop.f32.mrb[1].mxu1 }
  0xf9   :  { %v443_v38 = vadd.f32 %v442_v35, %v441_v33  ;;  %v343_v39 = vadd.f32 %v440_v32, %v342_v36  ;;  %v479_v40 = vpop.f32.mrb[2].mxu1 }
  0xfa   :  { %v345_v41 = vpop.f32.mrb[3].mxu1 }
  0xfb   :  { %v379_v42 = vadd.f32 %v421_v37, %v343_v39  ;;  %v346_v43 = vadd.f32 %v443_v38, %v345_v41 }
  0xfd   :  { %383 = vst [vmem:[%s640_s3] sm:$0xff] %v379_v42  ;;  %v380_v44 = vadd.f32 %v421_v37, %v346_v43  ;;  %v444_v45 = vpop.f32.mrb[4].mxu0 }
  0xfe   :  { %v445_v46 = vpop.f32.mrb[5].mxu0 }
  0xff   :  { %384 = vst [vmem:[%s640_s3 + $0x8] sm:$0xff] %v380_v44  ;;  %v446_v47 = vadd.f32 %v445_v46, %v444_v45  ;;  %v447_v48 = vpop.f32.mrb[6].mxu0 }
 0x100   :  { %v448_v49 = vpop.f32.mrb[7].mxu0 }
 0x101   :  { %v351_v50 = vadd.f32 %v478_v34, %v446_v47  ;;  %v449_v51 = vadd.f32 %v448_v49, %v447_v48 }
 0x103   :  { %v381_v52 = vadd.f32 %v421_v37, %v351_v50  ;;  %v354_v53 = vadd.f32 %v479_v40, %v449_v51 }
 0x105   :  { %385 = vst [vmem:[%s640_s3 + $0x10] sm:$0xff] %v381_v52  ;;  %v382_v54 = vadd.f32 %v421_v37, %v354_v53 }
 0x107   :  { %386 = vst [vmem:[%s640_s3 + $0x18] sm:$0xff] %v382_v54 }

// kernel: fcos_forward.25
= control target key start
LH: loop header
LB: loop body
LE: loop exit
PB: predicated region body
PF: predicated region fallthrough
CT: control target
= control target key end

     0   :  { %s586_s1 = inlined_call_operand.vmem [shape: bf16[128,128], index: 1, kind: input, shape index: {}]   ;;  %s587_s0 = inlined_call_operand.vmem [shape: bf16[128,128], index: 0, kind: input, shape index: {}]   ;;  %s588_s2 = inlined_call_operand.vmem [shape: f32[1,128], index: 2, kind: input, shape index: {}]   ;;  %s589_s3 = inlined_call_operand.vmem [shape: f32[128,128], index: 3, kind: output, shape index: {}]  }
   0x1   :  { %v451_v0 = vld [vmem:[%s586_s1] sm:$0xff]   ;;  %v452_v1 = vld [vmem:[%s586_s1 + $0x8] sm:$0xff]   ;;  %v453_v2 = vld [vmem:[%s586_s1 + $0x10] sm:$0xff]  }
   0x2   :  { %403 = vmatprep.subr.bf16.mxu0 %v451_v0  ;;  %435 = vmatprep.subr.bf16.mxu1 %v451_v0  ;;  %v454_v3 = vld [vmem:[%s586_s1 + $0x18] sm:$0xff]   ;;  %v459_v4 = vld [vmem:[%s587_s0] sm:$0xff]   ;;  %v456_v7 = vld [vmem:[%s586_s1 + $0x28] sm:$0xff]  }
   0x3   :  { %404 = vmatpush3.bf16.msra.mxu0 %v451_v0  ;;  %443 = vmatpush3.bf16.msra.mxu1 %v451_v0  ;;  %v460_v5 = vld [vmem:[%s587_s0 + $0x20] sm:$0xff]   ;;  %v457_v8 = vld [vmem:[%s586_s1 + $0x30] sm:$0xff]   ;;  %v458_v9 = vld [vmem:[%s586_s1 + $0x38] sm:$0xff]  }
   0x4   :  { %405 = vmatprep.subr.bf16.mxu0 %v452_v1  ;;  %436 = vmatprep.subr.bf16.mxu1 %v452_v1  ;;  %v455_v6 = vld [vmem:[%s586_s1 + $0x20] sm:$0xff]   ;;  %v461_v10 = vld [vmem:[%s587_s0 + $0x8] sm:$0xff]   ;;  %v463_v12 = vld [vmem:[%s587_s0 + $0x10] sm:$0xff]  }
   0x5   :  { %419 = vmatprep.mubr.bf16.mxu0 %v459_v4  ;;  %427 = vmatprep.mubr.bf16.mxu1 %v460_v5  ;;  %v462_v11 = vld [vmem:[%s587_s0 + $0x28] sm:$0xff]   ;;  %v464_v13 = vld [vmem:[%s587_s0 + $0x30] sm:$0xff]   ;;  %v465_v14 = vld [vmem:[%s587_s0 + $0x18] sm:$0xff]  }
   0x6   :  { %v466_v15 = vld [vmem:[%s587_s0 + $0x38] sm:$0xff]   ;;  %v386_v16 = vld [vmem:[%s588_s2] ss:$0 sm:$0xff] }
   0x7   :  { %406 = vmatpush3.bf16.msra.mxu0 %v452_v1  ;;  %444 = vmatpush3.bf16.msra.mxu1 %v452_v1 }
   0x8   :  { %407 = vmatprep.subr.bf16.mxu0 %v453_v2  ;;  %437 = vmatprep.subr.bf16.mxu1 %v453_v2 }
   0xb   :  { %408 = vmatpush3.bf16.msra.mxu0 %v453_v2  ;;  %445 = vmatpush3.bf16.msra.mxu1 %v453_v2 }
   0xc   :  { %409 = vmatprep.subr.bf16.mxu0 %v454_v3  ;;  %438 = vmatprep.subr.bf16.mxu1 %v454_v3 }
   0xf   :  { %410 = vmatpush3.bf16.msra.mxu0 %v454_v3  ;;  %446 = vmatpush3.bf16.msra.mxu1 %v454_v3 }
  0x10   :  { %411 = vmatprep.subr.bf16.mxu0 %v455_v6  ;;  %439 = vmatprep.subr.bf16.mxu1 %v455_v6 }
  0x13   :  { %412 = vmatpush3.bf16.msra.mxu0 %v455_v6  ;;  %447 = vmatpush3.bf16.msra.mxu1 %v455_v6 }
  0x14   :  { %413 = vmatprep.subr.bf16.mxu0 %v456_v7  ;;  %440 = vmatprep.subr.bf16.mxu1 %v456_v7 }
  0x17   :  { %414 = vmatpush3.bf16.msra.mxu0 %v456_v7  ;;  %448 = vmatpush3.bf16.msra.mxu1 %v456_v7 }
  0x18   :  { %415 = vmatprep.subr.bf16.mxu0 %v457_v8  ;;  %441 = vmatprep.subr.bf16.mxu1 %v457_v8 }
  0x1b   :  { %416 = vmatpush3.bf16.msra.mxu0 %v457_v8  ;;  %449 = vmatpush3.bf16.msra.mxu1 %v457_v8 }
  0x1c   :  { %417 = vmatprep.subr.bf16.mxu0 %v458_v9  ;;  %442 = vmatprep.subr.bf16.mxu1 %v458_v9 }
  0x1f   :  { %418 = vmatpush3.bf16.msra.mxu0 %v458_v9  ;;  %450 = vmatpush3.bf16.msra.mxu1 %v458_v9 }
  0x22   :  { %420 = vmatmul.mubr.bf16.vlgmr.msra.gmra.mrb[0].mxu0 %v461_v10  ;;  %428 = vmatmul.mubr.bf16.vlgmr.msra.gmra.mrb[0].mxu1 %v462_v11 }
  0x23   :  { %423 = vmatprep.mubr.bf16.mxu0 %v463_v12  ;;  %431 = vmatprep.mubr.bf16.mxu1 %v464_v13 }
  0x2a   :  { %424 = vmatmul.mubr.bf16.gmra.mrb[4].mxu0 %v465_v14  ;;  %432 = vmatmul.mubr.bf16.gmra.mrb[4].mxu1 %v466_v15 }
  0xf5   :  { %v421_v17 = vpop.f32.mrb[0].mxu0  ;;  %v429_v18 = vpop.f32.mrb[0].mxu1 }
  0xf6   :  { %v336_v19 = vadd.f32 %v421_v17, %v386_v16  ;;  %v344_v20 = vadd.f32 %v429_v18, %v386_v16  ;;  %v213_v21 = vpop.f32.mrb[1].mxu0  ;;  %v245_v22 = vpop.f32.mrb[1].mxu1 }
  0xf7   :  { %v334_v23 = vadd.f32 %v386_v16, %v213_v21  ;;  %v342_v24 = vadd.f32 %v386_v16, %v245_v22  ;;  %v422_v25 = vpop.f32.mrb[2].mxu0  ;;  %v430_v26 = vpop.f32.mrb[2].mxu1 }
  0xf8   :  { %352 = vst [vmem:[%s589_s3 + $0x10] sm:$0xff] %v336_v19  ;;  %360 = vst [vmem:[%s589_s3 + $0x50] sm:$0xff] %v344_v20  ;;  %v337_v27 = vadd.f32 %v422_v25, %v386_v16  ;;  %v345_v28 = vadd.f32 %v430_v26, %v386_v16  ;;  %v216_v29 = vpop.f32.mrb[3].mxu0  ;;  %v248_v30 = vpop.f32.mrb[3].mxu1 }
  0xf9   :  { %350 = vst [vmem:[%s589_s3] sm:$0xff] %v334_v23  ;;  %358 = vst [vmem:[%s589_s3 + $0x40] sm:$0xff] %v342_v24  ;;  %v335_v31 = vadd.f32 %v386_v16, %v216_v29  ;;  %v343_v32 = vadd.f32 %v386_v16, %v248_v30 }
  0xfa   :  { %353 = vst [vmem:[%s589_s3 + $0x18] sm:$0xff] %v337_v27  ;;  %361 = vst [vmem:[%s589_s3 + $0x58] sm:$0xff] %v345_v28 }
  0xfb   :  { %351 = vst [vmem:[%s589_s3 + $0x8] sm:$0xff] %v335_v31  ;;  %359 = vst [vmem:[%s589_s3 + $0x48] sm:$0xff] %v343_v32 }
  0xfd   :  { %v425_v33 = vpop.f32.mrb[4].mxu0  ;;  %v433_v34 = vpop.f32.mrb[4].mxu1 }
  0xfe   :  { %v340_v35 = vadd.f32 %v425_v33, %v386_v16  ;;  %v348_v36 = vadd.f32 %v433_v34, %v386_v16  ;;  %v229_v37 = vpop.f32.mrb[5].mxu0  ;;  %v261_v38 = vpop.f32.mrb[5].mxu1 }
  0xff   :  { %v338_v39 = vadd.f32 %v386_v16, %v229_v37  ;;  %v346_v40 = vadd.f32 %v386_v16, %v261_v38  ;;  %v426_v41 = vpop.f32.mrb[6].mxu0  ;;  %v434_v42 = vpop.f32.mrb[6].mxu1 }
 0x100   :  { %356 = vst [vmem:[%s589_s3 + $0x30] sm:$0xff] %v340_v35  ;;  %364 = vst [vmem:[%s589_s3 + $0x70] sm:$0xff] %v348_v36  ;;  %v341_v43 = vadd.f32 %v426_v41, %v386_v16  ;;  %v349_v44 = vadd.f32 %v434_v42, %v386_v16  ;;  %v232_v45 = vpop.f32.mrb[7].mxu0  ;;  %v264_v46 = vpop.f32.mrb[7].mxu1 }
 0x101   :  { %354 = vst [vmem:[%s589_s3 + $0x20] sm:$0xff] %v338_v39  ;;  %362 = vst [vmem:[%s589_s3 + $0x60] sm:$0xff] %v346_v40  ;;  %v339_v47 = vadd.f32 %v386_v16, %v232_v45  ;;  %v347_v48 = vadd.f32 %v386_v16, %v264_v46 }
 0x102   :  { %357 = vst [vmem:[%s589_s3 + $0x38] sm:$0xff] %v341_v43  ;;  %365 = vst [vmem:[%s589_s3 + $0x78] sm:$0xff] %v349_v44 }
 0x103   :  { %355 = vst [vmem:[%s589_s3 + $0x28] sm:$0xff] %v339_v47  ;;  %363 = vst [vmem:[%s589_s3 + $0x68] sm:$0xff] %v347_v48 }

// kernel: fcos_forward.26
= control target key start
LH: loop header
LB: loop body
LE: loop exit
PB: predicated region body
PF: predicated region fallthrough
CT: control target
= control target key end

     0   :  { %s1141_s1 = inlined_call_operand.vmem [shape: bf16[384,128], index: 1, kind: input, shape index: {}]   ;;  %s1142_s0 = inlined_call_operand.vmem [shape: bf16[128,384], index: 0, kind: input, shape index: {}]   ;;  %s1143_s2 = inlined_call_operand.vmem [shape: f32[1,128], index: 2, kind: input, shape index: {}]   ;;  %s1144_s3 = inlined_call_operand.vmem [shape: f32[128,128], index: 3, kind: output, shape index: {}]  }
   0x1   :  { %v852_v0 = vld [vmem:[%s1141_s1 + $0x40] sm:$0xff]   ;;  %v855_v3 = vld [vmem:[%s1141_s1 + $0x48] sm:$0xff]   ;;  %v858_v6 = vld [vmem:[%s1141_s1 + $0x50] sm:$0xff]  }
   0x2   :  { %v853_v1 = vld [vmem:[%s1141_s1] sm:$0xff]   ;;  %740 = vmatprep.subr.bf16.mxu0 %v852_v0  ;;  %v856_v4 = vld [vmem:[%s1141_s1 + $0x8] sm:$0xff]   ;;  %v859_v7 = vld [vmem:[%s1141_s1 + $0x10] sm:$0xff]  }
   0x3   :  { %v854_v2 = vld [vmem:[%s1141_s1 + $0x80] sm:$0xff]   ;;  %741 = vmatpush3.bf16.msra.mxu0 %v853_v1  ;;  %v857_v5 = vld [vmem:[%s1141_s1 + $0x88] sm:$0xff]   ;;  %v860_v8 = vld [vmem:[%s1141_s1 + $0x90] sm:$0xff]  }
   0x4   :  { %820 = vmatprep.subr.bf16.mxu1 %v854_v2  ;;  %742 = vmatprep.subr.bf16.mxu0 %v855_v3  ;;  %v861_v9 = vld [vmem:[%s1141_s1 + $0x58] sm:$0xff]   ;;  %v864_v12 = vld [vmem:[%s1141_s1 + $0x60] sm:$0xff]   ;;  %v867_v15 = vld [vmem:[%s1141_s1 + $0x68] sm:$0xff]  }
   0x5   :  { %821 = vmatpush3.bf16.msra.mxu1 %v854_v2  ;;  %v862_v10 = vld [vmem:[%s1141_s1 + $0x18] sm:$0xff]   ;;  %v866_v13 = vld [vmem:[%s1141_s1 + $0xa0] sm:$0xff]   ;;  %v869_v16 = vld [vmem:[%s1141_s1 + $0xa8] sm:$0xff]  }
   0x6   :  { %822 = vmatprep.subr.bf16.mxu1 %v857_v5  ;;  %v863_v11 = vld [vmem:[%s1141_s1 + $0x98] sm:$0xff]   ;;  %v865_v14 = vld [vmem:[%s1141_s1 + $0x20] sm:$0xff]   ;;  %v868_v17 = vld [vmem:[%s1141_s1 + $0x28] sm:$0xff]  }
   0x7   :  { %743 = vmatpush3.bf16.msra.mxu0 %v856_v4  ;;  %v870_v18 = vld [vmem:[%s1141_s1 + $0x70] sm:$0xff]   ;;  %v873_v21 = vld [vmem:[%s1141_s1 + $0x78] sm:$0xff]   ;;  %v876_v26 = vld [vmem:[%s1142_s0] ss:$12 sps:$4 sm:$0xff]  }
   0x8   :  { %744 = vmatprep.subr.bf16.mxu0 %v858_v6  ;;  %v871_v19 = vld [vmem:[%s1141_s1 + $0x30] sm:$0xff]   ;;  %v875_v22 = vld [vmem:[%s1141_s1 + $0xb8] sm:$0xff]   ;;  %v880_v28 = vld [vmem:[%s1142_s0 + $0x20] ss:$12 sps:$4 sm:$0xff]  }
   0x9   :  { %823 = vmatpush3.bf16.msra.mxu1 %v857_v5  ;;  %v872_v20 = vld [vmem:[%s1141_s1 + $0xb0] sm:$0xff]   ;;  %v874_v25 = vld [vmem:[%s1141_s1 + $0x38] sm:$0xff]   ;;  %v896_v36 = vld [vmem:[%s1142_s0 + $0x80] ss:$12 sps:$4 sm:$0xff]  }
   0xa   :  { %824 = vmatprep.subr.bf16.mxu1 %v860_v8  ;;  %v878_v23 = vld [vmem:[%s1142_s0 + $0x4] ss:$12 sps:$4 sm:$0xff]   ;;  %v879_v24 = vld [vmem:[%s1142_s0 + $0x8] ss:$12 sps:$4 sm:$0xff]   ;;  %v889_v35 = vld [vmem:[%s1142_s0 + $0x4c] ss:$12 sps:$4 sm:$0xff]  }
   0xb   :  { %745 = vmatpush3.bf16.msra.mxu0 %v859_v7  ;;  %435 = vmatprep.mubr.bf16.mxu0 %v878_v23  ;;  %v881_v27 = vld [vmem:[%s1142_s0 + $0x1c] ss:$12 sps:$4 sm:$0xff]   ;;  %v887_v29 = vld [vmem:[%s1142_s0 + $0x38] ss:$12 sps:$4 sm:$0xff]   ;;  %v884_v31 = vld [vmem:[%s1142_s0 + $0x34] ss:$12 sps:$4 sm:$0xff]  }
   0xc   :  { %746 = vmatprep.subr.bf16.mxu0 %v861_v9  ;;  %836 = vmatprep.mubr.bf16.mxu1 %v879_v24  ;;  %v883_v30 = vld [vmem:[%s1142_s0 + $0x18] ss:$12 sps:$4 sm:$0xff]   ;;  %v888_v32 = vld [vmem:[%s1142_s0 + $0x50] ss:$12 sps:$4 sm:$0xff]   ;;  %v895_v33 = vld [vmem:[%s1142_s0 + $0x68] ss:$12 sps:$4 sm:$0xff]  }
   0xd   :  { %825 = vmatpush3.bf16.msra.mxu1 %v860_v8  ;;  %v886_v34 = vld [vmem:[%s1142_s0 + $0x30] ss:$12 sps:$4 sm:$0xff]   ;;  %v903_v37 = vld [vmem:[%s1142_s0 + $0x98] ss:$12 sps:$4 sm:$0xff]   ;;  %v891_v38 = vld [vmem:[%s1142_s0 + $0x48] ss:$12 sps:$4 sm:$0xff]  }
   0xe   :  { %826 = vmatprep.subr.bf16.mxu1 %v863_v11  ;;  %v892_v39 = vld [vmem:[%s1142_s0 + $0x64] ss:$12 sps:$4 sm:$0xff]   ;;  %v894_v41 = vld [vmem:[%s1142_s0 + $0x60] ss:$12 sps:$4 sm:$0xff]   ;;  %v897_v42 = vld [vmem:[%s1142_s0 + $0x7c] ss:$12 sps:$4 sm:$0xff]  }
   0xf   :  { %747 = vmatpush3.bf16.msra.mxu0 %v862_v10  ;;  %v904_v40 = vld [vmem:[%s1142_s0 + $0xb0] ss:$12 sps:$4 sm:$0xff]   ;;  %v899_v43 = vld [vmem:[%s1142_s0 + $0x78] ss:$12 sps:$4 sm:$0xff]   ;;  %v900_v44 = vld [vmem:[%s1142_s0 + $0x94] ss:$12 sps:$4 sm:$0xff]  }
  0x10   :  { %748 = vmatprep.subr.bf16.mxu0 %v864_v12  ;;  %v902_v45 = vld [vmem:[%s1142_s0 + $0x90] ss:$12 sps:$4 sm:$0xff]   ;;  %v905_v46 = vld [vmem:[%s1142_s0 + $0xac] ss:$12 sps:$4 sm:$0xff]   ;;  %v907_v47 = vld [vmem:[%s1142_s0 + $0xa8] ss:$12 sps:$4 sm:$0xff]  }
  0x11   :  { %827 = vmatpush3.bf16.msra.mxu1 %v863_v11  ;;  %v1075_v55 = vld [vmem:[%s1143_s2] ss:$0 sm:$0xff] }
  0x12   :  { %828 = vmatprep.subr.bf16.mxu1 %v866_v13 }
  0x13   :  { %749 = vmatpush3.bf16.msra.mxu0 %v865_v14 }
  0x14   :  { %750 = vmatprep.subr.bf16.mxu0 %v867_v15 }
  0x15   :  { %829 = vmatpush3.bf16.msra.mxu1 %v866_v13 }
  0x16   :  { %830 = vmatprep.subr.bf16.mxu1 %v869_v16 }
  0x17   :  { %751 = vmatpush3.bf16.msra.mxu0 %v868_v17 }
  0x18   :  { %752 = vmatprep.subr.bf16.mxu0 %v870_v18 }
  0x19   :  { %831 = vmatpush3.bf16.msra.mxu1 %v869_v16 }
  0x1a   :  { %832 = vmatprep.subr.bf16.mxu1 %v872_v20 }
  0x1b   :  { %753 = vmatpush3.bf16.msra.mxu0 %v871_v19 }
  0x1c   :  { %754 = vmatprep.subr.bf16.mxu0 %v873_v21 }
  0x1d   :  { %833 = vmatpush3.bf16.msra.mxu1 %v872_v20 }
  0x1e   :  { %834 = vmatprep.subr.bf16.mxu1 %v875_v22 }
  0x1f   :  { %755 = vmatpush3.bf16.msra.mxu0 %v874_v25 }
  0x21   :  { %835 = vmatpush3.bf16.msra.mxu1 %v875_v22 }
  0x22   :  { %436 = vmatmul.mubr.bf16.vlgmr.msra.gmra.mrb[0].mxu0 %v876_v26 }
  0x23   :  { %443 = vmatprep.mubr.bf16.mxu0 %v881_v27 }
  0x24   :  { %837 = vmatmul.mubr.bf16.vlgmr.msra.gmra.mrb[0].mxu1 %v880_v28 }
  0x25   :  { %840 = vmatprep.mubr.bf16.mxu1 %v887_v29 }
  0x2a   :  { %444 = vmatmul.mubr.bf16.gmra.mrb[4].mxu0 %v883_v30 }
  0x2b   :  { %451 = vmatprep.mubr.bf16.mxu0 %v884_v31 }
  0x2c   :  { %841 = vmatmul.mubr.bf16.gmra.mrb[4].mxu1 %v888_v32 }
  0x2d   :  { %844 = vmatprep.mubr.bf16.mxu1 %v895_v33 }
  0x32   :  { %452 = vmatmul.mubr.bf16.gmra.mrb[8].mxu0 %v886_v34 }
  0x33   :  { %459 = vmatprep.mubr.bf16.mxu0 %v889_v35 }
  0x34   :  { %845 = vmatmul.mubr.bf16.gmra.mrb[8].mxu1 %v896_v36 }
  0x35   :  { %848 = vmatprep.mubr.bf16.mxu1 %v903_v37 }
  0x3a   :  { %460 = vmatmul.mubr.bf16.gmra.mrb[12].mxu0 %v891_v38 }
  0x3b   :  { %467 = vmatprep.mubr.bf16.mxu0 %v892_v39 }
  0x3c   :  { %849 = vmatmul.mubr.bf16.gmra.mrb[12].mxu1 %v904_v40 }
  0x42   :  { %468 = vmatmul.mubr.bf16.gmra.mrb[16].mxu0 %v894_v41 }
  0x43   :  { %475 = vmatprep.mubr.bf16.mxu0 %v897_v42 }
  0x4a   :  { %476 = vmatmul.mubr.bf16.gmra.mrb[20].mxu0 %v899_v43 }
  0x4b   :  { %483 = vmatprep.mubr.bf16.mxu0 %v900_v44 }
  0x52   :  { %484 = vmatmul.mubr.bf16.gmra.mrb[24].mxu0 %v902_v45 }
  0x53   :  { %491 = vmatprep.mubr.bf16.mxu0 %v905_v46 }
  0x5a   :  { %492 = vmatmul.mubr.bf16.gmra.mrb[28].mxu0 %v907_v47 }
  0xf5   :  { %v756_v48 = vpop.f32.mrb[0].mxu0 }
  0xf6   :  { %v757_v49 = vpop.f32.mrb[1].mxu0 }
  0xf7   :  { %v758_v50 = vadd.f32 %v757_v49, %v756_v48  ;;  %v759_v51 = vpop.f32.mrb[2].mxu0  ;;  %v838_v52 = vpop.f32.mrb[0].mxu1 }
  0xf8   :  { %v760_v53 = vpop.f32.mrb[3].mxu0  ;;  %v534_v54 = vpop.f32.mrb[1].mxu1 }
  0xf9   :  { %v761_v56 = vadd.f32 %v760_v53, %v759_v51  ;;  %v535_v57 = vadd.f32 %v758_v50, %v534_v54  ;;  %v839_v58 = vpop.f32.mrb[2].mxu1 }
  0xfa   :  { %v537_v59 = vpop.f32.mrb[3].mxu1 }
  0xfb   :  { %v655_v60 = vadd.f32 %v1075_v55, %v535_v57  ;;  %v538_v61 = vadd.f32 %v761_v56, %v537_v59 }
  0xfd   :  { %671 = vst [vmem:[%s1144_s3] sm:$0xff] %v655_v60  ;;  %v656_v62 = vadd.f32 %v1075_v55, %v538_v61  ;;  %v762_v63 = vpop.f32.mrb[4].mxu0 }
  0xfe   :  { %v763_v0 = vpop.f32.mrb[5].mxu0 }
  0xff   :  { %672 = vst [vmem:[%s1144_s3 + $0x8] sm:$0xff] %v656_v62  ;;  %v764_v1 = vadd.f32 %v763_v0, %v762_v63  ;;  %v765_v2 = vpop.f32.mrb[6].mxu0  ;;  %v842_v3 = vpop.f32.mrb[4].mxu1 }
 0x100   :  { %v766_v4 = vpop.f32.mrb[7].mxu0  ;;  %v550_v5 = vpop.f32.mrb[5].mxu1 }
 0x101   :  { %v543_v6 = vadd.f32 %v838_v52, %v764_v1  ;;  %v767_v7 = vadd.f32 %v766_v4, %v765_v2  ;;  %v843_v8 = vpop.f32.mrb[6].mxu1 }
 0x102   :  { %v553_v9 = vpop.f32.mrb[7].mxu1 }
 0x103   :  { %v657_v10 = vadd.f32 %v1075_v55, %v543_v6  ;;  %v546_v11 = vadd.f32 %v839_v58, %v767_v7 }
 0x105   :  { %673 = vst [vmem:[%s1144_s3 + $0x10] sm:$0xff] %v657_v10  ;;  %v658_v12 = vadd.f32 %v1075_v55, %v546_v11  ;;  %v768_v13 = vpop.f32.mrb[8].mxu0 }
 0x106   :  { %v769_v14 = vpop.f32.mrb[9].mxu0 }
 0x107   :  { %674 = vst [vmem:[%s1144_s3 + $0x18] sm:$0xff] %v658_v12  ;;  %v770_v15 = vadd.f32 %v769_v14, %v768_v13  ;;  %v771_v16 = vpop.f32.mrb[10].mxu0  ;;  %v846_v17 = vpop.f32.mrb[8].mxu1 }
 0x108   :  { %v772_v18 = vpop.f32.mrb[11].mxu0  ;;  %v566_v19 = vpop.f32.mrb[9].mxu1 }
 0x109   :  { %v773_v20 = vadd.f32 %v772_v18, %v771_v16  ;;  %v551_v21 = vadd.f32 %v770_v15, %v550_v5  ;;  %v847_v22 = vpop.f32.mrb[10].mxu1 }
 0x10a   :  { %v569_v23 = vpop.f32.mrb[11].mxu1 }
 0x10b   :  { %v659_v24 = vadd.f32 %v1075_v55, %v551_v21  ;;  %v554_v25 = vadd.f32 %v773_v20, %v553_v9 }
 0x10d   :  { %675 = vst [vmem:[%s1144_s3 + $0x20] sm:$0xff] %v659_v24  ;;  %v660_v26 = vadd.f32 %v1075_v55, %v554_v25  ;;  %v774_v27 = vpop.f32.mrb[12].mxu0 }
 0x10e   :  { %v775_v28 = vpop.f32.mrb[13].mxu0 }
 0x10f   :  { %676 = vst [vmem:[%s1144_s3 + $0x28] sm:$0xff] %v660_v26  ;;  %v776_v29 = vadd.f32 %v775_v28, %v774_v27  ;;  %v777_v30 = vpop.f32.mrb[14].mxu0  ;;  %v850_v31 = vpop.f32.mrb[12].mxu1 }
 0x110   :  { %v778_v32 = vpop.f32.mrb[15].mxu0  ;;  %v582_v33 = vpop.f32.mrb[13].mxu1 }
 0x111   :  { %v559_v34 = vadd.f32 %v842_v3, %v776_v29  ;;  %v779_v35 = vadd.f32 %v778_v32, %v777_v30  ;;  %v851_v36 = vpop.f32.mrb[14].mxu1 }
 0x112   :  { %v585_v37 = vpop.f32.mrb[15].mxu1 }
 0x113   :  { %v661_v38 = vadd.f32 %v1075_v55, %v559_v34  ;;  %v562_v39 = vadd.f32 %v843_v8, %v779_v35 }
 0x115   :  { %677 = vst [vmem:[%s1144_s3 + $0x30] sm:$0xff] %v661_v38  ;;  %v662_v40 = vadd.f32 %v1075_v55, %v562_v39  ;;  %v780_v41 = vpop.f32.mrb[16].mxu0 }
 0x116   :  { %v781_v42 = vpop.f32.mrb[17].mxu0 }
 0x117   :  { %678 = vst [vmem:[%s1144_s3 + $0x38] sm:$0xff] %v662_v40  ;;  %v782_v43 = vadd.f32 %v781_v42, %v780_v41  ;;  %v783_v44 = vpop.f32.mrb[18].mxu0 }
 0x118   :  { %v784_v45 = vpop.f32.mrb[19].mxu0 }
 0x119   :  { %v785_v46 = vadd.f32 %v784_v45, %v783_v44  ;;  %v567_v47 = vadd.f32 %v782_v43, %v566_v19 }
 0x11b   :  { %v663_v48 = vadd.f32 %v1075_v55, %v567_v47  ;;  %v570_v49 = vadd.f32 %v785_v46, %v569_v23 }
 0x11d   :  { %679 = vst [vmem:[%s1144_s3 + $0x40] sm:$0xff] %v663_v48  ;;  %v664_v50 = vadd.f32 %v1075_v55, %v570_v49  ;;  %v786_v51 = vpop.f32.mrb[20].mxu0 }
 0x11e   :  { %v787_v52 = vpop.f32.mrb[21].mxu0 }
 0x11f   :  { %680 = vst [vmem:[%s1144_s3 + $0x48] sm:$0xff] %v664_v50  ;;  %v788_v53 = vadd.f32 %v787_v52, %v786_v51  ;;  %v789_v54 = vpop.f32.mrb[22].mxu0 }
 0x120   :  { %v790_v56 = vpop.f32.mrb[23].mxu0 }
 0x121   :  { %v575_v57 = vadd.f32 %v846_v17, %v788_v53  ;;  %v791_v58 = vadd.f32 %v790_v56, %v789_v54 }
 0x123   :  { %v665_v59 = vadd.f32 %v1075_v55, %v575_v57  ;;  %v578_v60 = vadd.f32 %v847_v22, %v791_v58 }
 0x125   :  { %681 = vst [vmem:[%s1144_s3 + $0x50] sm:$0xff] %v665_v59  ;;  %v666_v61 = vadd.f32 %v1075_v55, %v578_v60  ;;  %v792_v62 = vpop.f32.mrb[24].mxu0 }
 0x126   :  { %v793_v63 = vpop.f32.mrb[25].mxu0 }
 0x127   :  { %682 = vst [vmem:[%s1144_s3 + $0x58] sm:$0xff] %v666_v61  ;;  %v794_v0 = vadd.f32 %v793_v63, %v792_v62  ;;  %v795_v1 = vpop.f32.mrb[26].mxu0 }
 0x128   :  { %v796_v2 = vpop.f32.mrb[27].mxu0 }
 0x129   :  { %v797_v3 = vadd.f32 %v796_v2, %v795_v1  ;;  %v583_v4 = vadd.f32 %v794_v0, %v582_v33 }
 0x12b   :  { %v667_v5 = vadd.f32 %v1075_v55, %v583_v4  ;;  %v586_v6 = vadd.f32 %v797_v3, %v585_v37 }
 0x12d   :  { %683 = vst [vmem:[%s1144_s3 + $0x60] sm:$0xff] %v667_v5  ;;  %v668_v7 = vadd.f32 %v1075_v55, %v586_v6  ;;  %v798_v8 = vpop.f32.mrb[28].mxu0 }
 0x12e   :  { %v799_v9 = vpop.f32.mrb[29].mxu0 }
 0x12f   :  { %684 = vst [vmem:[%s1144_s3 + $0x68] sm:$0xff] %v668_v7  ;;  %v800_v10 = vadd.f32 %v799_v9, %v798_v8  ;;  %v801_v11 = vpop.f32.mrb[30].mxu0 }
 0x130   :  { %v802_v12 = vpop.f32.mrb[31].mxu0 }
 0x131   :  { %v591_v13 = vadd.f32 %v850_v31, %v800_v10  ;;  %v803_v14 = vadd.f32 %v802_v12, %v801_v11 }
 0x133   :  { %v669_v15 = vadd.f32 %v1075_v55, %v591_v13  ;;  %v594_v16 = vadd.f32 %v851_v36, %v803_v14 }
 0x135   :  { %685 = vst [vmem:[%s1144_s3 + $0x70] sm:$0xff] %v669_v15  ;;  %v670_v17 = vadd.f32 %v1075_v55, %v594_v16 }
 0x137   :  { %686 = vst [vmem:[%s1144_s3 + $0x78] sm:$0xff] %v670_v17 }

// kernel: fcos_forward.29
= control target key start
LH: loop header
LB: loop body
LE: loop exit
PB: predicated region body
PF: predicated region fallthrough
CT: control target
= control target key end

     0   :  { %v1134_v1 = vmov 0.0   ;;  %vm1135_vm0 = vmmov 0   ;;  %s1443_s1 = inlined_call_operand.vmem [shape: bf16[384,128], index: 1, kind: input, shape index: {}]   ;;  %s1444_s0 = inlined_call_operand.vmem [shape: bf16[168,384], index: 0, kind: input, shape index: {}]   ;;  %s1445_s2 = inlined_call_operand.vmem [shape: f32[1,128], index: 2, kind: input, shape index: {}]   ;;  %s1446_s3 = inlined_call_operand.vmem [shape: f32[168,128], index: 3, kind: output, shape index: {}]  }
   0x1   :  { %v1067_v0 = vld [vmem:[%s1443_s1 + $0x40] sm:$0xff]   ;;  %1005 = vmatprep.subr.bf16.mxu1 %v1134_v1  ;;  %1021 = vmatprep.mubr.msk.bf16.mxu1 %vm1135_vm0, %v1134_v1  ;;  %v1070_v4 = vld [vmem:[%s1443_s1 + $0x48] sm:$0xff]   ;;  %v1073_v7 = vld [vmem:[%s1443_s1 + $0x50] sm:$0xff]  }
   0x2   :  { %v1068_v2 = vld [vmem:[%s1443_s1] sm:$0xff]   ;;  %904 = vmatprep.subr.bf16.mxu0 %v1067_v0  ;;  %v1071_v5 = vld [vmem:[%s1443_s1 + $0x8] sm:$0xff]   ;;  %v1074_v8 = vld [vmem:[%s1443_s1 + $0x10] sm:$0xff]  }
   0x3   :  { %v1069_v3 = vld [vmem:[%s1443_s1 + $0x80] sm:$0xff]   ;;  %905 = vmatpush3.bf16.msra.mxu0 %v1068_v2  ;;  %v1072_v6 = vld [vmem:[%s1443_s1 + $0x88] sm:$0xff]   ;;  %v1075_v9 = vld [vmem:[%s1443_s1 + $0x90] sm:$0xff]  }
   0x4   :  { %1006 = vmatpush3.bf16.msra.mxu1 %v1069_v3  ;;  %906 = vmatprep.subr.bf16.mxu0 %v1070_v4  ;;  %v1076_v10 = vld [vmem:[%s1443_s1 + $0x58] sm:$0xff]   ;;  %v1079_v13 = vld [vmem:[%s1443_s1 + $0x60] sm:$0xff]   ;;  %v1082_v16 = vld [vmem:[%s1443_s1 + $0x68] sm:$0xff]  }
   0x5   :  { %1007 = vmatprep.subr.bf16.mxu1 %v1134_v1  ;;  %v1077_v11 = vld [vmem:[%s1443_s1 + $0x18] sm:$0xff]   ;;  %v1080_v14 = vld [vmem:[%s1443_s1 + $0x20] sm:$0xff]   ;;  %v1083_v17 = vld [vmem:[%s1443_s1 + $0x28] sm:$0xff]  }
   0x6   :  { %v1078_v12 = vld [vmem:[%s1443_s1 + $0x98] sm:$0xff]   ;;  %v1081_v15 = vld [vmem:[%s1443_s1 + $0xa0] sm:$0xff]   ;;  %v1084_v18 = vld [vmem:[%s1443_s1 + $0xa8] sm:$0xff]  }
   0x7   :  { %907 = vmatpush3.bf16.msra.mxu0 %v1071_v5  ;;  %v1085_v19 = vld [vmem:[%s1443_s1 + $0x70] sm:$0xff]   ;;  %v1088_v22 = vld [vmem:[%s1443_s1 + $0x78] sm:$0xff]   ;;  %v1091_v26 = vld [vmem:[%s1444_s0] ss:$12 sps:$4 sm:$0xff]  }
   0x8   :  { %1008 = vmatpush3.bf16.msra.mxu1 %v1072_v6  ;;  %908 = vmatprep.subr.bf16.mxu0 %v1073_v7  ;;  %v1086_v20 = vld [vmem:[%s1443_s1 + $0x30] sm:$0xff]   ;;  %v1089_v24 = vld [vmem:[%s1443_s1 + $0x38] sm:$0xff]   ;;  %v1098_v30 = vld [vmem:[%s1444_s0 + $0x20] ss:$12 sps:$4 sm:$0xff]  }
   0x9   :  { %1009 = vmatprep.subr.bf16.mxu1 %v1134_v1  ;;  %v1087_v21 = vld [vmem:[%s1443_s1 + $0xb0] sm:$0xff]   ;;  %v1090_v25 = vld [vmem:[%s1443_s1 + $0xb8] sm:$0xff]   ;;  %v1109_v38 = vld [vmem:[%s1444_s0 + $0x60] ss:$12 sps:$4 sm:$0xff]  }
   0xa   :  { %v1093_v23 = vld [vmem:[%s1444_s0 + $0x4] ss:$12 sps:$4 sm:$0xff]   ;;  %v1094_v27 = vld [vmem:[%s1444_s0 + $0x8] ss:$12 sps:$4 sm:$0xff]   ;;  %v1103_v34 = vld [vmem:[%s1444_s0 + $0x4c] ss:$12 sps:$4 sm:$0xff]  }
   0xb   :  { %909 = vmatpush3.bf16.msra.mxu0 %v1074_v8  ;;  %498 = vmatprep.mubr.bf16.mxu0 %v1093_v23  ;;  %v1095_v28 = vld [vmem:[%s1444_s0 + $0x1c] ss:$12 sps:$4 sm:$0xff]   ;;  %v1097_v29 = vld [vmem:[%s1444_s0 + $0x18] ss:$12 sps:$4 sm:$0xff]   ;;  %v1099_v31 = vld [vmem:[%s1444_s0 + $0x34] ss:$12 sps:$4 sm:$0xff]  }
   0xc   :  { %1010 = vmatpush3.bf16.msra.mxu1 %v1075_v9  ;;  %910 = vmatprep.subr.bf16.mxu0 %v1076_v10  ;;  %v1101_v32 = vld [vmem:[%s1444_s0 + $0x30] ss:$12 sps:$4 sm:$0xff]   ;;  %v1102_v33 = vld [vmem:[%s1444_s0 + $0x38] ss:$12 sps:$4 sm:$0xff]   ;;  %v1105_v35 = vld [vmem:[%s1444_s0 + $0x48] ss:$12 sps:$4 sm:$0xff]  }
   0xd   :  { %1011 = vmatprep.subr.bf16.mxu1 %v1134_v1  ;;  %v1106_v36 = vld [vmem:[%s1444_s0 + $0x50] ss:$12 sps:$4 sm:$0xff]   ;;  %v1110_v39 = vld [vmem:[%s1444_s0 + $0x68] ss:$12 sps:$4 sm:$0xff]   ;;  %v1113_v41 = vld [vmem:[%s1444_s0 + $0x78] ss:$12 sps:$4 sm:$0xff]  }
   0xe   :  { %v1107_v37 = vld [vmem:[%s1444_s0 + $0x64] ss:$12 sps:$4 sm:$0xff]   ;;  %v1111_v40 = vld [vmem:[%s1444_s0 + $0x7c] ss:$12 sps:$4 sm:$0xff]   ;;  %v1114_v42 = vld [vmem:[%s1444_s0 + $0x80] ss:$12 sps:$4 sm:$0xff]  }
   0xf   :  { %911 = vmatpush3.bf16.msra.mxu0 %v1077_v11  ;;  %v1115_v43 = vld [vmem:[%s1444_s0 + $0x94] ss:$12 sps:$4 sm:$0xff]   ;;  %v1117_v44 = vld [vmem:[%s1444_s0 + $0x90] ss:$12 sps:$4 sm:$0xff]   ;;  %v1118_v45 = vld [vmem:[%s1444_s0 + $0x98] ss:$12 sps:$4 sm:$0xff]  }
  0x10   :  { %1012 = vmatpush3.bf16.msra.mxu1 %v1078_v12  ;;  %912 = vmatprep.subr.bf16.mxu0 %v1079_v13  ;;  %v1119_v46 = vld [vmem:[%s1444_s0 + $0xac] ss:$12 sps:$4 sm:$0xff]   ;;  %v1121_v47 = vld [vmem:[%s1444_s0 + $0xa8] ss:$12 sps:$4 sm:$0xff]   ;;  %v1122_v48 = vld [vmem:[%s1444_s0 + $0xb0] ss:$12 sps:$4 sm:$0xff]  }
  0x11   :  { %1013 = vmatprep.subr.bf16.mxu1 %v1134_v1  ;;  %v1123_v49 = vld [vmem:[%s1444_s0 + $0xc4] ss:$12 sps:$4 sm:$0xff]   ;;  %v1125_v50 = vld [vmem:[%s1444_s0 + $0xc0] ss:$12 sps:$4 sm:$0xff]   ;;  %v1126_v51 = vld [vmem:[%s1444_s0 + $0xc8] ss:$12 sps:$4 sm:$0xff]  }
  0x12   :  { %v1127_v52 = vld [vmem:[%s1444_s0 + $0xdc] ss:$12 sps:$4 sm:$0xff]   ;;  %v101_v53 = vld [vmem:[%s1444_s0 + $0xf0] sm:$0xff]  ;;  %v1129_v54 = vld [vmem:[%s1444_s0 + $0xd8] ss:$12 sps:$4 sm:$0xff]  }
  0x13   :  { %913 = vmatpush3.bf16.msra.mxu0 %v1080_v14  ;;  %v1130_v55 = vld [vmem:[%s1444_s0 + $0xe0] ss:$12 sps:$4 sm:$0xff]   ;;  %v877_v56 = vcombine.high %v101_v53, %v101_v53  ;;  %v876_v57 = vcombine.low %v101_v53, %v101_v53  ;;  %v1133_v58 = vld [vmem:[%s1444_s0 + $0xf8] ss:$0 sps:$4 sm:$0xff]  }
  0x14   :  { %1014 = vmatpush3.bf16.msra.mxu1 %v1081_v15  ;;  %914 = vmatprep.subr.bf16.mxu0 %v1082_v16  ;;  %v1357_v2 = vld [vmem:[%s1445_s2] ss:$0 sm:$0xff] }
  0x15   :  { %1015 = vmatprep.subr.bf16.mxu1 %v1134_v1 }
  0x17   :  { %915 = vmatpush3.bf16.msra.mxu0 %v1083_v17 }
  0x18   :  { %1016 = vmatpush3.bf16.msra.mxu1 %v1084_v18  ;;  %916 = vmatprep.subr.bf16.mxu0 %v1085_v19 }
  0x19   :  { %1017 = vmatprep.subr.bf16.mxu1 %v1134_v1 }
  0x1b   :  { %917 = vmatpush3.bf16.msra.mxu0 %v1086_v20 }
  0x1c   :  { %1018 = vmatpush3.bf16.msra.mxu1 %v1087_v21  ;;  %918 = vmatprep.subr.bf16.mxu0 %v1088_v22 }
  0x1d   :  { %1019 = vmatprep.subr.bf16.mxu1 %v1134_v1 }
  0x1f   :  { %919 = vmatpush3.bf16.msra.mxu0 %v1089_v24 }
  0x20   :  { %1020 = vmatpush3.bf16.msra.mxu1 %v1090_v25 }
  0x22   :  { %499 = vmatmul.mubr.bf16.vlgmr.msra.gmra.mrb[0].mxu0 %v1091_v26 }
  0x23   :  { %1022 = vmatmul.mubr.bf16.vlgmr.msra.gmra.mrb[0].mxu1 %v1094_v27  ;;  %506 = vmatprep.mubr.bf16.mxu0 %v1095_v28 }
  0x24   :  { %1025 = vmatprep.mubr.msk.bf16.mxu1 %vm1135_vm0, %v1134_v1 }
  0x2a   :  { %507 = vmatmul.mubr.bf16.gmra.mrb[4].mxu0 %v1097_v29 }
  0x2b   :  { %1026 = vmatmul.mubr.bf16.gmra.mrb[4].mxu1 %v1098_v30  ;;  %514 = vmatprep.mubr.bf16.mxu0 %v1099_v31 }
  0x2c   :  { %1029 = vmatprep.mubr.msk.bf16.mxu1 %vm1135_vm0, %v1134_v1 }
  0x32   :  { %515 = vmatmul.mubr.bf16.gmra.mrb[8].mxu0 %v1101_v32 }
  0x33   :  { %1030 = vmatmul.mubr.bf16.gmra.mrb[8].mxu1 %v1102_v33  ;;  %522 = vmatprep.mubr.bf16.mxu0 %v1103_v34 }
  0x34   :  { %1033 = vmatprep.mubr.msk.bf16.mxu1 %vm1135_vm0, %v1134_v1 }
  0x3a   :  { %523 = vmatmul.mubr.bf16.gmra.mrb[12].mxu0 %v1105_v35 }
  0x3b   :  { %1034 = vmatmul.mubr.bf16.gmra.mrb[12].mxu1 %v1106_v36  ;;  %530 = vmatprep.mubr.bf16.mxu0 %v1107_v37 }
  0x3c   :  { %1037 = vmatprep.mubr.msk.bf16.mxu1 %vm1135_vm0, %v1134_v1 }
  0x42   :  { %531 = vmatmul.mubr.bf16.gmra.mrb[16].mxu0 %v1109_v38 }
  0x43   :  { %1038 = vmatmul.mubr.bf16.gmra.mrb[16].mxu1 %v1110_v39  ;;  %538 = vmatprep.mubr.bf16.mxu0 %v1111_v40 }
  0x44   :  { %1041 = vmatprep.mubr.msk.bf16.mxu1 %vm1135_vm0, %v1134_v1 }
  0x4a   :  { %539 = vmatmul.mubr.bf16.gmra.mrb[20].mxu0 %v1113_v41 }
  0x4b   :  { %1042 = vmatmul.mubr.bf16.gmra.mrb[20].mxu1 %v1114_v42  ;;  %546 = vmatprep.mubr.bf16.mxu0 %v1115_v43 }
  0x4c   :  { %1045 = vmatprep.mubr.msk.bf16.mxu1 %vm1135_vm0, %v1134_v1 }
  0x52   :  { %547 = vmatmul.mubr.bf16.gmra.mrb[24].mxu0 %v1117_v44 }
  0x53   :  { %1046 = vmatmul.mubr.bf16.gmra.mrb[24].mxu1 %v1118_v45  ;;  %554 = vmatprep.mubr.bf16.mxu0 %v1119_v46 }
  0x54   :  { %1049 = vmatprep.mubr.msk.bf16.mxu1 %vm1135_vm0, %v1134_v1 }
  0x5a   :  { %555 = vmatmul.mubr.bf16.gmra.mrb[28].mxu0 %v1121_v47 }
  0x5b   :  { %1050 = vmatmul.mubr.bf16.gmra.mrb[28].mxu1 %v1122_v48  ;;  %562 = vmatprep.mubr.bf16.mxu0 %v1123_v49 }
  0x5c   :  { %1053 = vmatprep.mubr.msk.bf16.mxu1 %vm1135_vm0, %v1134_v1 }
  0x62   :  { %563 = vmatmul.mubr.bf16.gmra.mrb[32].mxu0 %v1125_v50 }
  0x63   :  { %1054 = vmatmul.mubr.bf16.gmra.mrb[32].mxu1 %v1126_v51  ;;  %570 = vmatprep.mubr.bf16.mxu0 %v1127_v52 }
  0x64   :  { %1057 = vmatprep.mubr.msk.bf16.mxu1 %vm1135_vm0, %v1134_v1 }
  0x6a   :  { %571 = vmatmul.mubr.bf16.gmra.mrb[36].mxu0 %v1129_v54 }
  0x6b   :  { %1058 = vmatmul.mubr.bf16.gmra.mrb[36].mxu1 %v1130_v55  ;;  %578 = vmatprep.mubr.bf16.mxu0 %v877_v56 }
  0x6c   :  { %1061 = vmatprep.mubr.msk.bf16.mxu1 %vm1135_vm0, %v1134_v1 }
  0x72   :  { %579 = vmatmul.mubr.bf16.gmra.mrb[40].mxu0 %v876_v57 }
  0x73   :  { %1062 = vmatmul.mubr.bf16.gmra.mrb[40].mxu1 %v1133_v58 }
  0xf5   :  { %v920_v59 = vpop.f32.mrb[0].mxu0 }
  0xf6   :  { %v620_v60 = vpop.f32.mrb[0].mxu1  ;;  %v921_v61 = vpop.f32.mrb[1].mxu0 }
  0xf7   :  { %v922_v62 = vadd.f32 %v921_v61, %v920_v59  ;;  %v1023_v63 = vpop.f32.mrb[1].mxu1  ;;  %v923_v0 = vpop.f32.mrb[2].mxu0 }
  0xf8   :  { %v623_v3 = vpop.f32.mrb[2].mxu1  ;;  %v924_v1 = vpop.f32.mrb[3].mxu0 }
  0xf9   :  { %v621_v4 = vadd.f32 %v922_v62, %v620_v60  ;;  %v925_v5 = vadd.f32 %v924_v1, %v923_v0  ;;  %v1024_v6 = vpop.f32.mrb[3].mxu1 }
  0xfb   :  { %v779_v7 = vadd.f32 %v1357_v2, %v621_v4  ;;  %v624_v8 = vadd.f32 %v925_v5, %v623_v3 }
  0xfd   :  { %v800_v9 = vmax.f32 %v779_v7, 0.0  ;;  %v780_v10 = vadd.f32 %v1357_v2, %v624_v8  ;;  %v926_v11 = vpop.f32.mrb[4].mxu0 }
  0xfe   :  { %v628_v12 = vpop.f32.mrb[4].mxu1  ;;  %v927_v13 = vpop.f32.mrb[5].mxu0 }
  0xff   :  { %821 = vst [vmem:[%s1446_s3] sm:$0xff] %v800_v9  ;;  %v801_v14 = vmax.f32 %v780_v10, 0.0  ;;  %v928_v15 = vadd.f32 %v927_v13, %v926_v11  ;;  %v1027_v16 = vpop.f32.mrb[5].mxu1  ;;  %v929_v17 = vpop.f32.mrb[6].mxu0 }
 0x100   :  { %v631_v18 = vpop.f32.mrb[6].mxu1  ;;  %v930_v19 = vpop.f32.mrb[7].mxu0 }
 0x101   :  { %822 = vst [vmem:[%s1446_s3 + $0x8] sm:$0xff] %v801_v14  ;;  %v629_v20 = vadd.f32 %v928_v15, %v628_v12  ;;  %v931_v21 = vadd.f32 %v930_v19, %v929_v17  ;;  %v1028_v22 = vpop.f32.mrb[7].mxu1 }
 0x103   :  { %v781_v23 = vadd.f32 %v1357_v2, %v629_v20  ;;  %v632_v24 = vadd.f32 %v931_v21, %v631_v18 }
 0x105   :  { %v802_v25 = vmax.f32 %v781_v23, 0.0  ;;  %v782_v26 = vadd.f32 %v1357_v2, %v632_v24  ;;  %v932_v27 = vpop.f32.mrb[8].mxu0 }
 0x106   :  { %v636_v28 = vpop.f32.mrb[8].mxu1  ;;  %v933_v29 = vpop.f32.mrb[9].mxu0 }
 0x107   :  { %823 = vst [vmem:[%s1446_s3 + $0x10] sm:$0xff] %v802_v25  ;;  %v803_v30 = vmax.f32 %v782_v26, 0.0  ;;  %v934_v31 = vadd.f32 %v933_v29, %v932_v27  ;;  %v1031_v32 = vpop.f32.mrb[9].mxu1  ;;  %v935_v33 = vpop.f32.mrb[10].mxu0 }
 0x108   :  { %v639_v34 = vpop.f32.mrb[10].mxu1  ;;  %v936_v35 = vpop.f32.mrb[11].mxu0 }
 0x109   :  { %824 = vst [vmem:[%s1446_s3 + $0x18] sm:$0xff] %v803_v30  ;;  %v637_v36 = vadd.f32 %v934_v31, %v636_v28  ;;  %v937_v37 = vadd.f32 %v936_v35, %v935_v33  ;;  %v1032_v38 = vpop.f32.mrb[11].mxu1 }
 0x10b   :  { %v783_v39 = vadd.f32 %v1357_v2, %v637_v36  ;;  %v640_v40 = vadd.f32 %v937_v37, %v639_v34 }
 0x10d   :  { %v804_v41 = vmax.f32 %v783_v39, 0.0  ;;  %v784_v42 = vadd.f32 %v1357_v2, %v640_v40  ;;  %v938_v43 = vpop.f32.mrb[12].mxu0 }
 0x10e   :  { %v644_v44 = vpop.f32.mrb[12].mxu1  ;;  %v939_v45 = vpop.f32.mrb[13].mxu0 }
 0x10f   :  { %825 = vst [vmem:[%s1446_s3 + $0x20] sm:$0xff] %v804_v41  ;;  %v805_v46 = vmax.f32 %v784_v42, 0.0  ;;  %v940_v47 = vadd.f32 %v939_v45, %v938_v43  ;;  %v1035_v48 = vpop.f32.mrb[13].mxu1  ;;  %v941_v49 = vpop.f32.mrb[14].mxu0 }
 0x110   :  { %v647_v50 = vpop.f32.mrb[14].mxu1  ;;  %v942_v51 = vpop.f32.mrb[15].mxu0 }
 0x111   :  { %826 = vst [vmem:[%s1446_s3 + $0x28] sm:$0xff] %v805_v46  ;;  %v645_v52 = vadd.f32 %v940_v47, %v644_v44  ;;  %v943_v53 = vadd.f32 %v942_v51, %v941_v49  ;;  %v1036_v54 = vpop.f32.mrb[15].mxu1 }
 0x113   :  { %v785_v55 = vadd.f32 %v1357_v2, %v645_v52  ;;  %v648_v56 = vadd.f32 %v943_v53, %v647_v50 }
 0x115   :  { %v806_v57 = vmax.f32 %v785_v55, 0.0  ;;  %v786_v58 = vadd.f32 %v1357_v2, %v648_v56  ;;  %v944_v59 = vpop.f32.mrb[16].mxu0 }
 0x116   :  { %v652_v60 = vpop.f32.mrb[16].mxu1  ;;  %v945_v61 = vpop.f32.mrb[17].mxu0 }
 0x117   :  { %827 = vst [vmem:[%s1446_s3 + $0x30] sm:$0xff] %v806_v57  ;;  %v807_v62 = vmax.f32 %v786_v58, 0.0  ;;  %v946_v63 = vadd.f32 %v945_v61, %v944_v59  ;;  %v1039_v0 = vpop.f32.mrb[17].mxu1  ;;  %v947_v3 = vpop.f32.mrb[18].mxu0 }
 0x118   :  { %v655_v1 = vpop.f32.mrb[18].mxu1  ;;  %v948_v4 = vpop.f32.mrb[19].mxu0 }
 0x119   :  { %828 = vst [vmem:[%s1446_s3 + $0x38] sm:$0xff] %v807_v62  ;;  %v653_v5 = vadd.f32 %v946_v63, %v652_v60  ;;  %v949_v6 = vadd.f32 %v948_v4, %v947_v3  ;;  %v1040_v7 = vpop.f32.mrb[19].mxu1 }
 0x11b   :  { %v787_v8 = vadd.f32 %v1357_v2, %v653_v5  ;;  %v656_v9 = vadd.f32 %v949_v6, %v655_v1 }
 0x11d   :  { %v808_v10 = vmax.f32 %v787_v8, 0.0  ;;  %v788_v11 = vadd.f32 %v1357_v2, %v656_v9  ;;  %v950_v12 = vpop.f32.mrb[20].mxu0 }
 0x11e   :  { %v660_v13 = vpop.f32.mrb[20].mxu1  ;;  %v951_v14 = vpop.f32.mrb[21].mxu0 }
 0x11f   :  { %829 = vst [vmem:[%s1446_s3 + $0x40] sm:$0xff] %v808_v10  ;;  %v809_v15 = vmax.f32 %v788_v11, 0.0  ;;  %v952_v16 = vadd.f32 %v951_v14, %v950_v12  ;;  %v1043_v17 = vpop.f32.mrb[21].mxu1  ;;  %v953_v18 = vpop.f32.mrb[22].mxu0 }
 0x120   :  { %v663_v19 = vpop.f32.mrb[22].mxu1  ;;  %v954_v20 = vpop.f32.mrb[23].mxu0 }
 0x121   :  { %830 = vst [vmem:[%s1446_s3 + $0x48] sm:$0xff] %v809_v15  ;;  %v661_v21 = vadd.f32 %v952_v16, %v660_v13  ;;  %v955_v22 = vadd.f32 %v954_v20, %v953_v18  ;;  %v1044_v23 = vpop.f32.mrb[23].mxu1 }
 0x123   :  { %v789_v24 = vadd.f32 %v1357_v2, %v661_v21  ;;  %v664_v25 = vadd.f32 %v955_v22, %v663_v19 }
 0x125   :  { %v810_v26 = vmax.f32 %v789_v24, 0.0  ;;  %v790_v27 = vadd.f32 %v1357_v2, %v664_v25  ;;  %v956_v28 = vpop.f32.mrb[24].mxu0 }
 0x126   :  { %v668_v29 = vpop.f32.mrb[24].mxu1  ;;  %v957_v30 = vpop.f32.mrb[25].mxu0 }
 0x127   :  { %831 = vst [vmem:[%s1446_s3 + $0x50] sm:$0xff] %v810_v26  ;;  %v811_v31 = vmax.f32 %v790_v27, 0.0  ;;  %v958_v32 = vadd.f32 %v957_v30, %v956_v28  ;;  %v1047_v33 = vpop.f32.mrb[25].mxu1  ;;  %v959_v34 = vpop.f32.mrb[26].mxu0 }
 0x128   :  { %v671_v35 = vpop.f32.mrb[26].mxu1  ;;  %v960_v36 = vpop.f32.mrb[27].mxu0 }
 0x129   :  { %832 = vst [vmem:[%s1446_s3 + $0x58] sm:$0xff] %v811_v31  ;;  %v669_v37 = vadd.f32 %v958_v32, %v668_v29  ;;  %v961_v38 = vadd.f32 %v960_v36, %v959_v34  ;;  %v1048_v39 = vpop.f32.mrb[27].mxu1 }
 0x12b   :  { %v791_v40 = vadd.f32 %v1357_v2, %v669_v37  ;;  %v672_v41 = vadd.f32 %v961_v38, %v671_v35 }
 0x12d   :  { %v812_v42 = vmax.f32 %v791_v40, 0.0  ;;  %v792_v43 = vadd.f32 %v1357_v2, %v672_v41  ;;  %v962_v44 = vpop.f32.mrb[28].mxu0 }
 0x12e   :  { %v676_v45 = vpop.f32.mrb[28].mxu1  ;;  %v963_v46 = vpop.f32.mrb[29].mxu0 }
 0x12f   :  { %833 = vst [vmem:[%s1446_s3 + $0x60] sm:$0xff] %v812_v42  ;;  %v813_v47 = vmax.f32 %v792_v43, 0.0  ;;  %v964_v48 = vadd.f32 %v963_v46, %v962_v44  ;;  %v1051_v49 = vpop.f32.mrb[29].mxu1  ;;  %v965_v50 = vpop.f32.mrb[30].mxu0 }
 0x130   :  { %v679_v51 = vpop.f32.mrb[30].mxu1  ;;  %v966_v52 = vpop.f32.mrb[31].mxu0 }
 0x131   :  { %834 = vst [vmem:[%s1446_s3 + $0x68] sm:$0xff] %v813_v47  ;;  %v677_v53 = vadd.f32 %v964_v48, %v676_v45  ;;  %v967_v54 = vadd.f32 %v966_v52, %v965_v50  ;;  %v1052_v55 = vpop.f32.mrb[31].mxu1 }
 0x133   :  { %v793_v56 = vadd.f32 %v1357_v2, %v677_v53  ;;  %v680_v57 = vadd.f32 %v967_v54, %v679_v51 }
 0x135   :  { %v814_v58 = vmax.f32 %v793_v56, 0.0  ;;  %v794_v59 = vadd.f32 %v1357_v2, %v680_v57  ;;  %v968_v60 = vpop.f32.mrb[32].mxu0 }
 0x136   :  { %v684_v61 = vpop.f32.mrb[32].mxu1  ;;  %v969_v62 = vpop.f32.mrb[33].mxu0 }
 0x137   :  { %835 = vst [vmem:[%s1446_s3 + $0x70] sm:$0xff] %v814_v58  ;;  %v815_v63 = vmax.f32 %v794_v59, 0.0  ;;  %v970_v0 = vadd.f32 %v969_v62, %v968_v60  ;;  %v1055_v3 = vpop.f32.mrb[33].mxu1  ;;  %v971_v1 = vpop.f32.mrb[34].mxu0 }
 0x138   :  { %v687_v4 = vpop.f32.mrb[34].mxu1  ;;  %v972_v5 = vpop.f32.mrb[35].mxu0 }
 0x139   :  { %836 = vst [vmem:[%s1446_s3 + $0x78] sm:$0xff] %v815_v63  ;;  %v685_v6 = vadd.f32 %v970_v0, %v684_v61  ;;  %v973_v7 = vadd.f32 %v972_v5, %v971_v1  ;;  %v1056_v8 = vpop.f32.mrb[35].mxu1 }
 0x13b   :  { %v795_v9 = vadd.f32 %v1357_v2, %v685_v6  ;;  %v688_v10 = vadd.f32 %v973_v7, %v687_v4 }
 0x13d   :  { %v816_v11 = vmax.f32 %v795_v9, 0.0  ;;  %v796_v12 = vadd.f32 %v1357_v2, %v688_v10  ;;  %v974_v13 = vpop.f32.mrb[36].mxu0 }
 0x13e   :  { %v692_v14 = vpop.f32.mrb[36].mxu1  ;;  %v975_v15 = vpop.f32.mrb[37].mxu0 }
 0x13f   :  { %837 = vst [vmem:[%s1446_s3 + $0x80] sm:$0xff] %v816_v11  ;;  %v817_v16 = vmax.f32 %v796_v12, 0.0  ;;  %v976_v17 = vadd.f32 %v975_v15, %v974_v13  ;;  %v1059_v18 = vpop.f32.mrb[37].mxu1  ;;  %v977_v19 = vpop.f32.mrb[38].mxu0 }
 0x140   :  { %v695_v20 = vpop.f32.mrb[38].mxu1  ;;  %v978_v21 = vpop.f32.mrb[39].mxu0 }
 0x141   :  { %838 = vst [vmem:[%s1446_s3 + $0x88] sm:$0xff] %v817_v16  ;;  %v693_v22 = vadd.f32 %v976_v17, %v692_v14  ;;  %v979_v23 = vadd.f32 %v978_v21, %v977_v19  ;;  %v1060_v24 = vpop.f32.mrb[39].mxu1 }
 0x143   :  { %v797_v25 = vadd.f32 %v1357_v2, %v693_v22  ;;  %v696_v26 = vadd.f32 %v979_v23, %v695_v20 }
 0x145   :  { %v818_v27 = vmax.f32 %v797_v25, 0.0  ;;  %v798_v28 = vadd.f32 %v1357_v2, %v696_v26  ;;  %v980_v29 = vpop.f32.mrb[40].mxu0 }
 0x146   :  { %v700_v30 = vpop.f32.mrb[40].mxu1  ;;  %v981_v31 = vpop.f32.mrb[41].mxu0 }
 0x147   :  { %839 = vst [vmem:[%s1446_s3 + $0x90] sm:$0xff] %v818_v27  ;;  %v819_v32 = vmax.f32 %v798_v28, 0.0  ;;  %v982_v33 = vadd.f32 %v981_v31, %v980_v29  ;;  %v1063_v34 = vpop.f32.mrb[41].mxu1  ;;  %v983_v35 = vpop.f32.mrb[42].mxu0 }
 0x148   :  { %v703_v36 = vpop.f32.mrb[42].mxu1  ;;  %v984_v37 = vpop.f32.mrb[43].mxu0 }
 0x149   :  { %840 = vst [vmem:[%s1446_s3 + $0x98] sm:$0xff] %v819_v32  ;;  %v701_v38 = vadd.f32 %v982_v33, %v700_v30  ;;  %v1064_v39 = vpop.f32.mrb[43].mxu1 }
 0x14b   :  { %v799_v40 = vadd.f32 %v1357_v2, %v701_v38 }
 0x14d   :  { %v820_v41 = vmax.f32 %v799_v40, 0.0 }
 0x14f   :  { %841 = vst [vmem:[%s1446_s3 + $0xa0] sm:$0xff] %v820_v41 }

// kernel: fcos_forward.31
= control target key start
LH: loop header
LB: loop body
LE: loop exit
PB: predicated region body
PF: predicated region fallthrough
CT: control target
= control target key end

     0   :  { %v3021_v1 = vmov 0.0   ;;  %vm3022_vm0 = vmmov 0   ;;  %s3868_s2 = inlined_call_operand.vmem [shape: bf16[384,128], index: 2, kind: input, shape index: {}]   ;;  %s3869_s0 = inlined_call_operand.vmem [shape: bf16[168,384], index: 0, kind: input, shape index: {}]   ;;  %s3870_s3 = inlined_call_operand.vmem [shape: bf16[384,128], index: 3, kind: input, shape index: {}]   ;;  %s3871_s1 = inlined_call_operand.vmem [shape: bf16[168,384], index: 1, kind: input, shape index: {}]   ;;  %s3872_s4 = inlined_call_operand.vmem [shape: f32[1,128], index: 4, kind: input, shape index: {}]   ;;  %s3873_s6 = inlined_call_operand.vmem [shape: f32[168,128], index: 6, kind: output, shape index: {0}]   ;;  %s3874_s5 = inlined_call_operand.vmem [shape: f32[1,128], index: 5, kind: input, shape index: {}]   ;;  %s3875_s7 = inlined_call_operand.vmem [shape: f32[168,128], index: 7, kind: output, shape index: {1}]   ;;  %s3876_s8 = inlined_call_operand.vmem [shape: f32[168,128], index: 8, kind: output, shape index: {2}]  }
   0x1   :  { %v2675_v0 = vld [vmem:[%s3868_s2 + $0x40] sm:$0xff]   ;;  %2550 = vmatprep.subr.bf16.mxu1 %v3021_v1  ;;  %2566 = vmatprep.mubr.msk.bf16.mxu1 %vm3022_vm0, %v3021_v1  ;;  %v2678_v4 = vld [vmem:[%s3868_s2 + $0x48] sm:$0xff]   ;;  %v2681_v7 = vld [vmem:[%s3868_s2 + $0x50] sm:$0xff]  }
   0x2   :  { %v2676_v2 = vld [vmem:[%s3868_s2] sm:$0xff]   ;;  %2348 = vmatprep.subr.bf16.mxu0 %v2675_v0  ;;  %v2679_v5 = vld [vmem:[%s3868_s2 + $0x8] sm:$0xff]   ;;  %v2682_v8 = vld [vmem:[%s3868_s2 + $0x10] sm:$0xff]  }
   0x3   :  { %v2677_v3 = vld [vmem:[%s3868_s2 + $0x80] sm:$0xff]   ;;  %2349 = vmatpush3.bf16.msra.mxu0 %v2676_v2  ;;  %v2680_v6 = vld [vmem:[%s3868_s2 + $0x88] sm:$0xff]   ;;  %v2683_v9 = vld [vmem:[%s3868_s2 + $0x90] sm:$0xff]  }
   0x4   :  { %2551 = vmatpush3.bf16.msra.mxu1 %v2677_v3  ;;  %2350 = vmatprep.subr.bf16.mxu0 %v2678_v4  ;;  %v2684_v10 = vld [vmem:[%s3868_s2 + $0x58] sm:$0xff]   ;;  %v2687_v13 = vld [vmem:[%s3868_s2 + $0x60] sm:$0xff]   ;;  %v2690_v16 = vld [vmem:[%s3868_s2 + $0x68] sm:$0xff]  }
   0x5   :  { %2552 = vmatprep.subr.bf16.mxu1 %v3021_v1  ;;  %v2685_v11 = vld [vmem:[%s3868_s2 + $0x18] sm:$0xff]   ;;  %v2688_v14 = vld [vmem:[%s3868_s2 + $0x20] sm:$0xff]   ;;  %v2691_v17 = vld [vmem:[%s3868_s2 + $0x28] sm:$0xff]  }
   0x6   :  { %v2686_v12 = vld [vmem:[%s3868_s2 + $0x98] sm:$0xff]   ;;  %v2689_v15 = vld [vmem:[%s3868_s2 + $0xa0] sm:$0xff]   ;;  %v2692_v18 = vld [vmem:[%s3868_s2 + $0xa8] sm:$0xff]  }
   0x7   :  { %2351 = vmatpush3.bf16.msra.mxu0 %v2679_v5  ;;  %v2693_v19 = vld [vmem:[%s3868_s2 + $0x70] sm:$0xff]   ;;  %v2696_v22 = vld [vmem:[%s3868_s2 + $0x78] sm:$0xff]   ;;  %v2702_v26 = vld [vmem:[%s3870_s3 + $0x40] sm:$0xff]  }
   0x8   :  { %2553 = vmatpush3.bf16.msra.mxu1 %v2680_v6  ;;  %2352 = vmatprep.subr.bf16.mxu0 %v2681_v7  ;;  %v2694_v20 = vld [vmem:[%s3868_s2 + $0x30] sm:$0xff]   ;;  %v2697_v24 = vld [vmem:[%s3868_s2 + $0x38] sm:$0xff]   ;;  %v2699_v27 = vld [vmem:[%s3869_s0] ss:$12 sps:$4 sm:$0xff]  }
   0x9   :  { %2554 = vmatprep.subr.bf16.mxu1 %v3021_v1  ;;  %v2695_v21 = vld [vmem:[%s3868_s2 + $0xb0] sm:$0xff]   ;;  %v2698_v25 = vld [vmem:[%s3868_s2 + $0xb8] sm:$0xff]   ;;  %v2704_v29 = vld [vmem:[%s3870_s3] sm:$0xff]  }
   0xa   :  { %v2701_v23 = vld [vmem:[%s3869_s0 + $0x4] ss:$12 sps:$4 sm:$0xff]   ;;  %v2703_v28 = vld [vmem:[%s3869_s0 + $0x8] ss:$12 sps:$4 sm:$0xff]   ;;  %v2709_v37 = vld [vmem:[%s3869_s0 + $0x20] ss:$12 sps:$4 sm:$0xff]  }
   0xb   :  { %2353 = vmatpush3.bf16.msra.mxu0 %v2682_v8  ;;  %531 = vmatprep.mubr.bf16.mxu0 %v2701_v23  ;;  %v2705_v30 = vld [vmem:[%s3870_s3 + $0x80] sm:$0xff]   ;;  %v2706_v31 = vld [vmem:[%s3869_s0 + $0x1c] ss:$12 sps:$4 sm:$0xff]   ;;  %v2717_v36 = vld [vmem:[%s3870_s3 + $0x50] sm:$0xff]  }
   0xc   :  { %2555 = vmatpush3.bf16.msra.mxu1 %v2683_v9  ;;  %2354 = vmatprep.subr.bf16.mxu0 %v2684_v10  ;;  %v2710_v32 = vld [vmem:[%s3870_s3 + $0x48] sm:$0xff]   ;;  %v2708_v34 = vld [vmem:[%s3869_s0 + $0x18] ss:$12 sps:$4 sm:$0xff]   ;;  %v2712_v38 = vld [vmem:[%s3869_s0 + $0x34] ss:$12 sps:$4 sm:$0xff]  }
   0xd   :  { %2556 = vmatprep.subr.bf16.mxu1 %v3021_v1  ;;  %v2711_v33 = vld [vmem:[%s3870_s3 + $0x8] sm:$0xff]   ;;  %v2720_v39 = vld [vmem:[%s3870_s3 + $0x10] sm:$0xff]   ;;  %v2716_v42 = vld [vmem:[%s3869_s0 + $0x38] ss:$12 sps:$4 sm:$0xff]  }
   0xe   :  { %v2714_v35 = vld [vmem:[%s3870_s3 + $0x88] sm:$0xff]   ;;  %v2723_v40 = vld [vmem:[%s3870_s3 + $0x90] sm:$0xff]   ;;  %v2728_v44 = vld [vmem:[%s3870_s3 + $0x58] sm:$0xff]  }
   0xf   :  { %2355 = vmatpush3.bf16.msra.mxu0 %v2685_v11  ;;  %v2715_v41 = vld [vmem:[%s3869_s0 + $0x30] ss:$12 sps:$4 sm:$0xff]   ;;  %v2718_v43 = vld [vmem:[%s3869_s0 + $0x4c] ss:$12 sps:$4 sm:$0xff]   ;;  %v2735_v47 = vld [vmem:[%s3870_s3 + $0x60] sm:$0xff]  }
  0x10   :  { %2557 = vmatpush3.bf16.msra.mxu1 %v2686_v12  ;;  %2356 = vmatprep.subr.bf16.mxu0 %v2687_v13  ;;  %v2729_v45 = vld [vmem:[%s3870_s3 + $0x18] sm:$0xff]   ;;  %v2736_v48 = vld [vmem:[%s3870_s3 + $0x20] sm:$0xff]   ;;  %v2721_v49 = vld [vmem:[%s3869_s0 + $0x48] ss:$12 sps:$4 sm:$0xff]  }
  0x11   :  { %2558 = vmatprep.subr.bf16.mxu1 %v3021_v1  ;;  %v2730_v46 = vld [vmem:[%s3870_s3 + $0x98] sm:$0xff]   ;;  %v2740_v51 = vld [vmem:[%s3870_s3 + $0xa0] sm:$0xff]   ;;  %v2744_v53 = vld [vmem:[%s3870_s3 + $0x68] sm:$0xff]  }
  0x12   :  { %v2722_v50 = vld [vmem:[%s3869_s0 + $0x50] ss:$12 sps:$4 sm:$0xff]   ;;  %v2746_v54 = vld [vmem:[%s3870_s3 + $0x28] sm:$0xff]   ;;  %v2733_v62 = vld [vmem:[%s3869_s0 + $0x78] ss:$12 sps:$4 sm:$0xff]  }
  0x13   :  { %2357 = vmatpush3.bf16.msra.mxu0 %v2688_v14  ;;  %v2724_v52 = vld [vmem:[%s3869_s0 + $0x64] ss:$12 sps:$4 sm:$0xff]   ;;  %v2748_v55 = vld [vmem:[%s3870_s3 + $0xa8] sm:$0xff]   ;;  %v2760_v63 = vld [vmem:[%s3870_s3 + $0x78] sm:$0xff]  }
  0x14   :  { %2559 = vmatpush3.bf16.msra.mxu1 %v2689_v15  ;;  %2358 = vmatprep.subr.bf16.mxu0 %v2690_v16  ;;  %v2726_v56 = vld [vmem:[%s3869_s0 + $0x60] ss:$12 sps:$4 sm:$0xff]   ;;  %v2727_v57 = vld [vmem:[%s3869_s0 + $0x68] ss:$12 sps:$4 sm:$0xff]   ;;  %v2761_v2 = vld [vmem:[%s3870_s3 + $0x38] sm:$0xff]  }
  0x15   :  { %2560 = vmatprep.subr.bf16.mxu1 %v3021_v1  ;;  %v2731_v58 = vld [vmem:[%s3869_s0 + $0x7c] ss:$12 sps:$4 sm:$0xff]   ;;  %v2753_v59 = vld [vmem:[%s3870_s3 + $0x70] sm:$0xff]   ;;  %v2734_v0 = vld [vmem:[%s3869_s0 + $0x80] ss:$12 sps:$4 sm:$0xff]  }
  0x16   :  { %v2754_v60 = vld [vmem:[%s3870_s3 + $0x30] sm:$0xff]   ;;  %v2765_v4 = vld [vmem:[%s3870_s3 + $0xb8] sm:$0xff]   ;;  %v2751_v11 = vld [vmem:[%s3869_s0 + $0xc0] ss:$12 sps:$4 sm:$0xff]  }
  0x17   :  { %2359 = vmatpush3.bf16.msra.mxu0 %v2691_v17  ;;  %v2755_v61 = vld [vmem:[%s3870_s3 + $0xb0] sm:$0xff]   ;;  %v2741_v6 = vld [vmem:[%s3869_s0 + $0x98] ss:$12 sps:$4 sm:$0xff]   ;;  %v2756_v13 = vld [vmem:[%s3869_s0 + $0xdc] ss:$12 sps:$4 sm:$0xff]  }
  0x18   :  { %2561 = vmatpush3.bf16.msra.mxu1 %v2692_v18  ;;  %2360 = vmatprep.subr.bf16.mxu0 %v2693_v19  ;;  %v2737_v3 = vld [vmem:[%s3869_s0 + $0x94] ss:$12 sps:$4 sm:$0xff]   ;;  %v2739_v5 = vld [vmem:[%s3869_s0 + $0x90] ss:$12 sps:$4 sm:$0xff]   ;;  %v2742_v7 = vld [vmem:[%s3869_s0 + $0xac] ss:$12 sps:$4 sm:$0xff]  }
  0x19   :  { %2562 = vmatprep.subr.bf16.mxu1 %v3021_v1  ;;  %v2745_v8 = vld [vmem:[%s3869_s0 + $0xa8] ss:$12 sps:$4 sm:$0xff]   ;;  %v2747_v9 = vld [vmem:[%s3869_s0 + $0xb0] ss:$12 sps:$4 sm:$0xff]   ;;  %v2758_v15 = vld [vmem:[%s3869_s0 + $0xd8] ss:$12 sps:$4 sm:$0xff]  }
  0x1a   :  { %v2749_v10 = vld [vmem:[%s3869_s0 + $0xc4] ss:$12 sps:$4 sm:$0xff]   ;;  %v2752_v12 = vld [vmem:[%s3869_s0 + $0xc8] ss:$12 sps:$4 sm:$0xff]   ;;  %v2759_v16 = vld [vmem:[%s3869_s0 + $0xe0] ss:$12 sps:$4 sm:$0xff]  }
  0x1b   :  { %2361 = vmatpush3.bf16.msra.mxu0 %v2694_v20  ;;  %v134_v14 = vld [vmem:[%s3869_s0 + $0xf0] sm:$0xff]  ;;  %v2764_v19 = vld [vmem:[%s3869_s0 + $0xf8] ss:$0 sps:$4 sm:$0xff]   ;;  %v2770_v23 = vld [vmem:[%s3871_s1 + $0x1c] ss:$12 sps:$4 sm:$0xff]  }
  0x1c   :  { %2563 = vmatpush3.bf16.msra.mxu1 %v2695_v21  ;;  %2362 = vmatprep.subr.bf16.mxu0 %v2696_v22  ;;  %v2221_v17 = vcombine.high %v134_v14, %v134_v14  ;;  %v2220_v18 = vcombine.low %v134_v14, %v134_v14  ;;  %v2768_v20 = vld [vmem:[%s3871_s1 + $0x4] ss:$12 sps:$4 sm:$0xff]   ;;  %v2766_v21 = vld [vmem:[%s3871_s1] ss:$12 sps:$4 sm:$0xff]   ;;  %v2769_v22 = vld [vmem:[%s3871_s1 + $0x8] ss:$12 sps:$4 sm:$0xff]  }
  0x1d   :  { %2564 = vmatprep.subr.bf16.mxu1 %v3021_v1 }
  0x1f   :  { %2363 = vmatpush3.bf16.msra.mxu0 %v2697_v24  ;;  %v2772_v24 = vld [vmem:[%s3871_s1 + $0x18] ss:$12 sps:$4 sm:$0xff]  }
  0x20   :  { %2565 = vmatpush3.bf16.msra.mxu1 %v2698_v25  ;;  %2449 = vmatprep.subr.bf16.mxu0 %v2702_v26  ;;  %v2773_v25 = vld [vmem:[%s3871_s1 + $0x20] ss:$12 sps:$4 sm:$0xff]  }
  0x21   :  { %2610 = vmatprep.subr.bf16.mxu1 %v3021_v1  ;;  %v2774_v26 = vld [vmem:[%s3871_s1 + $0x34] ss:$12 sps:$4 sm:$0xff]  }
  0x22   :  { %532 = vmatmul.mubr.bf16.vlgmr.msra.gmra.mrb[0].mxu0 %v2699_v27  ;;  %v2776_v27 = vld [vmem:[%s3871_s1 + $0x30] ss:$12 sps:$4 sm:$0xff]  }
  0x23   :  { %2567 = vmatmul.mubr.bf16.vlgmr.msra.gmra.mrb[0].mxu1 %v2703_v28  ;;  %2450 = vmatpush3.bf16.msra.mxu0 %v2704_v29  ;;  %v2777_v28 = vld [vmem:[%s3871_s1 + $0x38] ss:$12 sps:$4 sm:$0xff]  }
  0x24   :  { %2611 = vmatpush3.bf16.msra.mxu1 %v2705_v30  ;;  %539 = vmatprep.mubr.bf16.mxu0 %v2706_v31  ;;  %v2778_v29 = vld [vmem:[%s3871_s1 + $0x4c] ss:$12 sps:$4 sm:$0xff]   ;;  %v2780_v30 = vld [vmem:[%s3871_s1 + $0x48] ss:$12 sps:$4 sm:$0xff]   ;;  %v2781_v31 = vld [vmem:[%s3871_s1 + $0x50] ss:$12 sps:$4 sm:$0xff]  }
  0x25   :  { %2570 = vmatprep.mubr.msk.bf16.mxu1 %vm3022_vm0, %v3021_v1  ;;  %2451 = vmatprep.subr.bf16.mxu0 %v2710_v32  ;;  %v2782_v32 = vld [vmem:[%s3871_s1 + $0x64] ss:$12 sps:$4 sm:$0xff]  }
  0x26   :  { %2612 = vmatprep.subr.bf16.mxu1 %v3021_v1 }
  0x27   :  { %2452 = vmatpush3.bf16.msra.mxu0 %v2711_v33  ;;  %v2784_v33 = vld [vmem:[%s3871_s1 + $0x60] ss:$12 sps:$4 sm:$0xff]  }
  0x28   :  { %2613 = vmatpush3.bf16.msra.mxu1 %v2714_v35  ;;  %2453 = vmatprep.subr.bf16.mxu0 %v2717_v36  ;;  %v2786_v35 = vld [vmem:[%s3871_s1 + $0x7c] ss:$12 sps:$4 sm:$0xff]   ;;  %v2788_v36 = vld [vmem:[%s3871_s1 + $0x78] ss:$12 sps:$4 sm:$0xff]  }
  0x29   :  { %2614 = vmatprep.subr.bf16.mxu1 %v3021_v1 }
  0x2a   :  { %540 = vmatmul.mubr.bf16.gmra.mrb[4].mxu0 %v2708_v34  ;;  %v2785_v34 = vld [vmem:[%s3871_s1 + $0x68] ss:$12 sps:$4 sm:$0xff]  }
  0x2b   :  { %2571 = vmatmul.mubr.bf16.gmra.mrb[4].mxu1 %v2709_v37  ;;  %547 = vmatprep.mubr.bf16.mxu0 %v2712_v38  ;;  %v2789_v37 = vld [vmem:[%s3871_s1 + $0x80] ss:$12 sps:$4 sm:$0xff]  }
  0x2c   :  { %2574 = vmatprep.mubr.msk.bf16.mxu1 %vm3022_vm0, %v3021_v1  ;;  %2454 = vmatpush3.bf16.msra.mxu0 %v2720_v39  ;;  %v2790_v38 = vld [vmem:[%s3871_s1 + $0x94] ss:$12 sps:$4 sm:$0xff]   ;;  %v2792_v39 = vld [vmem:[%s3871_s1 + $0x90] ss:$12 sps:$4 sm:$0xff]  }
  0x2d   :  { %2615 = vmatpush3.bf16.msra.mxu1 %v2723_v40  ;;  %2455 = vmatprep.subr.bf16.mxu0 %v2728_v44  ;;  %v2793_v40 = vld [vmem:[%s3871_s1 + $0x98] ss:$12 sps:$4 sm:$0xff]  }
  0x2e   :  { %2616 = vmatprep.subr.bf16.mxu1 %v3021_v1  ;;  %v2798_v44 = vld [vmem:[%s3871_s1 + $0xc4] ss:$12 sps:$4 sm:$0xff]  }
  0x30   :  { %2456 = vmatpush3.bf16.msra.mxu0 %v2729_v45  ;;  %v2800_v45 = vld [vmem:[%s3871_s1 + $0xc0] ss:$12 sps:$4 sm:$0xff]  }
  0x31   :  { %2617 = vmatpush3.bf16.msra.mxu1 %v2730_v46  ;;  %2457 = vmatprep.subr.bf16.mxu0 %v2735_v47  ;;  %v2801_v46 = vld [vmem:[%s3871_s1 + $0xc8] ss:$12 sps:$4 sm:$0xff]  }
  0x32   :  { %548 = vmatmul.mubr.bf16.gmra.mrb[8].mxu0 %v2715_v41  ;;  %2618 = vmatprep.subr.bf16.mxu1 %v3021_v1  ;;  %v2794_v41 = vld [vmem:[%s3871_s1 + $0xac] ss:$12 sps:$4 sm:$0xff]   ;;  %v2802_v47 = vld [vmem:[%s3871_s1 + $0xdc] ss:$12 sps:$4 sm:$0xff]  }
  0x33   :  { %2575 = vmatmul.mubr.bf16.gmra.mrb[8].mxu1 %v2716_v42  ;;  %555 = vmatprep.mubr.bf16.mxu0 %v2718_v43  ;;  %v2796_v42 = vld [vmem:[%s3871_s1 + $0xa8] ss:$12 sps:$4 sm:$0xff]   ;;  %v2797_v43 = vld [vmem:[%s3871_s1 + $0xb0] ss:$12 sps:$4 sm:$0xff]  }
  0x34   :  { %2578 = vmatprep.mubr.msk.bf16.mxu1 %vm3022_vm0, %v3021_v1  ;;  %2458 = vmatpush3.bf16.msra.mxu0 %v2736_v48  ;;  %v842_v48 = vld [vmem:[%s3871_s1 + $0xf0] sm:$0xff] }
  0x35   :  { %2619 = vmatpush3.bf16.msra.mxu1 %v2740_v51  ;;  %2459 = vmatprep.subr.bf16.mxu0 %v2744_v53  ;;  %v2278_v51 = vcombine.high %v842_v48, %v842_v48  ;;  %v2808_v53 = vld [vmem:[%s3871_s1 + $0xf8] ss:$0 sps:$4 sm:$0xff]  }
  0x36   :  { %2620 = vmatprep.subr.bf16.mxu1 %v3021_v1 }
  0x38   :  { %2460 = vmatpush3.bf16.msra.mxu0 %v2746_v54  ;;  %v3023_v54 = vmov 4  }
  0x39   :  { %2621 = vmatpush3.bf16.msra.mxu1 %v2748_v55  ;;  %2461 = vmatprep.subr.bf16.mxu0 %v2753_v59 }
  0x3a   :  { %556 = vmatmul.mubr.bf16.gmra.mrb[12].mxu0 %v2721_v49  ;;  %2622 = vmatprep.subr.bf16.mxu1 %v3021_v1  ;;  %v2804_v49 = vld [vmem:[%s3871_s1 + $0xd8] ss:$12 sps:$4 sm:$0xff]  }
  0x3b   :  { %2579 = vmatmul.mubr.bf16.gmra.mrb[12].mxu1 %v2722_v50  ;;  %563 = vmatprep.mubr.bf16.mxu0 %v2724_v52  ;;  %v2805_v50 = vld [vmem:[%s3871_s1 + $0xe0] ss:$12 sps:$4 sm:$0xff]   ;;  %v2277_v52 = vcombine.low %v842_v48, %v842_v48 }
  0x3c   :  { %2582 = vmatprep.mubr.msk.bf16.mxu1 %vm3022_vm0, %v3021_v1  ;;  %2462 = vmatpush3.bf16.msra.mxu0 %v2754_v60 }
  0x3d   :  { %2623 = vmatpush3.bf16.msra.mxu1 %v2755_v61  ;;  %2463 = vmatprep.subr.bf16.mxu0 %v2760_v63 }
  0x3e   :  { %2624 = vmatprep.subr.bf16.mxu1 %v3021_v1  ;;  %2673 = vset.pattern.permute.xlu0 %v3023_v54 }
  0x3f   :  { %2674 = vset.pattern.permute.xlu1 %v3023_v54 }
  0x40   :  { %2464 = vmatpush3.bf16.msra.mxu0 %v2761_v2 }
  0x41   :  { %2625 = vmatpush3.bf16.msra.mxu1 %v2765_v4 }
  0x42   :  { %564 = vmatmul.mubr.bf16.gmra.mrb[16].mxu0 %v2726_v56 }
  0x43   :  { %2583 = vmatmul.mubr.bf16.gmra.mrb[16].mxu1 %v2727_v57  ;;  %571 = vmatprep.mubr.bf16.mxu0 %v2731_v58 }
  0x44   :  { %2586 = vmatprep.mubr.msk.bf16.mxu1 %vm3022_vm0, %v3021_v1 }
  0x4a   :  { %572 = vmatmul.mubr.bf16.gmra.mrb[20].mxu0 %v2733_v62 }
  0x4b   :  { %2587 = vmatmul.mubr.bf16.gmra.mrb[20].mxu1 %v2734_v0  ;;  %579 = vmatprep.mubr.bf16.mxu0 %v2737_v3 }
  0x4c   :  { %2590 = vmatprep.mubr.msk.bf16.mxu1 %vm3022_vm0, %v3021_v1 }
  0x52   :  { %580 = vmatmul.mubr.bf16.gmra.mrb[24].mxu0 %v2739_v5 }
  0x53   :  { %2591 = vmatmul.mubr.bf16.gmra.mrb[24].mxu1 %v2741_v6  ;;  %587 = vmatprep.mubr.bf16.mxu0 %v2742_v7 }
  0x54   :  { %2594 = vmatprep.mubr.msk.bf16.mxu1 %vm3022_vm0, %v3021_v1 }
  0x5a   :  { %588 = vmatmul.mubr.bf16.gmra.mrb[28].mxu0 %v2745_v8 }
  0x5b   :  { %2595 = vmatmul.mubr.bf16.gmra.mrb[28].mxu1 %v2747_v9  ;;  %595 = vmatprep.mubr.bf16.mxu0 %v2749_v10 }
  0x5c   :  { %2598 = vmatprep.mubr.msk.bf16.mxu1 %vm3022_vm0, %v3021_v1 }
  0x62   :  { %596 = vmatmul.mubr.bf16.gmra.mrb[32].mxu0 %v2751_v11 }
  0x63   :  { %2599 = vmatmul.mubr.bf16.gmra.mrb[32].mxu1 %v2752_v12  ;;  %603 = vmatprep.mubr.bf16.mxu0 %v2756_v13 }
  0x64   :  { %2602 = vmatprep.mubr.msk.bf16.mxu1 %vm3022_vm0, %v3021_v1 }
  0x6a   :  { %604 = vmatmul.mubr.bf16.gmra.mrb[36].mxu0 %v2758_v15 }
  0x6b   :  { %2603 = vmatmul.mubr.bf16.gmra.mrb[36].mxu1 %v2759_v16  ;;  %611 = vmatprep.mubr.bf16.mxu0 %v2221_v17 }
  0x6c   :  { %2606 = vmatprep.mubr.msk.bf16.mxu1 %vm3022_vm0, %v3021_v1 }
  0x72   :  { %612 = vmatmul.mubr.bf16.gmra.mrb[40].mxu0 %v2220_v18 }
  0x73   :  { %2607 = vmatmul.mubr.bf16.gmra.mrb[40].mxu1 %v2764_v19  ;;  %1239 = vmatprep.mubr.bf16.mxu0 %v2768_v20 }
  0x74   :  { %2626 = vmatprep.mubr.msk.bf16.mxu1 %vm3022_vm0, %v3021_v1 }
  0x7a   :  { %1240 = vmatmul.mubr.bf16.vlgmr.msra.gmra.mrb[44].mxu0 %v2766_v21 }
  0x7b   :  { %2627 = vmatmul.mubr.bf16.vlgmr.msra.gmra.mrb[44].mxu1 %v2769_v22  ;;  %1247 = vmatprep.mubr.bf16.mxu0 %v2770_v23 }
  0x7c   :  { %2630 = vmatprep.mubr.msk.bf16.mxu1 %vm3022_vm0, %v3021_v1 }
  0x82   :  { %1248 = vmatmul.mubr.bf16.gmra.mrb[48].mxu0 %v2772_v24 }
  0x83   :  { %2631 = vmatmul.mubr.bf16.gmra.mrb[48].mxu1 %v2773_v25  ;;  %1255 = vmatprep.mubr.bf16.mxu0 %v2774_v26 }
  0x84   :  { %2634 = vmatprep.mubr.msk.bf16.mxu1 %vm3022_vm0, %v3021_v1 }
  0x8a   :  { %1256 = vmatmul.mubr.bf16.gmra.mrb[52].mxu0 %v2776_v27 }
  0x8b   :  { %2635 = vmatmul.mubr.bf16.gmra.mrb[52].mxu1 %v2777_v28  ;;  %1263 = vmatprep.mubr.bf16.mxu0 %v2778_v29 }
  0x8c   :  { %2638 = vmatprep.mubr.msk.bf16.mxu1 %vm3022_vm0, %v3021_v1 }
  0x92   :  { %1264 = vmatmul.mubr.bf16.gmra.mrb[56].mxu0 %v2780_v30 }
  0x93   :  { %2639 = vmatmul.mubr.bf16.gmra.mrb[56].mxu1 %v2781_v31  ;;  %1271 = vmatprep.mubr.bf16.mxu0 %v2782_v32 }
  0x94   :  { %2642 = vmatprep.mubr.msk.bf16.mxu1 %vm3022_vm0, %v3021_v1 }
  0x9a   :  { %1272 = vmatmul.mubr.bf16.gmra.mrb[60].mxu0 %v2784_v33 }
  0x9b   :  { %2643 = vmatmul.mubr.bf16.gmra.mrb[60].mxu1 %v2785_v34  ;;  %1279 = vmatprep.mubr.bf16.mxu0 %v2786_v35 }
  0x9c   :  { %2646 = vmatprep.mubr.msk.bf16.mxu1 %vm3022_vm0, %v3021_v1 }
  0xa2   :  { %1280 = vmatmul.mubr.bf16.gmra.mrb[64].mxu0 %v2788_v36 }
  0xa3   :  { %2647 = vmatmul.mubr.bf16.gmra.mrb[64].mxu1 %v2789_v37  ;;  %1287 = vmatprep.mubr.bf16.mxu0 %v2790_v38 }
  0xa4   :  { %2650 = vmatprep.mubr.msk.bf16.mxu1 %vm3022_vm0, %v3021_v1 }
  0xaa   :  { %1288 = vmatmul.mubr.bf16.gmra.mrb[68].mxu0 %v2792_v39 }
  0xab   :  { %2651 = vmatmul.mubr.bf16.gmra.mrb[68].mxu1 %v2793_v40  ;;  %1295 = vmatprep.mubr.bf16.mxu0 %v2794_v41 }
  0xac   :  { %2654 = vmatprep.mubr.msk.bf16.mxu1 %vm3022_vm0, %v3021_v1 }
  0xb2   :  { %1296 = vmatmul.mubr.bf16.gmra.mrb[72].mxu0 %v2796_v42 }
  0xb3   :  { %2655 = vmatmul.mubr.bf16.gmra.mrb[72].mxu1 %v2797_v43  ;;  %1303 = vmatprep.mubr.bf16.mxu0 %v2798_v44 }
  0xb4   :  { %2658 = vmatprep.mubr.msk.bf16.mxu1 %vm3022_vm0, %v3021_v1 }
  0xba   :  { %1304 = vmatmul.mubr.bf16.gmra.mrb[76].mxu0 %v2800_v45 }
  0xbb   :  { %2659 = vmatmul.mubr.bf16.gmra.mrb[76].mxu1 %v2801_v46  ;;  %1311 = vmatprep.mubr.bf16.mxu0 %v2802_v47 }
  0xbc   :  { %2662 = vmatprep.mubr.msk.bf16.mxu1 %vm3022_vm0, %v3021_v1 }
  0xc2   :  { %1312 = vmatmul.mubr.bf16.gmra.mrb[80].mxu0 %v2804_v49 }
  0xc3   :  { %2663 = vmatmul.mubr.bf16.gmra.mrb[80].mxu1 %v2805_v50  ;;  %1319 = vmatprep.mubr.bf16.mxu0 %v2278_v51 }
  0xc4   :  { %2666 = vmatprep.mubr.msk.bf16.mxu1 %vm3022_vm0, %v3021_v1  ;;  %v3468_v1 = vld [vmem:[%s3872_s4] ss:$0 sm:$0xff] }
  0xca   :  { %1320 = vmatmul.mubr.bf16.gmra.mrb[84].mxu0 %v2277_v52 }
  0xcb   :  { %2667 = vmatmul.mubr.bf16.gmra.mrb[84].mxu1 %v2808_v53 }
  0xf5   :  { %v2364_v55 = vpop.f32.mrb[0].mxu0 }
  0xf6   :  { %v2365_v56 = vpop.f32.mrb[1].mxu0  ;;  %v653_v57 = vpop.f32.mrb[0].mxu1 }
  0xf7   :  { %v2366_v58 = vadd.f32 %v2365_v56, %v2364_v55  ;;  %v2367_v59 = vpop.f32.mrb[2].mxu0  ;;  %v2568_v60 = vpop.f32.mrb[1].mxu1 }
  0xf8   :  { %v2368_v61 = vpop.f32.mrb[3].mxu0  ;;  %v656_v62 = vpop.f32.mrb[2].mxu1 }
  0xf9   :  { %v654_v63 = vadd.f32 %v2366_v58, %v653_v57  ;;  %v2369_v0 = vadd.f32 %v2368_v61, %v2367_v59  ;;  %v2569_v2 = vpop.f32.mrb[3].mxu1 }
  0xfb   :  { %v3471_v3 = vadd.f32 %v3468_v1, %v654_v63  ;;  %v657_v4 = vadd.f32 %v2369_v0, %v656_v62 }
  0xfd   :  { %1590 = vst [vmem:[%s3873_s6] sm:$0xff] %v3471_v3  ;;  %v3478_v5 = vadd.f32 %v3468_v1, %v657_v4  ;;  %v2370_v6 = vpop.f32.mrb[4].mxu0 }
  0xfe   :  { %v2371_v7 = vpop.f32.mrb[5].mxu0  ;;  %v661_v8 = vpop.f32.mrb[4].mxu1 }
  0xff   :  { %1591 = vst [vmem:[%s3873_s6 + $0x8] sm:$0xff] %v3478_v5  ;;  %v2372_v9 = vadd.f32 %v2371_v7, %v2370_v6  ;;  %v2373_v10 = vpop.f32.mrb[6].mxu0  ;;  %v2572_v11 = vpop.f32.mrb[5].mxu1 }
 0x100   :  { %v2374_v12 = vpop.f32.mrb[7].mxu0  ;;  %v664_v13 = vpop.f32.mrb[6].mxu1 }
 0x101   :  { %v662_v14 = vadd.f32 %v2372_v9, %v661_v8  ;;  %v2375_v15 = vadd.f32 %v2374_v12, %v2373_v10  ;;  %v2573_v16 = vpop.f32.mrb[7].mxu1 }
 0x103   :  { %v3485_v17 = vadd.f32 %v3468_v1, %v662_v14  ;;  %v665_v18 = vadd.f32 %v2375_v15, %v664_v13 }
 0x105   :  { %1592 = vst [vmem:[%s3873_s6 + $0x10] sm:$0xff] %v3485_v17  ;;  %v3492_v19 = vadd.f32 %v3468_v1, %v665_v18  ;;  %v2376_v20 = vpop.f32.mrb[8].mxu0 }
 0x106   :  { %v2377_v21 = vpop.f32.mrb[9].mxu0  ;;  %v669_v22 = vpop.f32.mrb[8].mxu1 }
 0x107   :  { %1593 = vst [vmem:[%s3873_s6 + $0x18] sm:$0xff] %v3492_v19  ;;  %v2378_v23 = vadd.f32 %v2377_v21, %v2376_v20  ;;  %v2379_v24 = vpop.f32.mrb[10].mxu0  ;;  %v2576_v25 = vpop.f32.mrb[9].mxu1 }
 0x108   :  { %v2380_v26 = vpop.f32.mrb[11].mxu0  ;;  %v672_v27 = vpop.f32.mrb[10].mxu1 }
 0x109   :  { %v670_v28 = vadd.f32 %v2378_v23, %v669_v22  ;;  %v2381_v29 = vadd.f32 %v2380_v26, %v2379_v24  ;;  %v2577_v30 = vpop.f32.mrb[11].mxu1 }
 0x10b   :  { %v3499_v31 = vadd.f32 %v3468_v1, %v670_v28  ;;  %v673_v32 = vadd.f32 %v2381_v29, %v672_v27 }
 0x10d   :  { %1594 = vst [vmem:[%s3873_s6 + $0x20] sm:$0xff] %v3499_v31  ;;  %v3506_v33 = vadd.f32 %v3468_v1, %v673_v32  ;;  %v2382_v34 = vpop.f32.mrb[12].mxu0 }
 0x10e   :  { %v2383_v35 = vpop.f32.mrb[13].mxu0  ;;  %v677_v36 = vpop.f32.mrb[12].mxu1 }
 0x10f   :  { %1595 = vst [vmem:[%s3873_s6 + $0x28] sm:$0xff] %v3506_v33  ;;  %v2384_v37 = vadd.f32 %v2383_v35, %v2382_v34  ;;  %v2385_v38 = vpop.f32.mrb[14].mxu0  ;;  %v2580_v39 = vpop.f32.mrb[13].mxu1 }
 0x110   :  { %v2386_v40 = vpop.f32.mrb[15].mxu0  ;;  %v680_v41 = vpop.f32.mrb[14].mxu1 }
 0x111   :  { %v678_v42 = vadd.f32 %v2384_v37, %v677_v36  ;;  %v2387_v43 = vadd.f32 %v2386_v40, %v2385_v38  ;;  %v2581_v44 = vpop.f32.mrb[15].mxu1 }
 0x113   :  { %v3513_v45 = vadd.f32 %v3468_v1, %v678_v42  ;;  %v681_v46 = vadd.f32 %v2387_v43, %v680_v41 }
 0x115   :  { %1596 = vst [vmem:[%s3873_s6 + $0x30] sm:$0xff] %v3513_v45  ;;  %v3520_v47 = vadd.f32 %v3468_v1, %v681_v46  ;;  %v2388_v48 = vpop.f32.mrb[16].mxu0 }
 0x116   :  { %v2389_v49 = vpop.f32.mrb[17].mxu0  ;;  %v685_v50 = vpop.f32.mrb[16].mxu1 }
 0x117   :  { %1597 = vst [vmem:[%s3873_s6 + $0x38] sm:$0xff] %v3520_v47  ;;  %v2390_v51 = vadd.f32 %v2389_v49, %v2388_v48  ;;  %v2391_v52 = vpop.f32.mrb[18].mxu0  ;;  %v2584_v53 = vpop.f32.mrb[17].mxu1 }
 0x118   :  { %v2392_v54 = vpop.f32.mrb[19].mxu0  ;;  %v688_v55 = vpop.f32.mrb[18].mxu1 }
 0x119   :  { %v686_v56 = vadd.f32 %v2390_v51, %v685_v50  ;;  %v2393_v57 = vadd.f32 %v2392_v54, %v2391_v52  ;;  %v2585_v58 = vpop.f32.mrb[19].mxu1 }
 0x11b   :  { %v3527_v59 = vadd.f32 %v3468_v1, %v686_v56  ;;  %v689_v60 = vadd.f32 %v2393_v57, %v688_v55 }
 0x11d   :  { %1598 = vst [vmem:[%s3873_s6 + $0x40] sm:$0xff] %v3527_v59  ;;  %v3534_v61 = vadd.f32 %v3468_v1, %v689_v60  ;;  %v2394_v62 = vpop.f32.mrb[20].mxu0 }
 0x11e   :  { %v2395_v63 = vpop.f32.mrb[21].mxu0  ;;  %v693_v0 = vpop.f32.mrb[20].mxu1 }
 0x11f   :  { %1599 = vst [vmem:[%s3873_s6 + $0x48] sm:$0xff] %v3534_v61  ;;  %v2396_v2 = vadd.f32 %v2395_v63, %v2394_v62  ;;  %v2397_v4 = vpop.f32.mrb[22].mxu0  ;;  %v2588_v6 = vpop.f32.mrb[21].mxu1 }
 0x120   :  { %v2398_v7 = vpop.f32.mrb[23].mxu0  ;;  %v696_v8 = vpop.f32.mrb[22].mxu1 }
 0x121   :  { %v694_v9 = vadd.f32 %v2396_v2, %v693_v0  ;;  %v2399_v10 = vadd.f32 %v2398_v7, %v2397_v4  ;;  %v2589_v11 = vpop.f32.mrb[23].mxu1 }
 0x123   :  { %v3541_v12 = vadd.f32 %v3468_v1, %v694_v9  ;;  %v697_v13 = vadd.f32 %v2399_v10, %v696_v8 }
 0x125   :  { %1600 = vst [vmem:[%s3873_s6 + $0x50] sm:$0xff] %v3541_v12  ;;  %v3548_v14 = vadd.f32 %v3468_v1, %v697_v13  ;;  %v2400_v15 = vpop.f32.mrb[24].mxu0 }
 0x126   :  { %v2401_v16 = vpop.f32.mrb[25].mxu0  ;;  %v701_v18 = vpop.f32.mrb[24].mxu1 }
 0x127   :  { %1601 = vst [vmem:[%s3873_s6 + $0x58] sm:$0xff] %v3548_v14  ;;  %v2402_v20 = vadd.f32 %v2401_v16, %v2400_v15  ;;  %v2403_v21 = vpop.f32.mrb[26].mxu0  ;;  %v2592_v22 = vpop.f32.mrb[25].mxu1 }
 0x128   :  { %v2404_v23 = vpop.f32.mrb[27].mxu0  ;;  %v704_v24 = vpop.f32.mrb[26].mxu1 }
 0x129   :  { %v702_v25 = vadd.f32 %v2402_v20, %v701_v18  ;;  %v2405_v26 = vadd.f32 %v2404_v23, %v2403_v21  ;;  %v2593_v27 = vpop.f32.mrb[27].mxu1 }
 0x12b   :  { %v3555_v28 = vadd.f32 %v3468_v1, %v702_v25  ;;  %v705_v29 = vadd.f32 %v2405_v26, %v704_v24 }
 0x12d   :  { %1602 = vst [vmem:[%s3873_s6 + $0x60] sm:$0xff] %v3555_v28  ;;  %v3562_v30 = vadd.f32 %v3468_v1, %v705_v29  ;;  %v2406_v32 = vpop.f32.mrb[28].mxu0 }
 0x12e   :  { %v2407_v34 = vpop.f32.mrb[29].mxu0  ;;  %v709_v35 = vpop.f32.mrb[28].mxu1 }
 0x12f   :  { %1603 = vst [vmem:[%s3873_s6 + $0x68] sm:$0xff] %v3562_v30  ;;  %v2408_v36 = vadd.f32 %v2407_v34, %v2406_v32  ;;  %v2409_v37 = vpop.f32.mrb[30].mxu0  ;;  %v2596_v38 = vpop.f32.mrb[29].mxu1 }
 0x130   :  { %v2410_v39 = vpop.f32.mrb[31].mxu0  ;;  %v712_v40 = vpop.f32.mrb[30].mxu1 }
 0x131   :  { %v710_v41 = vadd.f32 %v2408_v36, %v709_v35  ;;  %v2411_v42 = vadd.f32 %v2410_v39, %v2409_v37  ;;  %v2597_v43 = vpop.f32.mrb[31].mxu1 }
 0x132   :  { %v3614_v43 = vld [vmem:[%s3874_s5] ss:$0 sm:$0xff] }
 0x133   :  { %v3569_v44 = vadd.f32 %v3468_v1, %v710_v41  ;;  %v713_v46 = vadd.f32 %v2411_v42, %v712_v40 }
 0x135   :  { %1604 = vst [vmem:[%s3873_s6 + $0x70] sm:$0xff] %v3569_v44  ;;  %v3576_v48 = vadd.f32 %v3468_v1, %v713_v46  ;;  %v2412_v49 = vpop.f32.mrb[32].mxu0 }
 0x136   :  { %v2413_v50 = vpop.f32.mrb[33].mxu0  ;;  %v717_v51 = vpop.f32.mrb[32].mxu1 }
 0x137   :  { %1605 = vst [vmem:[%s3873_s6 + $0x78] sm:$0xff] %v3576_v48  ;;  %v2414_v52 = vadd.f32 %v2413_v50, %v2412_v49  ;;  %v2415_v53 = vpop.f32.mrb[34].mxu0  ;;  %v2600_v54 = vpop.f32.mrb[33].mxu1 }
 0x138   :  { %v2416_v55 = vpop.f32.mrb[35].mxu0  ;;  %v720_v56 = vpop.f32.mrb[34].mxu1 }
 0x139   :  { %v718_v57 = vadd.f32 %v2414_v52, %v717_v51  ;;  %v2417_v58 = vadd.f32 %v2416_v55, %v2415_v53  ;;  %v2601_v60 = vpop.f32.mrb[35].mxu1 }
 0x13b   :  { %v3583_v62 = vadd.f32 %v3468_v1, %v718_v57  ;;  %v721_v63 = vadd.f32 %v2417_v58, %v720_v56 }
 0x13d   :  { %1606 = vst [vmem:[%s3873_s6 + $0x80] sm:$0xff] %v3583_v62  ;;  %v3590_v0 = vadd.f32 %v3468_v1, %v721_v63  ;;  %v2418_v2 = vpop.f32.mrb[36].mxu0 }
 0x13e   :  { %v2419_v4 = vpop.f32.mrb[37].mxu0  ;;  %v725_v6 = vpop.f32.mrb[36].mxu1 }
 0x13f   :  { %1607 = vst [vmem:[%s3873_s6 + $0x88] sm:$0xff] %v3590_v0  ;;  %v2420_v7 = vadd.f32 %v2419_v4, %v2418_v2  ;;  %v2421_v8 = vpop.f32.mrb[38].mxu0  ;;  %v2604_v9 = vpop.f32.mrb[37].mxu1 }
 0x140   :  { %v2422_v10 = vpop.f32.mrb[39].mxu0  ;;  %v728_v11 = vpop.f32.mrb[38].mxu1 }
 0x141   :  { %v726_v13 = vadd.f32 %v2420_v7, %v725_v6  ;;  %v2423_v15 = vadd.f32 %v2422_v10, %v2421_v8  ;;  %v2605_v16 = vpop.f32.mrb[39].mxu1 }
 0x143   :  { %v3597_v18 = vadd.f32 %v3468_v1, %v726_v13  ;;  %v729_v20 = vadd.f32 %v2423_v15, %v728_v11 }
 0x145   :  { %1608 = vst [vmem:[%s3873_s6 + $0x90] sm:$0xff] %v3597_v18  ;;  %v1539_v21 = vadd.f32 %v3468_v1, %v729_v20  ;;  %v2424_v22 = vpop.f32.mrb[40].mxu0 }
 0x146   :  { %v2425_v23 = vpop.f32.mrb[41].mxu0  ;;  %v733_v24 = vpop.f32.mrb[40].mxu1 }
 0x147   :  { %1609 = vst [vmem:[%s3873_s6 + $0x98] sm:$0xff] %v1539_v21  ;;  %v2426_v25 = vadd.f32 %v2425_v23, %v2424_v22  ;;  %v2427_v26 = vpop.f32.mrb[42].mxu0  ;;  %v2608_v27 = vpop.f32.mrb[41].mxu1 }
 0x148   :  { %v2428_v29 = vpop.f32.mrb[43].mxu0  ;;  %v736_v32 = vpop.f32.mrb[42].mxu1 }
 0x149   :  { %v734_v34 = vadd.f32 %v2426_v25, %v733_v24  ;;  %v2609_v35 = vpop.f32.mrb[43].mxu1 }
 0x14b   :  { %v1540_v36 = vadd.f32 %v3468_v1, %v734_v34 }
 0x14d   :  { %1610 = vst [vmem:[%s3873_s6 + $0xa0] sm:$0xff] %v1540_v36  ;;  %v2465_v37 = vpop.f32.mrb[44].mxu0 }
 0x14e   :  { %v2466_v38 = vpop.f32.mrb[45].mxu0  ;;  %v1361_v39 = vpop.f32.mrb[44].mxu1 }
 0x14f   :  { %v2467_v40 = vadd.f32 %v2466_v38, %v2465_v37  ;;  %v2468_v41 = vpop.f32.mrb[46].mxu0  ;;  %v2628_v42 = vpop.f32.mrb[45].mxu1 }
 0x150   :  { %v2469_v46 = vpop.f32.mrb[47].mxu0  ;;  %v1364_v49 = vpop.f32.mrb[46].mxu1 }
 0x151   :  { %v1362_v50 = vadd.f32 %v2467_v40, %v1361_v39  ;;  %v2470_v51 = vadd.f32 %v2469_v46, %v2468_v41  ;;  %v2629_v1 = vpop.f32.mrb[47].mxu1 }
 0x153   :  { %v1569_v52 = vadd.f32 %v3614_v43, %v1362_v50  ;;  %v1365_v53 = vadd.f32 %v2470_v51, %v1364_v49 }
 0x155   :  { %1611 = vst [vmem:[%s3875_s7] sm:$0xff] %v1569_v52  ;;  %v2327_v54 = vmul.f32 -1.442695, %v1569_v52  ;;  %v1570_v55 = vadd.f32 %v3614_v43, %v1365_v53  ;;  %v2471_v56 = vpop.f32.mrb[48].mxu0 }
 0x156   :  { %v2472_v57 = vpop.f32.mrb[49].mxu0  ;;  %v1369_v58 = vpop.f32.mrb[48].mxu1 }
 0x157   :  { %2809 = vpow2.f32 %v2327_v54  ;;  %1612 = vst [vmem:[%s3875_s7 + $0x8] sm:$0xff] %v1570_v55  ;;  %v2328_v60 = vmul.f32 -1.442695, %v1570_v55  ;;  %v2473_v63 = vadd.f32 %v2472_v57, %v2471_v56  ;;  %v2474_v2 = vpop.f32.mrb[50].mxu0  ;;  %v2632_v4 = vpop.f32.mrb[49].mxu1 }
 0x158   :  { %v2475_v6 = vpop.f32.mrb[51].mxu0  ;;  %v1372_v7 = vpop.f32.mrb[50].mxu1 }
 0x159   :  { %2811 = vpow2.f32 %v2328_v60  ;;  %v1370_v8 = vadd.f32 %v2473_v63, %v1369_v58  ;;  %v2476_v9 = vadd.f32 %v2475_v6, %v2474_v2  ;;  %v2633_v10 = vpop.f32.mrb[51].mxu1 }
 0x15b   :  { %v1571_v11 = vadd.f32 %v3614_v43, %v1370_v8  ;;  %v1373_v13 = vadd.f32 %v2476_v9, %v1372_v7 }
 0x15d   :  { %1613 = vst [vmem:[%s3875_s7 + $0x10] sm:$0xff] %v1571_v11  ;;  %v2329_v15 = vmul.f32 -1.442695, %v1571_v11  ;;  %v1572_v16 = vadd.f32 %v3614_v43, %v1373_v13  ;;  %v2477_v20 = vpop.f32.mrb[52].mxu0 }
 0x15e   :  { %v2478_v21 = vpop.f32.mrb[53].mxu0  ;;  %v1377_v22 = vpop.f32.mrb[52].mxu1 }
 0x15f   :  { %2813 = vpow2.f32 %v2329_v15  ;;  %1614 = vst [vmem:[%s3875_s7 + $0x18] sm:$0xff] %v1572_v16  ;;  %v2330_v23 = vmul.f32 -1.442695, %v1572_v16  ;;  %v2479_v24 = vadd.f32 %v2478_v21, %v2477_v20  ;;  %v2480_v25 = vpop.f32.mrb[54].mxu0  ;;  %v2636_v26 = vpop.f32.mrb[53].mxu1 }
 0x160   :  { %v2481_v27 = vpop.f32.mrb[55].mxu0  ;;  %v1380_v29 = vpop.f32.mrb[54].mxu1 }
 0x161   :  { %v2810_v32 = vpop.eup %2809  ;;  %2815 = vpow2.f32 %v2330_v23  ;;  %v1378_v34 = vadd.f32 %v2479_v24, %v1377_v22  ;;  %v2482_v35 = vadd.f32 %v2481_v27, %v2480_v25  ;;  %v2637_v36 = vpop.f32.mrb[55].mxu1 }
 0x162   :  { %v1821_v37 = vadd.f32 1.0, %v2810_v32 }
 0x163   :  { %v2812_v38 = vpop.eup %2811  ;;  %v1573_v39 = vadd.f32 %v3614_v43, %v1378_v34  ;;  %v1381_v40 = vadd.f32 %v2482_v35, %v1380_v29 }
 0x164   :  { %2817 = vrcp.f32 %v1821_v37  ;;  %v1822_v41 = vadd.f32 1.0, %v2812_v38 }
 0x165   :  { %1615 = vst [vmem:[%s3875_s7 + $0x20] sm:$0xff] %v1573_v39  ;;  %v2331_v42 = vmul.f32 -1.442695, %v1573_v39  ;;  %v1574_v46 = vadd.f32 %v3614_v43, %v1381_v40  ;;  %v2483_v49 = vpop.f32.mrb[56].mxu0 }
 0x166   :  { %v2484_v50 = vpop.f32.mrb[57].mxu0  ;;  %v1385_v51 = vpop.f32.mrb[56].mxu1 }
 0x167   :  { %2819 = vpow2.f32 %v2331_v42  ;;  %1616 = vst [vmem:[%s3875_s7 + $0x28] sm:$0xff] %v1574_v46  ;;  %v2332_v1 = vmul.f32 -1.442695, %v1574_v46  ;;  %v2485_v52 = vadd.f32 %v2484_v50, %v2483_v49  ;;  %v2486_v53 = vpop.f32.mrb[58].mxu0  ;;  %v2640_v54 = vpop.f32.mrb[57].mxu1 }
 0x168   :  { %2821 = vrcp.f32 %v1822_v41  ;;  %v2487_v55 = vpop.f32.mrb[59].mxu0  ;;  %v1388_v56 = vpop.f32.mrb[58].mxu1 }
 0x169   :  { %v2814_v57 = vpop.eup %2813  ;;  %2823 = vpow2.f32 %v2332_v1  ;;  %v1386_v58 = vadd.f32 %v2485_v52, %v1385_v51  ;;  %v2488_v60 = vadd.f32 %v2487_v55, %v2486_v53  ;;  %v2641_v63 = vpop.f32.mrb[59].mxu1 }
 0x16a   :  { %v1823_v2 = vadd.f32 1.0, %v2814_v57 }
 0x16b   :  { %v2816_v4 = vpop.eup %2815  ;;  %v1575_v6 = vadd.f32 %v3614_v43, %v1386_v58  ;;  %v1389_v7 = vadd.f32 %v2488_v60, %v1388_v56 }
 0x16c   :  { %2825 = vrcp.f32 %v1823_v2  ;;  %v1824_v8 = vadd.f32 1.0, %v2816_v4 }
 0x16d   :  { %1617 = vst [vmem:[%s3875_s7 + $0x30] sm:$0xff] %v1575_v6  ;;  %v2333_v9 = vmul.f32 -1.442695, %v1575_v6  ;;  %v1576_v10 = vadd.f32 %v3614_v43, %v1389_v7  ;;  %v2489_v11 = vpop.f32.mrb[60].mxu0 }
 0x16e   :  { %v2818_v13 = vpop.eup %2817  ;;  %v2490_v15 = vpop.f32.mrb[61].mxu0 }
 0x16f   :  { %v1393_v16 = vpop.f32.mrb[60].mxu1  ;;  %2827 = vpow2.f32 %v2333_v9  ;;  %1618 = vst [vmem:[%s3875_s7 + $0x38] sm:$0xff] %v1576_v10  ;;  %v2334_v20 = vmul.f32 -1.442695, %v1576_v10  ;;  %v2491_v21 = vadd.f32 %v2490_v15, %v2489_v11  ;;  %v2492_v22 = vpop.f32.mrb[62].mxu0  ;;  %1886 = vperm.xlu0 %2673, %v2818_v13  }
 0x170   :  { %v2644_v23 = vpop.f32.mrb[61].mxu1  ;;  %2829 = vrcp.f32 %v1824_v8  ;;  %v2493_v24 = vpop.f32.mrb[63].mxu0 }
 0x171   :  { %v1396_v25 = vpop.f32.mrb[62].mxu1  ;;  %v2820_v26 = vpop.eup %2819  ;;  %2831 = vpow2.f32 %v2334_v20  ;;  %v1394_v27 = vadd.f32 %v2491_v21, %v1393_v16  ;;  %v2494_v29 = vadd.f32 %v2493_v24, %v2492_v22 }
 0x172   :  { %v2645_v32 = vpop.f32.mrb[63].mxu1  ;;  %v2822_v34 = vpop.eup %2821  ;;  %v1825_v35 = vadd.f32 1.0, %v2820_v26 }
 0x173   :  { %v2824_v36 = vpop.eup %2823  ;;  %v1577_v37 = vadd.f32 %v3614_v43, %v1394_v27  ;;  %v1397_v38 = vadd.f32 %v2494_v29, %v1396_v25  ;;  %1891 = vperm.xlu0 %2673, %v2822_v34  }
 0x174   :  { %2833 = vrcp.f32 %v1825_v35  ;;  %v1826_v39 = vadd.f32 1.0, %v2824_v36 }
 0x175   :  { %1619 = vst [vmem:[%s3875_s7 + $0x40] sm:$0xff] %v1577_v37  ;;  %v2335_v40 = vmul.f32 -1.442695, %v1577_v37  ;;  %v1578_v41 = vadd.f32 %v3614_v43, %v1397_v38  ;;  %v2495_v42 = vpop.f32.mrb[64].mxu0 }
 0x176   :  { %v2826_v46 = vpop.eup %2825  ;;  %2835 = vrcp.f32 %v1826_v39  ;;  %v2496_v49 = vpop.f32.mrb[65].mxu0 }
 0x177   :  { %v1401_v50 = vpop.f32.mrb[64].mxu1  ;;  %2837 = vpow2.f32 %v2335_v40  ;;  %1620 = vst [vmem:[%s3875_s7 + $0x48] sm:$0xff] %v1578_v41  ;;  %v2336_v51 = vmul.f32 -1.442695, %v1578_v41  ;;  %v2497_v1 = vadd.f32 %v2496_v49, %v2495_v42  ;;  %v2498_v52 = vpop.f32.mrb[66].mxu0  ;;  %1896 = vperm.xlu1 %2674, %v2826_v46  }
 0x178   :  { %v2648_v53 = vpop.f32.mrb[65].mxu1  ;;  %v2499_v54 = vpop.f32.mrb[67].mxu0 }
 0x179   :  { %v1404_v55 = vpop.f32.mrb[66].mxu1  ;;  %v2828_v56 = vpop.eup %2827  ;;  %2839 = vpow2.f32 %v2336_v51  ;;  %v1402_v57 = vadd.f32 %v2497_v1, %v1401_v50  ;;  %v2500_v58 = vadd.f32 %v2499_v54, %v2498_v52 }
 0x17a   :  { %v2649_v60 = vpop.f32.mrb[67].mxu1  ;;  %v2830_v63 = vpop.eup %2829  ;;  %v1827_v2 = vadd.f32 1.0, %v2828_v56 }
 0x17b   :  { %v2832_v4 = vpop.eup %2831  ;;  %v1579_v6 = vadd.f32 %v3614_v43, %v1402_v57  ;;  %v1405_v7 = vadd.f32 %v2500_v58, %v1404_v55  ;;  %1901 = vperm.xlu1 %2674, %v2830_v63  }
 0x17c   :  { %2841 = vrcp.f32 %v1827_v2  ;;  %v1828_v8 = vadd.f32 1.0, %v2832_v4 }
 0x17d   :  { %1621 = vst [vmem:[%s3875_s7 + $0x50] sm:$0xff] %v1579_v6  ;;  %v2337_v9 = vmul.f32 -1.442695, %v1579_v6  ;;  %v1580_v10 = vadd.f32 %v3614_v43, %v1405_v7  ;;  %v2501_v11 = vpop.f32.mrb[68].mxu0 }
 0x17e   :  { %v2834_v13 = vpop.eup %2833  ;;  %2843 = vrcp.f32 %v1828_v8  ;;  %v2502_v15 = vpop.f32.mrb[69].mxu0 }
 0x17f   :  { %v1409_v16 = vpop.f32.mrb[68].mxu1  ;;  %2845 = vpow2.f32 %v2337_v9  ;;  %1622 = vst [vmem:[%s3875_s7 + $0x58] sm:$0xff] %v1580_v10  ;;  %v2338_v20 = vmul.f32 -1.442695, %v1580_v10  ;;  %v2503_v21 = vadd.f32 %v2502_v15, %v2501_v11  ;;  %v2504_v22 = vpop.f32.mrb[70].mxu0  ;;  %1906 = vperm.xlu0 %2673, %v2834_v13  }
 0x180   :  { %v2652_v23 = vpop.f32.mrb[69].mxu1  ;;  %v2836_v24 = vpop.eup %2835 }
 0x181   :  { %v2505_v25 = vpop.f32.mrb[71].mxu0  ;;  %v1412_v26 = vpop.f32.mrb[70].mxu1  ;;  %2847 = vpow2.f32 %v2338_v20  ;;  %v1410_v29 = vadd.f32 %v2503_v21, %v1409_v16  ;;  %1911 = vperm.xlu1 %2674, %v2836_v24  }
 0x182   :  { %v2838_v27 = vpop.eup %2837  ;;  %v2506_v32 = vadd.f32 %v2505_v25, %v2504_v22  ;;  %v2653_v34 = vpop.f32.mrb[71].mxu1 }
 0x183   :  { %v1829_v35 = vadd.f32 1.0, %v2838_v27  ;;  %v2840_v36 = vpop.eup %2839  ;;  %v1581_v37 = vadd.f32 %v3614_v43, %v1410_v29 }
 0x184   :  { %v1413_v38 = vadd.f32 %v2506_v32, %v1412_v26  ;;  %v1830_v39 = vadd.f32 1.0, %v2840_v36 }
 0x185   :  { %2849 = vrcp.f32 %v1829_v35  ;;  %1623 = vst [vmem:[%s3875_s7 + $0x60] sm:$0xff] %v1581_v37  ;;  %v2339_v40 = vmul.f32 -1.442695, %v1581_v37  ;;  %v2507_v42 = vpop.f32.mrb[72].mxu0 }
 0x186   :  { %v1582_v41 = vadd.f32 %v3614_v43, %v1413_v38  ;;  %v2842_v46 = vpop.eup %2841  ;;  %2851 = vrcp.f32 %v1830_v39  ;;  %v2508_v49 = vpop.f32.mrb[73].mxu0 }
 0x187   :  { %v1417_v50 = vpop.f32.mrb[72].mxu1  ;;  %2853 = vpow2.f32 %v2339_v40  ;;  %v2509_v1 = vadd.f32 %v2508_v49, %v2507_v42  ;;  %v2510_v52 = vpop.f32.mrb[74].mxu0  ;;  %1916 = vperm.xlu0 %2673, %v2842_v46  }
 0x188   :  { %1624 = vst [vmem:[%s3875_s7 + $0x68] sm:$0xff] %v1582_v41  ;;  %v2340_v51 = vmul.f32 -1.442695, %v1582_v41  ;;  %v2656_v53 = vpop.f32.mrb[73].mxu1  ;;  %v2844_v54 = vpop.eup %2843 }
 0x189   :  { %v2511_v55 = vpop.f32.mrb[75].mxu0  ;;  %v1420_v56 = vpop.f32.mrb[74].mxu1  ;;  %v1418_v58 = vadd.f32 %v2509_v1, %v1417_v50  ;;  %1921 = vperm.xlu1 %2674, %v2844_v54  }
 0x18a   :  { %v2846_v57 = vpop.eup %2845  ;;  %2855 = vpow2.f32 %v2340_v51  ;;  %v2512_v60 = vadd.f32 %v2511_v55, %v2510_v52  ;;  %v2657_v63 = vpop.f32.mrb[75].mxu1 }
 0x18b   :  { %v1831_v2 = vadd.f32 1.0, %v2846_v57  ;;  %v2848_v4 = vpop.eup %2847  ;;  %v1583_v6 = vadd.f32 %v3614_v43, %v1418_v58 }
 0x18c   :  { %v1421_v7 = vadd.f32 %v2512_v60, %v1420_v56  ;;  %v1832_v8 = vadd.f32 1.0, %v2848_v4 }
 0x18d   :  { %2857 = vrcp.f32 %v1831_v2  ;;  %1625 = vst [vmem:[%s3875_s7 + $0x70] sm:$0xff] %v1583_v6  ;;  %v2341_v9 = vmul.f32 -1.442695, %v1583_v6  ;;  %v2513_v11 = vpop.f32.mrb[76].mxu0 }
 0x18e   :  { %v1584_v10 = vadd.f32 %v3614_v43, %v1421_v7  ;;  %2859 = vrcp.f32 %v1832_v8  ;;  %v2514_v15 = vpop.f32.mrb[77].mxu0  ;;  %v1425_v16 = vpop.f32.mrb[76].mxu1 }
 0x18f   :  { %v2850_v13 = vpop.eup %2849  ;;  %2861 = vpow2.f32 %v2341_v9  ;;  %v2515_v21 = vadd.f32 %v2514_v15, %v2513_v11  ;;  %v2516_v22 = vpop.f32.mrb[78].mxu0 }
 0x190   :  { %1626 = vst [vmem:[%s3875_s7 + $0x78] sm:$0xff] %v1584_v10  ;;  %v2342_v20 = vmul.f32 -1.442695, %v1584_v10  ;;  %v2660_v23 = vpop.f32.mrb[77].mxu1  ;;  %1926 = vperm.xlu0 %2673, %v2850_v13   ;;  %v2852_v24 = vpop.eup %2851 }
 0x191   :  { %v2517_v25 = vpop.f32.mrb[79].mxu0  ;;  %v1428_v26 = vpop.f32.mrb[78].mxu1  ;;  %v1426_v29 = vadd.f32 %v2515_v21, %v1425_v16  ;;  %1931 = vperm.xlu1 %2674, %v2852_v24  }
 0x192   :  { %v2854_v27 = vpop.eup %2853  ;;  %2863 = vpow2.f32 %v2342_v20  ;;  %v2518_v32 = vadd.f32 %v2517_v25, %v2516_v22  ;;  %v2661_v34 = vpop.f32.mrb[79].mxu1 }
 0x193   :  { %v1833_v35 = vadd.f32 1.0, %v2854_v27  ;;  %v1585_v37 = vadd.f32 %v3614_v43, %v1426_v29 }
 0x194   :  { %v2856_v36 = vpop.eup %2855  ;;  %v1429_v38 = vadd.f32 %v2518_v32, %v1428_v26 }
 0x195   :  { %2865 = vrcp.f32 %v1833_v35  ;;  %v1834_v39 = vadd.f32 1.0, %v2856_v36  ;;  %1627 = vst [vmem:[%s3875_s7 + $0x80] sm:$0xff] %v1585_v37  ;;  %v2343_v40 = vmul.f32 -1.442695, %v1585_v37  ;;  %v2519_v42 = vpop.f32.mrb[80].mxu0 }
 0x196   :  { %v1586_v41 = vadd.f32 %v3614_v43, %v1429_v38  ;;  %v2520_v49 = vpop.f32.mrb[81].mxu0  ;;  %v1433_v50 = vpop.f32.mrb[80].mxu1 }
 0x197   :  { %v2858_v46 = vpop.eup %2857  ;;  %2867 = vrcp.f32 %v1834_v39  ;;  %v2521_v1 = vadd.f32 %v2520_v49, %v2519_v42  ;;  %v2522_v52 = vpop.f32.mrb[82].mxu0 }
 0x198   :  { %2869 = vpow2.f32 %v2343_v40  ;;  %1628 = vst [vmem:[%s3875_s7 + $0x88] sm:$0xff] %v1586_v41  ;;  %v2344_v51 = vmul.f32 -1.442695, %v1586_v41  ;;  %v2664_v53 = vpop.f32.mrb[81].mxu1  ;;  %1936 = vperm.xlu0 %2673, %v2858_v46   ;;  %v2860_v54 = vpop.eup %2859 }
 0x199   :  { %v2523_v55 = vpop.f32.mrb[83].mxu0  ;;  %v1436_v56 = vpop.f32.mrb[82].mxu1  ;;  %v1434_v58 = vadd.f32 %v2521_v1, %v1433_v50  ;;  %1941 = vperm.xlu1 %2674, %v2860_v54  }
 0x19a   :  { %v2862_v57 = vpop.eup %2861  ;;  %2871 = vpow2.f32 %v2344_v51  ;;  %v2524_v60 = vadd.f32 %v2523_v55, %v2522_v52  ;;  %v2665_v63 = vpop.f32.mrb[83].mxu1  ;;  %v2306_v55 = vmul.f32 -1.442695, %v3471_v3 }
 0x19b   :  { %v1835_v2 = vadd.f32 1.0, %v2862_v57  ;;  %v1587_v6 = vadd.f32 %v3614_v43, %v1434_v58  ;;  %v2308_v57 = vmul.f32 -1.442695, %v3485_v17  ;;  %v2309_v58 = vmul.f32 -1.442695, %v3492_v19 }
 0x19c   :  { %v2864_v4 = vpop.eup %2863  ;;  %v1437_v7 = vadd.f32 %v2524_v60, %v1436_v56  ;;  %v2307_v56 = vmul.f32 -1.442695, %v3478_v5  ;;  %v2310_v63 = vmul.f32 -1.442695, %v3499_v31  ;;  %v2312_v5 = vmul.f32 -1.442695, %v3513_v45 }
 0x19d   :  { %2873 = vrcp.f32 %v1835_v2  ;;  %v1836_v8 = vadd.f32 1.0, %v2864_v4  ;;  %1629 = vst [vmem:[%s3875_s7 + $0x90] sm:$0xff] %v1587_v6  ;;  %v2345_v9 = vmul.f32 -1.442695, %v1587_v6  ;;  %v2525_v11 = vpop.f32.mrb[84].mxu0 }
 0x19e   :  { %v1588_v10 = vadd.f32 %v3614_v43, %v1437_v7  ;;  %v2526_v15 = vpop.f32.mrb[85].mxu0  ;;  %v1441_v16 = vpop.f32.mrb[84].mxu1  ;;  %v2311_v6 = vmul.f32 -1.442695, %v3506_v33  ;;  %v2313_v19 = vmul.f32 -1.442695, %v3520_v47 }
 0x19f   :  { %v2866_v13 = vpop.eup %2865  ;;  %2875 = vrcp.f32 %v1836_v8  ;;  %v2527_v21 = vadd.f32 %v2526_v15, %v2525_v11  ;;  %v2528_v22 = vpop.f32.mrb[86].mxu0  ;;  %v2314_v33 = vmul.f32 -1.442695, %v3527_v59  ;;  %v2316_v59 = vmul.f32 -1.442695, %v3541_v12 }
 0x1a0   :  { %2877 = vpow2.f32 %v2345_v9  ;;  %1630 = vst [vmem:[%s3875_s7 + $0x98] sm:$0xff] %v1588_v10  ;;  %v2346_v20 = vmul.f32 -1.442695, %v1588_v10  ;;  %v2668_v23 = vpop.f32.mrb[85].mxu1  ;;  %1946 = vperm.xlu0 %2673, %v2866_v13   ;;  %v2529_v25 = vpop.f32.mrb[87].mxu0 }
 0x1a1   :  { %v2868_v24 = vpop.eup %2867  ;;  %v1444_v26 = vpop.f32.mrb[86].mxu1  ;;  %v1442_v29 = vadd.f32 %v2527_v21, %v1441_v16 }
 0x1a2   :  { %v2870_v27 = vpop.eup %2869  ;;  %2879 = vpow2.f32 %v2346_v20  ;;  %v2669_v32 = vpop.f32.mrb[87].mxu1  ;;  %1951 = vperm.xlu1 %2674, %v2868_v24   ;;  %v2315_v20 = vmul.f32 -1.442695, %v3534_v61  ;;  %v2317_v26 = vmul.f32 -1.442695, %v3548_v14 }
 0x1a3   :  { %v1837_v34 = vadd.f32 1.0, %v2870_v27  ;;  %v1589_v36 = vadd.f32 %v3614_v43, %v1442_v29 }
 0x1a4   :  { %v2872_v35 = vpop.eup %2871 }
 0x1a5   :  { %2881 = vrcp.f32 %v1837_v34  ;;  %v1838_v37 = vadd.f32 1.0, %v2872_v35  ;;  %1631 = vst [vmem:[%s3875_s7 + $0xa0] sm:$0xff] %v1589_v36  ;;  %v2347_v38 = vmul.f32 -1.442695, %v1589_v36 }
 0x1a7   :  { %v2874_v39 = vpop.eup %2873  ;;  %2883 = vrcp.f32 %v1838_v37 }
 0x1a8   :  { %2885 = vpow2.f32 %v2347_v38  ;;  %1956 = vperm.xlu0 %2673, %v2874_v39  }
 0x1a9   :  { %v2876_v40 = vpop.eup %2875 }
 0x1aa   :  { %v2878_v41 = vpop.eup %2877  ;;  %1961 = vperm.xlu1 %2674, %v2876_v40   ;;  %v2318_v40 = vmul.f32 -1.442695, %v3555_v28 }
 0x1ab   :  { %v1839_v42 = vadd.f32 1.0, %v2878_v41 }
 0x1ac   :  { %v2880_v46 = vpop.eup %2879 }
 0x1ad   :  { %2887 = vrcp.f32 %v1839_v42  ;;  %v1840_v49 = vadd.f32 1.0, %v2880_v46 }
 0x1af   :  { %v2882_v50 = vpop.eup %2881  ;;  %2889 = vrcp.f32 %v1840_v49 }
 0x1b0   :  { %1966 = vperm.xlu0 %2673, %v2882_v50  }
 0x1b1   :  { %v2884_v43 = vpop.eup %2883 }
 0x1b2   :  { %v2886_v51 = vpop.eup %2885  ;;  %1971 = vperm.xlu1 %2674, %v2884_v43  }
 0x1b3   :  { %v1841_v1 = vadd.f32 1.0, %v2886_v51 }
 0x1b5   :  { %2891 = vrcp.f32 %v1841_v1 }
 0x1b6   :  { %2893 = vpow2.f32 %v2306_v55 }
 0x1b7   :  { %v2888_v52 = vpop.eup %2887  ;;  %2895 = vpow2.f32 %v2307_v56 }
 0x1b8   :  { %1976 = vperm.xlu0 %2673, %v2888_v52   ;;  %2897 = vpow2.f32 %v2308_v57 }
 0x1b9   :  { %v2890_v53 = vpop.eup %2889  ;;  %2899 = vpow2.f32 %v2309_v58 }
 0x1ba   :  { %1981 = vperm.xlu1 %2674, %v2890_v53   ;;  %2901 = vpow2.f32 %v2310_v63 }
 0x1bf   :  { %v2892_v54 = vpop.eup %2891 }
 0x1c0   :  { %1986 = vperm.xlu0 %2673, %v2892_v54   ;;  %v2894_v60 = vpop.eup %2893  ;;  %v2319_v54 = vmul.f32 -1.442695, %v3562_v30 }
 0x1c1   :  { %v1695_v2 = vadd.f32 1.0, %v2894_v60  ;;  %v2896_v4 = vpop.eup %2895 }
 0x1c2   :  { %v1696_v3 = vadd.f32 1.0, %v2896_v4  ;;  %v2898_v7 = vpop.eup %2897 }
 0x1c3   :  { %2903 = vrcp.f32 %v1695_v2  ;;  %v1697_v17 = vadd.f32 1.0, %v2898_v7  ;;  %v2900_v8 = vpop.eup %2899 }
 0x1c4   :  { %2905 = vpow2.f32 %v2311_v6  ;;  %v1698_v9 = vadd.f32 1.0, %v2900_v8  ;;  %v2902_v31 = vpop.eup %2901 }
 0x1c5   :  { %2907 = vrcp.f32 %v1696_v3  ;;  %v1699_v16 = vadd.f32 1.0, %v2902_v31  ;;  %v2320_v3 = vmul.f32 -1.442695, %v3569_v44 }
 0x1c6   :  { %2909 = vpow2.f32 %v2312_v5 }
 0x1c7   :  { %2911 = vrcp.f32 %v1697_v17 }
 0x1c8   :  { %2913 = vpow2.f32 %v2313_v19 }
 0x1c9   :  { %2915 = vrcp.f32 %v1698_v9 }
 0x1cd   :  { %v2904_v10 = vpop.eup %2903 }
 0x1ce   :  { %v2906_v15 = vpop.eup %2905 }
 0x1cf   :  { %v2908_v45 = vpop.eup %2907  ;;  %v1700_v47 = vadd.f32 1.0, %v2906_v15 }
 0x1d0   :  { %v2910_v23 = vpop.eup %2909 }
 0x1d1   :  { %v2912_v24 = vpop.eup %2911  ;;  %v1701_v32 = vadd.f32 1.0, %v2910_v23 }
 0x1d2   :  { %v2914_v29 = vpop.eup %2913 }
 0x1d3   :  { %v2916_v61 = vpop.eup %2915  ;;  %v1702_v36 = vadd.f32 1.0, %v2914_v29 }
 0x1ee   :  { %v1887_v11 = vpop.permute.xlu0 %1886 }
 0x1ef   :  { %v1989_v13 = vmul.f32 %v2904_v10, %v1887_v11  ;;  %v2321_v11 = vmul.f32 -1.442695, %v3576_v48 }
 0x1f1   :  { %2917 = vrsqrt.f32 %v1989_v13  ;;  %vm2012_vm1 = vcmp.eq.f32.partialorder %v1989_v13, inf  ;;  %v2015_v39 = vand.u32 2147483648, %v1989_v13  ;;  %vm2014_vm2 = vcmp.eq.f32.partialorder %v1989_v13, 0.0 }
 0x1f2   :  { %2919 = vpow2.f32 %v2314_v33  ;;  %v1892_v21 = vpop.permute.xlu0 %1891 }
 0x1f3   :  { %v1990_v22 = vmul.f32 %v2908_v45, %v1892_v21  ;;  %2921 = vrcp.f32 %v1699_v16 }
 0x1f5   :  { %2923 = vrsqrt.f32 %v1990_v22  ;;  %vm2019_vm3 = vcmp.eq.f32.partialorder %v1990_v22, inf  ;;  %v2022_v28 = vand.u32 2147483648, %v1990_v22  ;;  %vm2021_vm4 = vcmp.eq.f32.partialorder %v1990_v22, 0.0 }
 0x1f6   :  { %2925 = vpow2.f32 %v2315_v20  ;;  %v1897_v25 = vpop.permute.xlu1 %1896 }
 0x1f7   :  { %2927 = vrcp.f32 %v1700_v47  ;;  %v3712_v27 = vmul.f32 %v2912_v24, %v1897_v25  ;;  %v2322_v24 = vmul.f32 -1.442695, %v3583_v62 }
 0x1f9   :  { %2929 = vrsqrt.f32 %v3712_v27  ;;  %vm2026_vm5 = vcmp.eq.f32.partialorder %v3712_v27, inf  ;;  %v2029_v4 = vand.u32 2147483648, %v3712_v27  ;;  %vm2028_vm6 = vcmp.eq.f32.partialorder %v3712_v27, 0.0 }
 0x1fa   :  { %2931 = vpow2.f32 %v2316_v59  ;;  %v1902_v34 = vpop.permute.xlu1 %1901 }
 0x1fb   :  { %v2918_v35 = vpop.eup %2917  ;;  %2933 = vpow2.f32 %v2317_v26  ;;  %v3715_v37 = vmul.f32 %v2916_v61, %v1902_v34 }
 0x1fc   :  { %v2920_v38 = vpop.eup %2919  ;;  %2935 = vrcp.f32 %v1701_v32  ;;  %v2011_v12 = vmul.f32 %v2918_v35, %v1989_v13 }
 0x1fd   :  { %2937 = vrsqrt.f32 %v3715_v37  ;;  %v2922_v14 = vpop.eup %2921  ;;  %v1703_v49 = vadd.f32 1.0, %v2920_v38  ;;  %vm2033_vm7 = vcmp.eq.f32.partialorder %v3715_v37, inf  ;;  %vm2035_vm8 = vcmp.eq.f32.partialorder %v3715_v37, 0.0 }
 0x1fe   :  { %v2013_v41 = vsel %vm2012_vm1, %v1989_v13, %v2011_v12  ;;  %v1907_v42 = vpop.permute.xlu0 %1906  ;;  %2939 = vrcp.f32 %v1702_v36  ;;  %v2036_v13 = vand.u32 2147483648, %v3715_v37  ;;  %v2323_v36 = vmul.f32 -1.442695, %v3590_v0 }
 0x1ff   :  { %v2924_v46 = vpop.eup %2923  ;;  %v2016_v50 = vsel %vm2014_vm2, %v2015_v39, %v2013_v41  ;;  %v3719_v43 = vmul.f32 %v2922_v14, %v1907_v42 }
 0x200   :  { %v2926_v51 = vpop.eup %2925  ;;  %2157 = vst [vmem:[%s3876_s8] sm:$0xff] %v2016_v50  ;;  %v2018_v1 = vmul.f32 %v2924_v46, %v1990_v22  ;;  %v1912_v52 = vpop.permute.xlu1 %1911 }
 0x201   :  { %v2928_v53 = vpop.eup %2927  ;;  %2941 = vrsqrt.f32 %v3719_v43  ;;  %v1704_v58 = vadd.f32 1.0, %v2926_v51  ;;  %vm2040_vm9 = vcmp.eq.f32.partialorder %v3719_v43, inf  ;;  %vm2042_vm10 = vcmp.eq.f32.partialorder %v3719_v43, 0.0 }
 0x202   :  { %2943 = vpow2.f32 %v2318_v40  ;;  %v2020_v55 = vsel %vm2019_vm3, %v1990_v22, %v2018_v1  ;;  %v3726_v56 = vmul.f32 %v2928_v53, %v1912_v52  ;;  %v2043_v22 = vand.u32 2147483648, %v3719_v43 }
 0x203   :  { %v2930_v57 = vpop.eup %2929  ;;  %2945 = vrcp.f32 %v1703_v49  ;;  %v2023_v60 = vsel %vm2021_vm4, %v2022_v28, %v2020_v55  ;;  %v2324_v49 = vmul.f32 -1.442695, %v3597_v18 }
 0x204   :  { %v2932_v63 = vpop.eup %2931  ;;  %2158 = vst [vmem:[%s3876_s8 + $0x8] sm:$0xff] %v2023_v60  ;;  %v2025_v30 = vmul.f32 %v2930_v57, %v3712_v27  ;;  %2947 = vrsqrt.f32 %v3726_v56  ;;  %vm2047_vm11 = vcmp.eq.f32.partialorder %v3726_v56, inf  ;;  %v2050_v62 = vand.u32 2147483648, %v3726_v56 }
 0x205   :  { %v2934_v2 = vpop.eup %2933  ;;  %2949 = vpow2.f32 %v2319_v54  ;;  %v1705_v8 = vadd.f32 1.0, %v2932_v63  ;;  %vm2049_vm12 = vcmp.eq.f32.partialorder %v3726_v56, 0.0 }
 0x206   :  { %v2936_v6 = vpop.eup %2935  ;;  %v2027_v7 = vsel %vm2026_vm5, %v3712_v27, %v2025_v30  ;;  %v1917_v5 = vpop.permute.xlu0 %1916  ;;  %2951 = vrcp.f32 %v1704_v58  ;;  %v1706_v31 = vadd.f32 1.0, %v2934_v2 }
 0x207   :  { %v2938_v17 = vpop.eup %2937  ;;  %v2030_v19 = vsel %vm2028_vm6, %v2029_v4, %v2027_v7  ;;  %v3738_v9 = vmul.f32 %v2936_v6, %v1917_v5 }
 0x208   :  { %2159 = vst [vmem:[%s3876_s8 + $0x10] sm:$0xff] %v2030_v19  ;;  %v2032_v10 = vmul.f32 %v2938_v17, %v3715_v37  ;;  %v1922_v33 = vpop.permute.xlu1 %1921  ;;  %v2940_v44 = vpop.eup %2939  ;;  %v3020_v17 = vld [vmem:[%s3873_s6 + $0xa0] sm:$0xff] }
 0x209   :  { %2953 = vrsqrt.f32 %v3738_v9  ;;  %v3750_v16 = vmul.f32 %v2940_v44, %v1922_v33  ;;  %vm2054_vm13 = vcmp.eq.f32.partialorder %v3738_v9, inf  ;;  %v2057_v42 = vand.u32 2147483648, %v3738_v9 }
 0x20a   :  { %2955 = vpow2.f32 %v2320_v3  ;;  %v2034_v15 = vsel %vm2033_vm7, %v3715_v37, %v2032_v10  ;;  %vm2056_vm14 = vcmp.eq.f32.partialorder %v3738_v9, 0.0 }
 0x20b   :  { %v2942_v45 = vpop.eup %2941  ;;  %2957 = vrcp.f32 %v1705_v8  ;;  %v2037_v20 = vsel %vm2035_vm8, %v2036_v13, %v2034_v15  ;;  %vm2061_vm15 = vcmp.eq.f32.partialorder %v3750_v16, inf  ;;  %v2064_v18 = vand.u32 2147483648, %v3750_v16 }
 0x20c   :  { %v2944_v21 = vpop.eup %2943  ;;  %2160 = vst [vmem:[%s3876_s8 + $0x18] sm:$0xff] %v2037_v20  ;;  %v2039_v48 = vmul.f32 %v2942_v45, %v3719_v43  ;;  %2959 = vrsqrt.f32 %v3750_v16  ;;  %vm2063_vm0 = vcmp.eq.f32.partialorder %v3750_v16, 0.0  ;;  %v2326_v8 = vmul.f32 -1.442695, %v3020_v17 }
 0x20d   :  { %v2946_v47 = vpop.eup %2945  ;;  %2961 = vpow2.f32 %v2321_v11  ;;  %v1707_v27 = vadd.f32 1.0, %v2944_v21 }
 0x20e   :  { %v2948_v23 = vpop.eup %2947  ;;  %2963 = vrcp.f32 %v1706_v31  ;;  %v2041_v59 = vsel %vm2040_vm9, %v3719_v43, %v2039_v48 }
 0x20f   :  { %v1927_v25 = vpop.permute.xlu0 %1926  ;;  %v2950_v26 = vpop.eup %2949  ;;  %v2044_v29 = vsel %vm2042_vm10, %v2043_v22, %v2041_v59  ;;  %v2046_v32 = vmul.f32 %v2948_v23, %v3726_v56 }
 0x210   :  { %v3763_v61 = vmul.f32 %v2946_v47, %v1927_v25  ;;  %2161 = vst [vmem:[%s3876_s8 + $0x20] sm:$0xff] %v2044_v29  ;;  %v1932_v34 = vpop.permute.xlu1 %1931  ;;  %v2952_v35 = vpop.eup %2951  ;;  %v1708_v38 = vadd.f32 1.0, %v2950_v26 }
 0x211   :  { %v2048_v37 = vsel %vm2047_vm11, %v3726_v56, %v2046_v32  ;;  %v3774_v39 = vmul.f32 %v2952_v35, %v1932_v34  ;;  %v3019_v56 = vld [vmem:[%s3873_s6 + $0x98] sm:$0xff] }
 0x212   :  { %2965 = vrsqrt.f32 %v3763_v61  ;;  %v2051_v12 = vsel %vm2049_vm12, %v2050_v62, %v2048_v37  ;;  %v2325_v57 = vmul.f32 -1.442695, %v3019_v56  ;;  %vm2068_vm1 = vcmp.eq.f32.partialorder %v3763_v61, inf }
 0x213   :  { %2967 = vpow2.f32 %v2322_v24  ;;  %v2954_v14 = vpop.eup %2953  ;;  %2162 = vst [vmem:[%s3876_s8 + $0x28] sm:$0xff] %v2051_v12  ;;  %v2071_v7 = vand.u32 2147483648, %v3763_v61  ;;  %vm2070_vm2 = vcmp.eq.f32.partialorder %v3763_v61, 0.0  ;;  %vm2075_vm3 = vcmp.eq.f32.partialorder %v3774_v39, inf }
 0x214   :  { %2969 = vrcp.f32 %v1707_v27  ;;  %v2956_v40 = vpop.eup %2955  ;;  %v2053_v0 = vmul.f32 %v2954_v14, %v3738_v9  ;;  %v2078_v15 = vand.u32 2147483648, %v3774_v39  ;;  %vm2077_vm4 = vcmp.eq.f32.partialorder %v3774_v39, 0.0 }
 0x215   :  { %2971 = vrsqrt.f32 %v3774_v39  ;;  %v2958_v41 = vpop.eup %2957  ;;  %v1709_v1 = vadd.f32 1.0, %v2956_v40 }
 0x216   :  { %2973 = vpow2.f32 %v2323_v36  ;;  %v2960_v46 = vpop.eup %2959  ;;  %v2055_v50 = vsel %vm2054_vm13, %v3738_v9, %v2053_v0 }
 0x217   :  { %2975 = vrcp.f32 %v1708_v38  ;;  %v1937_v43 = vpop.permute.xlu0 %1936  ;;  %v2962_v51 = vpop.eup %2961  ;;  %v2058_v52 = vsel %vm2056_vm14, %v2057_v42, %v2055_v50  ;;  %v2060_v53 = vmul.f32 %v2960_v46, %v3750_v16 }
 0x218   :  { %v3787_v54 = vmul.f32 %v2958_v41, %v1937_v43  ;;  %v2964_v28 = vpop.eup %2963  ;;  %2163 = vst [vmem:[%s3876_s8 + $0x30] sm:$0xff] %v2058_v52  ;;  %v1942_v55 = vpop.permute.xlu1 %1941  ;;  %v1710_v60 = vadd.f32 1.0, %v2962_v51 }
 0x219   :  { %v2062_v58 = vsel %vm2061_vm15, %v3750_v16, %v2060_v53  ;;  %v3800_v30 = vmul.f32 %v2964_v28, %v1942_v55 }
 0x21a   :  { %2977 = vrsqrt.f32 %v3787_v54  ;;  %v2065_v63 = vsel %vm2063_vm0, %v2064_v18, %v2062_v58  ;;  %vm2082_vm5 = vcmp.eq.f32.partialorder %v3787_v54, inf  ;;  %v2085_v59 = vand.u32 2147483648, %v3787_v54 }
 0x21b   :  { %2979 = vpow2.f32 %v2324_v49  ;;  %2164 = vst [vmem:[%s3876_s8 + $0x38] sm:$0xff] %v2065_v63  ;;  %vm2084_vm6 = vcmp.eq.f32.partialorder %v3787_v54, 0.0  ;;  %vm2089_vm7 = vcmp.eq.f32.partialorder %v3800_v30, inf  ;;  %v2092_v36 = vand.u32 2147483648, %v3800_v30 }
 0x21c   :  { %v2966_v2 = vpop.eup %2965  ;;  %2981 = vrcp.f32 %v1709_v1  ;;  %vm2091_vm8 = vcmp.eq.f32.partialorder %v3800_v30, 0.0 }
 0x21d   :  { %v2968_v4 = vpop.eup %2967  ;;  %v2067_v6 = vmul.f32 %v2966_v2, %v3763_v61  ;;  %2983 = vrsqrt.f32 %v3800_v30 }
 0x21e   :  { %v2970_v3 = vpop.eup %2969  ;;  %2985 = vpow2.f32 %v2325_v57  ;;  %v1711_v10 = vadd.f32 1.0, %v2968_v4 }
 0x21f   :  { %v2972_v5 = vpop.eup %2971  ;;  %2987 = vrcp.f32 %v1710_v60  ;;  %v2069_v19 = vsel %vm2068_vm1, %v3763_v61, %v2067_v6  ;;  %v1947_v9 = vpop.permute.xlu0 %1946 }
 0x220   :  { %v2974_v31 = vpop.eup %2973  ;;  %v2072_v33 = vsel %vm2070_vm2, %v2071_v7, %v2069_v19  ;;  %v2074_v44 = vmul.f32 %v2972_v5, %v3774_v39  ;;  %v2001_v11 = vmul.f32 %v2970_v3, %v1947_v9 }
 0x221   :  { %v2976_v13 = vpop.eup %2975  ;;  %2165 = vst [vmem:[%s3876_s8 + $0x40] sm:$0xff] %v2072_v33  ;;  %v1952_v16 = vpop.permute.xlu1 %1951  ;;  %v1712_v20 = vadd.f32 1.0, %v2974_v31 }
 0x222   :  { %v2076_v45 = vsel %vm2075_vm3, %v3774_v39, %v2074_v44  ;;  %2989 = vrsqrt.f32 %v2001_v11  ;;  %v2002_v48 = vmul.f32 %v2976_v13, %v1952_v16  ;;  %vm2096_vm9 = vcmp.eq.f32.partialorder %v2001_v11, inf }
 0x223   :  { %2991 = vpow2.f32 %v2326_v8  ;;  %v2079_v21 = vsel %vm2077_vm4, %v2078_v15, %v2076_v45  ;;  %v2099_v46 = vand.u32 2147483648, %v2001_v11  ;;  %vm2098_vm10 = vcmp.eq.f32.partialorder %v2001_v11, 0.0 }
 0x224   :  { %v2978_v47 = vpop.eup %2977  ;;  %2993 = vrcp.f32 %v1711_v10  ;;  %2166 = vst [vmem:[%s3876_s8 + $0x48] sm:$0xff] %v2079_v21  ;;  %vm2103_vm11 = vcmp.eq.f32.partialorder %v2002_v48, inf  ;;  %v2106_v28 = vand.u32 2147483648, %v2002_v48  ;;  %vm2105_vm12 = vcmp.eq.f32.partialorder %v2002_v48, 0.0 }
 0x225   :  { %v2980_v22 = vpop.eup %2979  ;;  %v2081_v23 = vmul.f32 %v2978_v47, %v3787_v54  ;;  %2995 = vrsqrt.f32 %v2002_v48 }
 0x226   :  { %v2982_v24 = vpop.eup %2981  ;;  %2997 = vrcp.f32 %v1712_v20  ;;  %v1713_v32 = vadd.f32 1.0, %v2980_v22 }
 0x227   :  { %v2984_v25 = vpop.eup %2983  ;;  %v2083_v26 = vsel %vm2082_vm5, %v3787_v54, %v2081_v23  ;;  %v1957_v27 = vpop.permute.xlu0 %1956 }
 0x228   :  { %v2986_v29 = vpop.eup %2985  ;;  %v2086_v61 = vsel %vm2084_vm6, %v2085_v59, %v2083_v26  ;;  %v2088_v62 = vmul.f32 %v2984_v25, %v3800_v30  ;;  %v2003_v34 = vmul.f32 %v2982_v24, %v1957_v27 }
 0x229   :  { %v2988_v35 = vpop.eup %2987  ;;  %2167 = vst [vmem:[%s3876_s8 + $0x50] sm:$0xff] %v2086_v61  ;;  %v1962_v37 = vpop.permute.xlu1 %1961  ;;  %v1714_v12 = vadd.f32 1.0, %v2986_v29 }
 0x22a   :  { %v2090_v38 = vsel %vm2089_vm7, %v3800_v30, %v2088_v62  ;;  %2999 = vrsqrt.f32 %v2003_v34  ;;  %v2004_v14 = vmul.f32 %v2988_v35, %v1962_v37  ;;  %vm2110_vm13 = vcmp.eq.f32.partialorder %v2003_v34, inf }
 0x22b   :  { %v2093_v39 = vsel %vm2091_vm8, %v2092_v36, %v2090_v38  ;;  %3001 = vrcp.f32 %v1713_v32  ;;  %v2113_v30 = vand.u32 2147483648, %v2003_v34  ;;  %vm2112_vm14 = vcmp.eq.f32.partialorder %v2003_v34, 0.0 }
 0x22c   :  { %v2990_v40 = vpop.eup %2989  ;;  %2168 = vst [vmem:[%s3876_s8 + $0x58] sm:$0xff] %v2093_v39  ;;  %3003 = vrsqrt.f32 %v2004_v14  ;;  %vm2117_vm15 = vcmp.eq.f32.partialorder %v2004_v14, inf  ;;  %v2120_v8 = vand.u32 2147483648, %v2004_v14  ;;  %vm2119_vm0 = vcmp.eq.f32.partialorder %v2004_v14, 0.0 }
 0x22d   :  { %v2992_v0 = vpop.eup %2991  ;;  %v2095_v41 = vmul.f32 %v2990_v40, %v2001_v11  ;;  %3005 = vrcp.f32 %v1714_v12 }
 0x22e   :  { %v2994_v42 = vpop.eup %2993  ;;  %v1715_v51 = vadd.f32 1.0, %v2992_v0 }
 0x22f   :  { %v2996_v49 = vpop.eup %2995  ;;  %v2097_v50 = vsel %vm2096_vm9, %v2001_v11, %v2095_v41  ;;  %v1967_v43 = vpop.permute.xlu0 %1966 }
 0x230   :  { %v2100_v1 = vsel %vm2098_vm10, %v2099_v46, %v2097_v50  ;;  %v2102_v52 = vmul.f32 %v2996_v49, %v2002_v48  ;;  %v2005_v53 = vmul.f32 %v2994_v42, %v1967_v43  ;;  %v2998_v54 = vpop.eup %2997 }
 0x231   :  { %2169 = vst [vmem:[%s3876_s8 + $0x60] sm:$0xff] %v2100_v1  ;;  %v1972_v18 = vpop.permute.xlu1 %1971 }
 0x232   :  { %v2104_v55 = vsel %vm2103_vm11, %v2002_v48, %v2102_v52  ;;  %3007 = vrsqrt.f32 %v2005_v53  ;;  %v2006_v57 = vmul.f32 %v2998_v54, %v1972_v18  ;;  %vm2124_vm1 = vcmp.eq.f32.partialorder %v2005_v53, inf }
 0x233   :  { %v2107_v56 = vsel %vm2105_vm12, %v2106_v28, %v2104_v55  ;;  %3009 = vrcp.f32 %v1715_v51  ;;  %v2127_v13 = vand.u32 2147483648, %v2005_v53  ;;  %vm2126_vm2 = vcmp.eq.f32.partialorder %v2005_v53, 0.0 }
 0x234   :  { %v3000_v58 = vpop.eup %2999  ;;  %2170 = vst [vmem:[%s3876_s8 + $0x68] sm:$0xff] %v2107_v56  ;;  %3011 = vrsqrt.f32 %v2006_v57  ;;  %vm2131_vm3 = vcmp.eq.f32.partialorder %v2006_v57, inf  ;;  %v2134_v47 = vand.u32 2147483648, %v2006_v57  ;;  %vm2133_vm4 = vcmp.eq.f32.partialorder %v2006_v57, 0.0 }
 0x235   :  { %v2109_v60 = vmul.f32 %v3000_v58, %v2003_v34  ;;  %v3002_v63 = vpop.eup %3001 }
 0x236   :  { %v3004_v2 = vpop.eup %3003 }
 0x237   :  { %v2111_v4 = vsel %vm2110_vm13, %v2003_v34, %v2109_v60  ;;  %v1977_v6 = vpop.permute.xlu0 %1976  ;;  %v2116_v7 = vmul.f32 %v3004_v2, %v2004_v14  ;;  %v3006_v17 = vpop.eup %3005 }
 0x238   :  { %v2114_v3 = vsel %vm2112_vm14, %v2113_v30, %v2111_v4  ;;  %v2007_v5 = vmul.f32 %v3002_v63, %v1977_v6 }
 0x239   :  { %2171 = vst [vmem:[%s3876_s8 + $0x70] sm:$0xff] %v2114_v3  ;;  %v1982_v19 = vpop.permute.xlu1 %1981  ;;  %v2118_v9 = vsel %vm2117_vm15, %v2004_v14, %v2116_v7 }
 0x23a   :  { %3013 = vrsqrt.f32 %v2007_v5  ;;  %v2121_v31 = vsel %vm2119_vm0, %v2120_v8, %v2118_v9  ;;  %v2008_v10 = vmul.f32 %v3006_v17, %v1982_v19  ;;  %vm2138_vm5 = vcmp.eq.f32.partialorder %v2007_v5, inf }
 0x23b   :  { %2172 = vst [vmem:[%s3876_s8 + $0x78] sm:$0xff] %v2121_v31  ;;  %v2141_v25 = vand.u32 2147483648, %v2007_v5  ;;  %vm2140_vm6 = vcmp.eq.f32.partialorder %v2007_v5, 0.0 }
 0x23c   :  { %v3008_v33 = vpop.eup %3007  ;;  %3015 = vrsqrt.f32 %v2008_v10  ;;  %vm2145_vm7 = vcmp.eq.f32.partialorder %v2008_v10, inf  ;;  %v2148_v61 = vand.u32 2147483648, %v2008_v10  ;;  %vm2147_vm8 = vcmp.eq.f32.partialorder %v2008_v10, 0.0 }
 0x23d   :  { %v2123_v44 = vmul.f32 %v3008_v33, %v2005_v53  ;;  %v3010_v11 = vpop.eup %3009 }
 0x23e   :  { %v3012_v15 = vpop.eup %3011 }
 0x23f   :  { %v2125_v16 = vsel %vm2124_vm1, %v2005_v53, %v2123_v44  ;;  %v1987_v45 = vpop.permute.xlu0 %1986  ;;  %v2130_v21 = vmul.f32 %v3012_v15, %v2006_v57 }
 0x240   :  { %v2128_v20 = vsel %vm2126_vm2, %v2127_v13, %v2125_v16  ;;  %v2009_v48 = vmul.f32 %v3010_v11, %v1987_v45 }
 0x241   :  { %2173 = vst [vmem:[%s3876_s8 + $0x80] sm:$0xff] %v2128_v20  ;;  %v2132_v22 = vsel %vm2131_vm3, %v2006_v57, %v2130_v21 }
 0x242   :  { %3017 = vrsqrt.f32 %v2009_v48  ;;  %v2135_v23 = vsel %vm2133_vm4, %v2134_v47, %v2132_v22  ;;  %vm2152_vm9 = vcmp.eq.f32.partialorder %v2009_v48, inf  ;;  %v2155_v37 = vand.u32 2147483648, %v2009_v48 }
 0x243   :  { %2174 = vst [vmem:[%s3876_s8 + $0x88] sm:$0xff] %v2135_v23  ;;  %vm2154_vm10 = vcmp.eq.f32.partialorder %v2009_v48, 0.0 }
 0x244   :  { %v3014_v24 = vpop.eup %3013 }
 0x245   :  { %v2137_v59 = vmul.f32 %v3014_v24, %v2007_v5 }
 0x246   :  { %v3016_v26 = vpop.eup %3015 }
 0x247   :  { %v2139_v27 = vsel %vm2138_vm5, %v2007_v5, %v2137_v59  ;;  %v2144_v32 = vmul.f32 %v3016_v26, %v2008_v10 }
 0x248   :  { %v2142_v29 = vsel %vm2140_vm6, %v2141_v25, %v2139_v27 }
 0x249   :  { %2175 = vst [vmem:[%s3876_s8 + $0x90] sm:$0xff] %v2142_v29  ;;  %v2146_v62 = vsel %vm2145_vm7, %v2008_v10, %v2144_v32 }
 0x24a   :  { %v2149_v34 = vsel %vm2147_vm8, %v2148_v61, %v2146_v62 }
 0x24b   :  { %2176 = vst [vmem:[%s3876_s8 + $0x98] sm:$0xff] %v2149_v34 }
 0x24c   :  { %v3018_v35 = vpop.eup %3017 }
 0x24d   :  { %v2151_v36 = vmul.f32 %v3018_v35, %v2009_v48 }
 0x24f   :  { %v2153_v38 = vsel %vm2152_vm9, %v2009_v48, %v2151_v36 }
 0x250   :  { %v2156_v12 = vsel %vm2154_vm10, %v2155_v37, %v2153_v38 }
 0x251   :  { %2177 = vst [vmem:[%s3876_s8 + $0xa0] sm:$0xff] %v2156_v12 }

</bundles_post_ra>
